<compile_context>
chip_gen: v7x
topology: tpu7x:2x2x1
jax: 0.10.0
libtpu: 0.0.40
codegen_flags: <defaults>
</compile_context>

<pallas_src>
import functools

import jax
import jax.numpy as jnp
import numpy as np
from jax import lax
from jax.experimental import pallas as pl
from jax.experimental.pallas import tpu as pltpu

EPS = 1e-5  # nn.BatchNorm2d default eps


# --------------------------------------------------------------------------
# In-kernel helpers
# --------------------------------------------------------------------------
def _partial_stats(a):
    # Per-block [sum; sum_of_squares] over rows -> (2, C).
    return jnp.concatenate(
        [jnp.sum(a, axis=0, keepdims=True),
         jnp.sum(a * a, axis=0, keepdims=True)], axis=0)


def _finalize_bn(stats, gamma, beta, count):
    # Tiny in-kernel finalize of the BN batch stats (biased variance) into a
    # per-channel scale/shift for a single fused FMA.
    s = jnp.sum(stats, axis=0)                       # (2, C)
    mean = s[0:1, :] * (1.0 / count)
    msq = s[1:2, :] * (1.0 / count)
    var = jnp.maximum(msq - mean * mean, 0.0)
    scale = gamma * lax.rsqrt(var + EPS)
    shift = beta - mean * scale
    return scale, shift                              # each (1, C), f32


# --------------------------------------------------------------------------
# Kernels
# --------------------------------------------------------------------------
def _conv1x1_stats_kernel(x_ref, w_ref, out_ref, stats_ref):
    # conv1 (1x1): plain MXU matmul, bf16 operands, f32 accumulation.
    a = jnp.dot(x_ref[...], w_ref[...], preferred_element_type=jnp.float32)
    out_ref[...] = a.astype(out_ref.dtype)
    stats_ref[...] = _partial_stats(a)


def _bn_relu_conv3x3_stats_kernel(stats_ref, g_ref, b_ref, a_ref, w_ref,
                                  out_ref, stats_out_ref, *, width, count):
    hw, cm = a_ref.shape

    # BN1 finalize (folded in) + fused FMA + ReLU in f32, then bf16 for the
    # whole window-building path (v6e/v7x have bf16 VPU; MXU operand is bf16
    # anyway).
    scale, shift = _finalize_bn(stats_ref[...], g_ref[...], b_ref[...], count)
    h1 = jnp.maximum(a_ref[...].astype(jnp.float32) * scale + shift, 0.0)
    h1 = h1.astype(jnp.bfloat16)

    # Width-only tap masks: vertical (dh) out-of-range rows are already zero
    # because the shifted windows are zero-filled at the top/bottom; only
    # horizontal wrap across row boundaries needs masking.
    row = lax.broadcasted_iota(jnp.int32, (hw, 1), 0)
    wi = row % width
    left_ok = wi > 0                 # tap dw = -1
    right_ok = wi < (width - 1)      # tap dw = +1

    # 3x3 / stride 1 / pad 1 conv as im2col: 9 statically shifted windows
    # (direct slices of h1 + small zero blocks; no full padded copy),
    # concatenated along lanes, then ONE deep MXU matmul (HW,9*Cm)x(9*Cm,Cm).
    cols = []
    for dh in (-1, 0, 1):
        for dw in (-1, 0, 1):
            s = dh * width + dw
            if s == 0:
                patch = h1
            elif s < 0:
                patch = jnp.concatenate(
                    [jnp.zeros((-s, cm), jnp.bfloat16),
                     lax.slice_in_dim(h1, 0, hw + s, axis=0)], axis=0)
            else:
                patch = jnp.concatenate(
                    [lax.slice_in_dim(h1, s, hw, axis=0),
                     jnp.zeros((s, cm), jnp.bfloat16)], axis=0)
            if dw == -1:
                patch = jnp.where(left_ok, patch, 0.0)
            elif dw == 1:
                patch = jnp.where(right_ok, patch, 0.0)
            cols.append(patch)
    patches = jnp.concatenate(cols, axis=1)          # (HW, 9*Cm) bf16

    a2 = jnp.dot(patches, w_ref[...], preferred_element_type=jnp.float32)
    out_ref[...] = a2.astype(out_ref.dtype)
    stats_out_ref[...] = _partial_stats(a2)


def _bn_relu_conv1x1_stats_kernel(stats_ref, g_ref, b_ref, a_ref, w_ref,
                                  out_ref, stats_out_ref, *, count):
    scale, shift = _finalize_bn(stats_ref[...], g_ref[...], b_ref[...], count)
    h2 = jnp.maximum(a_ref[...].astype(jnp.float32) * scale + shift, 0.0)
    a3 = jnp.dot(h2.astype(jnp.bfloat16), w_ref[...],
                 preferred_element_type=jnp.float32)
    out_ref[...] = a3.astype(out_ref.dtype)          # bf16 store (HBM saver)
    stats_out_ref[...] = _partial_stats(a3)          # stats on f32 accum


def _bn_residual_relu_kernel(stats_ref, g_ref, b_ref, a_ref, x_ref, out_ref,
                             *, count):
    # BN3 (fused FMA) + identity residual + ReLU, all in f32 after upcast.
    scale, shift = _finalize_bn(stats_ref[...], g_ref[...], b_ref[...], count)
    out_ref[...] = jnp.maximum(
        a_ref[...].astype(jnp.float32) * scale + shift
        + x_ref[...].astype(jnp.float32), 0.0)


# --------------------------------------------------------------------------
# Host-side wrapper
# --------------------------------------------------------------------------
def _pick_row_tile(hw, target=256):
    # Largest multiple-of-8 divisor of hw that is <= target (else whole hw).
    if hw <= target:
        return hw
    start = (target // 8) * 8
    for tr in range(start, 7, -8):
        if hw % tr == 0:
            return tr
    return hw


def bottleneck_forward(x_nchw, params):
    n, cin, h, w = x_nchw.shape
    cm = params["w1"].shape[1]
    cout = params["w3"].shape[1]
    hw = h * w
    count = float(n * hw)

    # NCHW -> per-image (HW, C) rows, channels on lanes.  Cast to bf16 once
    # here (fused into the transpose) so the conv1 read and the residual read
    # are half-width in HBM.
    x3 = (jnp.transpose(x_nchw, (0, 2, 3, 1))
          .reshape(n, hw, cin).astype(jnp.bfloat16))

    # Weights in bf16 (MXU-native); conv biases are dead math (BN cancels).
    w1 = params["w1"].astype(jnp.bfloat16)
    w2f = params["w2"].reshape(9 * cm, cm).astype(jnp.bfloat16)
    w3 = params["w3"].astype(jnp.bfloat16)

    tr = _pick_row_tile(hw)
    n_rt = hw // tr

    par2 = pltpu.CompilerParams(dimension_semantics=("parallel", "parallel"))
    par1 = pltpu.CompilerParams(dimension_semantics=("parallel",))

    def row_spec(ch):                      # (image, row-tile) grid
        return pl.BlockSpec((None, tr, ch), lambda i, j: (i, j, 0))

    def stat_out_spec(ch):
        return pl.BlockSpec((None, 2, ch), lambda i, j: (i * n_rt + j, 0, 0))

    def bcast2(shape):                     # broadcast block, 2-D grid
        return pl.BlockSpec(shape, lambda i, j: (0,) * len(shape))

    def bcast1(shape):                     # broadcast block, 1-D grid
        return pl.BlockSpec(shape, lambda i: (0,) * len(shape))

    # --- 1) conv1 (1x1) + BN1 partial stats ------------------------------
    a1, st1 = pl.pallas_call(
        _conv1x1_stats_kernel,
        grid=(n, n_rt),
        in_specs=[row_spec(cin), bcast2((cin, cm))],
        out_specs=(row_spec(cm), stat_out_spec(cm)),
        out_shape=(jax.ShapeDtypeStruct((n, hw, cm), jnp.bfloat16),
                   jax.ShapeDtypeStruct((n * n_rt, 2, cm), jnp.float32)),
        compiler_params=par2,
    )(x3, w1)

    # --- 2) BN1+ReLU + conv2 (3x3 im2col) + BN2 partial stats ------------
    a2, st2 = pl.pallas_call(
        functools.partial(_bn_relu_conv3x3_stats_kernel, width=w, count=count),
        grid=(n,),
        in_specs=[bcast1((n * n_rt, 2, cm)), bcast1((1, cm)), bcast1((1, cm)),
                  pl.BlockSpec((None, hw, cm), lambda i: (i, 0, 0)),
                  bcast1((9 * cm, cm))],
        out_specs=(pl.BlockSpec((None, hw, cm), lambda i: (i, 0, 0)),
                   pl.BlockSpec((None, 2, cm), lambda i: (i, 0, 0))),
        out_shape=(jax.ShapeDtypeStruct((n, hw, cm), jnp.bfloat16),
                   jax.ShapeDtypeStruct((n, 2, cm), jnp.float32)),
        compiler_params=par1,
    )(st1, params["g1"], params["be1"], a1, w2f)

    # --- 3) BN2+ReLU + conv3 (1x1) + BN3 partial stats --------------------
    a3, st3 = pl.pallas_call(
        functools.partial(_bn_relu_conv1x1_stats_kernel, count=count),
        grid=(n, n_rt),
        in_specs=[bcast2((n, 2, cm)), bcast2((1, cm)), bcast2((1, cm)),
                  row_spec(cm), bcast2((cm, cout))],
        out_specs=(row_spec(cout), stat_out_spec(cout)),
        out_shape=(jax.ShapeDtypeStruct((n, hw, cout), jnp.bfloat16),
                   jax.ShapeDtypeStruct((n * n_rt, 2, cout), jnp.float32)),
        compiler_params=par2,
    )(st2, params["g2"], params["be2"], a2, w3)

    # --- 4) BN3 + identity residual + ReLU --------------------------------
    out3 = pl.pallas_call(
        functools.partial(_bn_residual_relu_kernel, count=count),
        grid=(n, n_rt),
        in_specs=[bcast2((n * n_rt, 2, cout)), bcast2((1, cout)),
                  bcast2((1, cout)), row_spec(cout), row_spec(cin)],
        out_specs=row_spec(cout),
        out_shape=jax.ShapeDtypeStruct((n, hw, cout), jnp.float32),
        compiler_params=par2,
    )(st3, params["g3"], params["be3"], a3, x3)

    return jnp.transpose(out3.reshape(n, h, w, cout), (0, 3, 1, 2))


def bottleneck_reference(x_nchw, params):
    # Pure-JAX f32 reference (lax convs, with conv biases) for correctness.
    x = jnp.transpose(x_nchw, (0, 2, 3, 1))
    cm = params["w1"].shape[1]

    def bn(a, g, b):
        mean = jnp.mean(a, axis=(0, 1, 2), keepdims=True)
        var = jnp.mean((a - mean) ** 2, axis=(0, 1, 2), keepdims=True)
        return (a - mean) * lax.rsqrt(var + EPS) * g + b

    def conv(a, w_hwio, bias, padding):
        y = lax.conv_general_dilated(
            a, w_hwio, window_strides=(1, 1), padding=padding,
            dimension_numbers=("NHWC", "HWIO", "NHWC"))
        return y + bias

    w1 = params["w1"][None, None]
    w2 = params["w2"].reshape(3, 3, cm, cm)
    w3 = params["w3"][None, None]

    h1 = jax.nn.relu(bn(conv(x, w1, params["b1"], "VALID"),
                        params["g1"], params["be1"]))
    h2 = jax.nn.relu(bn(conv(h1, w2, params["b2"], [(1, 1), (1, 1)]),
                        params["g2"], params["be2"]))
    h3 = bn(conv(h2, w3, params["b3"], "VALID"),
            params["g3"], params["be3"])
    out = jax.nn.relu(h3 + x)
    return jnp.transpose(out, (0, 3, 1, 2))


if __name__ == "__main__":
    N, H, W = 2, 16, 16
    out_channels = 32                # bottleneck width Cm
    cm = out_channels
    cin = out_channels * 4           # identity path requires Cin == 4*Cm, stride=1
    cout = out_channels * 4          # lane-dense (128) output channels

    key = jax.random.PRNGKey(0)
    ks = jax.random.split(key, 13)
    params = {
        "w1": 0.1 * jax.random.normal(ks[0], (cin, cm), jnp.float32),
        "b1": 0.1 * jax.random.normal(ks[1], (1, cm), jnp.float32),
        "g1": 1.0 + 0.1 * jax.random.normal(ks[2], (1, cm), jnp.float32),
        "be1": 0.1 * jax.random.normal(ks[3], (1, cm), jnp.float32),
        "w2": 0.1 * jax.random.normal(ks[4], (9, cm, cm), jnp.float32),
        "b2": 0.1 * jax.random.normal(ks[5], (1, cm), jnp.float32),
        "g2": 1.0 + 0.1 * jax.random.normal(ks[6], (1, cm), jnp.float32),
        "be2": 0.1 * jax.random.normal(ks[7], (1, cm), jnp.float32),
        "w3": 0.1 * jax.random.normal(ks[8], (cm, cout), jnp.float32),
        "b3": 0.1 * jax.random.normal(ks[9], (1, cout), jnp.float32),
        "g3": 1.0 + 0.1 * jax.random.normal(ks[10], (1, cout), jnp.float32),
        "be3": 0.1 * jax.random.normal(ks[11], (1, cout), jnp.float32),
    }
    x = jax.random.normal(ks[12], (N, cin, H, W), jnp.float32)  # NCHW like PyTorch

    fwd = jax.jit(bottleneck_forward)
    out = jax.block_until_ready(fwd(x, params))
    ref = jax.block_until_ready(bottleneck_reference(x, params))
    # Tolerance accounts for bf16 activations/intermediates (x3/a1/a2/a3) and
    # bf16 MXU operands through 3 convs + 3 BNs vs the all-f32 reference.
    np.testing.assert_allclose(np.asarray(out), np.asarray(ref),
                               rtol=5e-2, atol=1e-1)
    print("KERNEL_OK")
</pallas_src>

<mosaic_0001>
module attributes {stable_mosaic.version = 11 : i64} {
  func.func @_conv1x1_stats_kernel(%arg0: i32, %arg1: i32, %arg2: memref<1x256x128xbf16, #tpu.memory_space<vmem>>, %arg3: memref<128x32xbf16, #tpu.memory_space<vmem>>, %arg4: memref<1x256x32xbf16, #tpu.memory_space<vmem>>, %arg5: memref<1x2x32xf32, #tpu.memory_space<vmem>>) attributes {dimension_semantics = [#tpu.dimension_semantics<parallel>, #tpu.dimension_semantics<parallel>], iteration_bounds = array<i64: 2, 1>, scalar_prefetch = 0 : i64, scratch_operands = 0 : i64, tpu.core_type = #tpu.core_type<tc>, window_params = [{transform_indices = @transform_0, window_bounds = array<i64: 1, 256, 128>}, {pipeline_mode = #tpu.pipeline_mode<synchronous>, transform_indices = @transform_1, window_bounds = array<i64: 128, 32>}, {transform_indices = @transform_2, window_bounds = array<i64: 1, 256, 32>}, {transform_indices = @transform_3, window_bounds = array<i64: 1, 2, 32>}]} {
    %c0 = arith.constant 0 : index
    %c0_0 = arith.constant 0 : index
    %c0_1 = arith.constant 0 : index
    %0 = vector.load %arg2[%c0, %c0_0, %c0_1] : memref<1x256x128xbf16, #tpu.memory_space<vmem>>, vector<1x256x128xbf16>
    %1 = vector.shape_cast %0 : vector<1x256x128xbf16> to vector<256x128xbf16>
    %c0_2 = arith.constant 0 : index
    %c0_3 = arith.constant 0 : index
    %2 = vector.load %arg3[%c0_2, %c0_3] : memref<128x32xbf16, #tpu.memory_space<vmem>>, vector<128x32xbf16>
    %cst = arith.constant dense<0.000000e+00> : vector<256x32xf32>
    %3 = tpu.matmul %1, %2, %cst {dimension_numbers = #tpu.dot_dimension_numbers<[1], [0], [0], [1], [0, 0, 1, 1], [], []>} : vector<256x128xbf16>, vector<128x32xbf16>, vector<256x32xf32> -> vector<256x32xf32>
    %4 = arith.truncf %3 : vector<256x32xf32> to vector<256x32xbf16>
    %c0_4 = arith.constant 0 : index
    %c0_5 = arith.constant 0 : index
    %c0_6 = arith.constant 0 : index
    %5 = vector.load %arg4[%c0_4, %c0_5, %c0_6] : memref<1x256x32xbf16, #tpu.memory_space<vmem>>, vector<1x256x32xbf16>
    %6 = vector.shape_cast %5 : vector<1x256x32xbf16> to vector<256x32xbf16>
    %7 = vector.shape_cast %4 : vector<256x32xbf16> to vector<1x256x32xbf16>
    tpu.vector_store %arg4[%c0_4, %c0_5, %c0_6], %7 {strides = array<i32>} : memref<1x256x32xbf16, #tpu.memory_space<vmem>>, vector<1x256x32xbf16>,
    %cst_7 = arith.constant dense<0.000000e+00> : vector<32xf32>
    %8 = vector.multi_reduction <add>, %3, %cst_7 [0] : vector<256x32xf32> to vector<32xf32>
    %9 = vector.shape_cast %8 : vector<32xf32> to vector<1x32xf32>
    %10 = arith.mulf %3, %3 : vector<256x32xf32>
    %cst_8 = arith.constant dense<0.000000e+00> : vector<32xf32>
    %11 = vector.multi_reduction <add>, %10, %cst_8 [0] : vector<256x32xf32> to vector<32xf32>
    %12 = vector.shape_cast %11 : vector<32xf32> to vector<1x32xf32>
    %13 = tpu.concatenate %9, %12 in 0 : vector<1x32xf32>, vector<1x32xf32> -> vector<2x32xf32>
    %c0_9 = arith.constant 0 : index
    %c0_10 = arith.constant 0 : index
    %c0_11 = arith.constant 0 : index
    %14 = vector.load %arg5[%c0_9, %c0_10, %c0_11] : memref<1x2x32xf32, #tpu.memory_space<vmem>>, vector<1x2x32xf32>
    %15 = vector.shape_cast %14 : vector<1x2x32xf32> to vector<2x32xf32>
    %16 = vector.shape_cast %13 : vector<2x32xf32> to vector<1x2x32xf32>
    tpu.vector_store %arg5[%c0_9, %c0_10, %c0_11], %16 {strides = array<i32>} : memref<1x2x32xf32, #tpu.memory_space<vmem>>, vector<1x2x32xf32>,
    return
  }
  func.func @transform_0(%arg0: i32, %arg1: i32) -> (i32, i32, i32) {
    %c0_i32 = arith.constant 0 : i32
    %c0_i32_0 = arith.constant 0 : i32
    return %arg0, %arg1, %c0_i32 : i32, i32, i32
  }
  func.func @transform_1(%arg0: i32, %arg1: i32) -> (i32, i32) {
    %c0_i32 = arith.constant 0 : i32
    %c0_i32_0 = arith.constant 0 : i32
    %c0_i32_1 = arith.constant 0 : i32
    return %c0_i32, %c0_i32_0 : i32, i32
  }
  func.func @transform_2(%arg0: i32, %arg1: i32) -> (i32, i32, i32) {
    %c0_i32 = arith.constant 0 : i32
    %c0_i32_0 = arith.constant 0 : i32
    return %arg0, %arg1, %c0_i32 : i32, i32, i32
  }
  func.func @transform_3(%arg0: i32, %arg1: i32) -> (i32, i32, i32) {
    %c1_i32 = arith.constant 1 : i32
    %0 = arith.muli %arg0, %c1_i32 : i32
    %1 = arith.addi %0, %arg1 : i32
    %c0_i32 = arith.constant 0 : i32
    %c0_i32_0 = arith.constant 0 : i32
    %c0_i32_1 = arith.constant 0 : i32
    return %1, %c0_i32, %c0_i32_0 : i32, i32, i32
  }
}

module attributes {stable_mosaic.version = 11 : i64} {
  func.func @_bn_relu_conv1x1_stats_kernel(%arg0: i32, %arg1: i32, %arg2: memref<2x2x32xf32, #tpu.memory_space<vmem>>, %arg3: memref<1x32xf32, #tpu.memory_space<vmem>>, %arg4: memref<1x32xf32, #tpu.memory_space<vmem>>, %arg5: memref<1x256x32xbf16, #tpu.memory_space<vmem>>, %arg6: memref<32x128xbf16, #tpu.memory_space<vmem>>, %arg7: memref<1x256x128xbf16, #tpu.memory_space<vmem>>, %arg8: memref<1x2x128xf32, #tpu.memory_space<vmem>>) attributes {dimension_semantics = [#tpu.dimension_semantics<parallel>, #tpu.dimension_semantics<parallel>], iteration_bounds = array<i64: 2, 1>, scalar_prefetch = 0 : i64, scratch_operands = 0 : i64, tpu.core_type = #tpu.core_type<tc>, window_params = [{pipeline_mode = #tpu.pipeline_mode<synchronous>, transform_indices = @transform_0, window_bounds = array<i64: 2, 2, 32>}, {pipeline_mode = #tpu.pipeline_mode<synchronous>, transform_indices = @transform_1, window_bounds = array<i64: 1, 32>}, {pipeline_mode = #tpu.pipeline_mode<synchronous>, transform_indices = @transform_2, window_bounds = array<i64: 1, 32>}, {transform_indices = @transform_3, window_bounds = array<i64: 1, 256, 32>}, {pipeline_mode = #tpu.pipeline_mode<synchronous>, transform_indices = @transform_4, window_bounds = array<i64: 32, 128>}, {transform_indices = @transform_5, window_bounds = array<i64: 1, 256, 128>}, {transform_indices = @transform_6, window_bounds = array<i64: 1, 2, 128>}]} {
    %c0 = arith.constant 0 : index
    %c0_0 = arith.constant 0 : index
    %c0_1 = arith.constant 0 : index
    %0 = vector.load %arg2[%c0, %c0_0, %c0_1] : memref<2x2x32xf32, #tpu.memory_space<vmem>>, vector<2x2x32xf32>
    %c0_2 = arith.constant 0 : index
    %c0_3 = arith.constant 0 : index
    %1 = vector.load %arg3[%c0_2, %c0_3] : memref<1x32xf32, #tpu.memory_space<vmem>>, vector<1x32xf32>
    %c0_4 = arith.constant 0 : index
    %c0_5 = arith.constant 0 : index
    %2 = vector.load %arg4[%c0_4, %c0_5] : memref<1x32xf32, #tpu.memory_space<vmem>>, vector<1x32xf32>
    %cst = arith.constant dense<0.000000e+00> : vector<2x32xf32>
    %3 = vector.multi_reduction <add>, %0, %cst [0] : vector<2x2x32xf32> to vector<2x32xf32>
    %4 = vector.extract_strided_slice %3 {offsets = [0, 0], sizes = [1, 32], strides = [1, 1]} : vector<2x32xf32> to vector<1x32xf32>
    %cst_6 = arith.constant 0.001953125 : f32
    %5 = vector.broadcast %cst_6 : f32 to vector<1x32xf32>
    %6 = arith.mulf %4, %5 : vector<1x32xf32>
    %7 = vector.extract_strided_slice %3 {offsets = [1, 0], sizes = [1, 32], strides = [1, 1]} : vector<2x32xf32> to vector<1x32xf32>
    %cst_7 = arith.constant 0.001953125 : f32
    %8 = vector.broadcast %cst_7 : f32 to vector<1x32xf32>
    %9 = arith.mulf %7, %8 : vector<1x32xf32>
    %10 = arith.mulf %6, %6 : vector<1x32xf32>
    %11 = arith.subf %9, %10 : vector<1x32xf32>
    %cst_8 = arith.constant 0.000000e+00 : f32
    %12 = vector.broadcast %cst_8 : f32 to vector<1x32xf32>
    %13 = arith.maximumf %11, %12 : vector<1x32xf32>
    %cst_9 = arith.constant 9.99999974E-6 : f32
    %14 = vector.broadcast %cst_9 : f32 to vector<1x32xf32>
    %15 = arith.addf %13, %14 : vector<1x32xf32>
    %16 = math.rsqrt %15 : vector<1x32xf32>
    %17 = arith.mulf %1, %16 : vector<1x32xf32>
    %18 = arith.mulf %6, %17 : vector<1x32xf32>
    %19 = arith.subf %2, %18 : vector<1x32xf32>
    %c0_10 = arith.constant 0 : index
    %c0_11 = arith.constant 0 : index
    %c0_12 = arith.constant 0 : index
    %20 = vector.load %arg5[%c0_10, %c0_11, %c0_12] : memref<1x256x32xbf16, #tpu.memory_space<vmem>>, vector<1x256x32xbf16>
    %21 = vector.shape_cast %20 : vector<1x256x32xbf16> to vector<256x32xbf16>
    %22 = arith.extf %21 : vector<256x32xbf16> to vector<256x32xf32>
    %23 = vector.broadcast %17 : vector<1x32xf32> to vector<256x32xf32>
    %24 = arith.mulf %22, %23 : vector<256x32xf32>
    %25 = vector.broadcast %19 : vector<1x32xf32> to vector<256x32xf32>
    %26 = arith.addf %24, %25 : vector<256x32xf32>
    %cst_13 = arith.constant 0.000000e+00 : f32
    %27 = vector.broadcast %cst_13 : f32 to vector<256x32xf32>
    %28 = arith.maximumf %26, %27 : vector<256x32xf32>
    %29 = arith.truncf %28 : vector<256x32xf32> to vector<256x32xbf16>
    %c0_14 = arith.constant 0 : index
    %c0_15 = arith.constant 0 : index
    %30 = vector.load %arg6[%c0_14, %c0_15] : memref<32x128xbf16, #tpu.memory_space<vmem>>, vector<32x128xbf16>
    %cst_16 = arith.constant dense<0.000000e+00> : vector<256x128xf32>
    %31 = tpu.matmul %29, %30, %cst_16 {dimension_numbers = #tpu.dot_dimension_numbers<[1], [0], [0], [1], [0, 0, 1, 1], [], []>} : vector<256x32xbf16>, vector<32x128xbf16>, vector<256x128xf32> -> vector<256x128xf32>
    %32 = arith.truncf %31 : vector<256x128xf32> to vector<256x128xbf16>
    %c0_17 = arith.constant 0 : index
    %c0_18 = arith.constant 0 : index
    %c0_19 = arith.constant 0 : index
    %33 = vector.load %arg7[%c0_17, %c0_18, %c0_19] : memref<1x256x128xbf16, #tpu.memory_space<vmem>>, vector<1x256x128xbf16>
    %34 = vector.shape_cast %33 : vector<1x256x128xbf16> to vector<256x128xbf16>
    %35 = vector.shape_cast %32 : vector<256x128xbf16> to vector<1x256x128xbf16>
    tpu.vector_store %arg7[%c0_17, %c0_18, %c0_19], %35 {strides = array<i32>} : memref<1x256x128xbf16, #tpu.memory_space<vmem>>, vector<1x256x128xbf16>,
    %cst_20 = arith.constant dense<0.000000e+00> : vector<128xf32>
    %36 = vector.multi_reduction <add>, %31, %cst_20 [0] : vector<256x128xf32> to vector<128xf32>
    %37 = vector.shape_cast %36 : vector<128xf32> to vector<1x128xf32>
    %38 = arith.mulf %31, %31 : vector<256x128xf32>
    %cst_21 = arith.constant dense<0.000000e+00> : vector<128xf32>
    %39 = vector.multi_reduction <add>, %38, %cst_21 [0] : vector<256x128xf32> to vector<128xf32>
    %40 = vector.shape_cast %39 : vector<128xf32> to vector<1x128xf32>
    %41 = tpu.concatenate %37, %40 in 0 : vector<1x128xf32>, vector<1x128xf32> -> vector<2x128xf32>
    %c0_22 = arith.constant 0 : index
    %c0_23 = arith.constant 0 : index
    %c0_24 = arith.constant 0 : index
    %42 = vector.load %arg8[%c0_22, %c0_23, %c0_24] : memref<1x2x128xf32, #tpu.memory_space<vmem>>, vector<1x2x128xf32>
    %43 = vector.shape_cast %42 : vector<1x2x128xf32> to vector<2x128xf32>
    %44 = vector.shape_cast %41 : vector<2x128xf32> to vector<1x2x128xf32>
    tpu.vector_store %arg8[%c0_22, %c0_23, %c0_24], %44 {strides = array<i32>} : memref<1x2x128xf32, #tpu.memory_space<vmem>>, vector<1x2x128xf32>,
    return
  }
  func.func @transform_0(%arg0: i32, %arg1: i32) -> (i32, i32, i32) {
    %c0_i32 = arith.constant 0 : i32
    %c0_i32_0 = arith.constant 0 : i32
    %c0_i32_1 = arith.constant 0 : i32
    %c0_i32_2 = arith.constant 0 : i32
    return %c0_i32, %c0_i32_0, %c0_i32_1 : i32, i32, i32
  }
  func.func @transform_1(%arg0: i32, %arg1: i32) -> (i32, i32) {
    %c0_i32 = arith.constant 0 : i32
    %c0_i32_0 = arith.constant 0 : i32
    %c0_i32_1 = arith.constant 0 : i32
    return %c0_i32, %c0_i32_0 : i32, i32
  }
  func.func @transform_2(%arg0: i32, %arg1: i32) -> (i32, i32) {
    %c0_i32 = arith.constant 0 : i32
    %c0_i32_0 = arith.constant 0 : i32
    %c0_i32_1 = arith.constant 0 : i32
    return %c0_i32, %c0_i32_0 : i32, i32
  }
  func.func @transform_3(%arg0: i32, %arg1: i32) -> (i32, i32, i32) {
    %c0_i32 = arith.constant 0 : i32
    %c0_i32_0 = arith.constant 0 : i32
    return %arg0, %arg1, %c0_i32 : i32, i32, i32
  }
  func.func @transform_4(%arg0: i32, %arg1: i32) -> (i32, i32) {
    %c0_i32 = arith.constant 0 : i32
    %c0_i32_0 = arith.constant 0 : i32
    %c0_i32_1 = arith.constant 0 : i32
    return %c0_i32, %c0_i32_0 : i32, i32
  }
  func.func @transform_5(%arg0: i32, %arg1: i32) -> (i32, i32, i32) {
    %c0_i32 = arith.constant 0 : i32
    %c0_i32_0 = arith.constant 0 : i32
    return %arg0, %arg1, %c0_i32 : i32, i32, i32
  }
  func.func @transform_6(%arg0: i32, %arg1: i32) -> (i32, i32, i32) {
    %c1_i32 = arith.constant 1 : i32
    %0 = arith.muli %arg0, %c1_i32 : i32
    %1 = arith.addi %0, %arg1 : i32
    %c0_i32 = arith.constant 0 : i32
    %c0_i32_0 = arith.constant 0 : i32
    %c0_i32_1 = arith.constant 0 : i32
    return %1, %c0_i32, %c0_i32_0 : i32, i32, i32
  }
}

module attributes {stable_mosaic.version = 11 : i64} {
  func.func @_bn_relu_conv3x3_stats_kernel(%arg0: i32, %arg1: memref<2x2x32xf32, #tpu.memory_space<vmem>>, %arg2: memref<1x32xf32, #tpu.memory_space<vmem>>, %arg3: memref<1x32xf32, #tpu.memory_space<vmem>>, %arg4: memref<1x256x32xbf16, #tpu.memory_space<vmem>>, %arg5: memref<288x32xbf16, #tpu.memory_space<vmem>>, %arg6: memref<1x256x32xbf16, #tpu.memory_space<vmem>>, %arg7: memref<1x2x32xf32, #tpu.memory_space<vmem>>) attributes {dimension_semantics = [#tpu.dimension_semantics<parallel>], iteration_bounds = array<i64: 2>, scalar_prefetch = 0 : i64, scratch_operands = 0 : i64, tpu.core_type = #tpu.core_type<tc>, window_params = [{pipeline_mode = #tpu.pipeline_mode<synchronous>, transform_indices = @transform_0, window_bounds = array<i64: 2, 2, 32>}, {pipeline_mode = #tpu.pipeline_mode<synchronous>, transform_indices = @transform_1, window_bounds = array<i64: 1, 32>}, {pipeline_mode = #tpu.pipeline_mode<synchronous>, transform_indices = @transform_2, window_bounds = array<i64: 1, 32>}, {transform_indices = @transform_3, window_bounds = array<i64: 1, 256, 32>}, {pipeline_mode = #tpu.pipeline_mode<synchronous>, transform_indices = @transform_4, window_bounds = array<i64: 288, 32>}, {transform_indices = @transform_5, window_bounds = array<i64: 1, 256, 32>}, {transform_indices = @transform_6, window_bounds = array<i64: 1, 2, 32>}]} {
    %c0 = arith.constant 0 : index
    %c0_0 = arith.constant 0 : index
    %c0_1 = arith.constant 0 : index
    %0 = vector.load %arg1[%c0, %c0_0, %c0_1] : memref<2x2x32xf32, #tpu.memory_space<vmem>>, vector<2x2x32xf32>
    %c0_2 = arith.constant 0 : index
    %c0_3 = arith.constant 0 : index
    %1 = vector.load %arg2[%c0_2, %c0_3] : memref<1x32xf32, #tpu.memory_space<vmem>>, vector<1x32xf32>
    %c0_4 = arith.constant 0 : index
    %c0_5 = arith.constant 0 : index
    %2 = vector.load %arg3[%c0_4, %c0_5] : memref<1x32xf32, #tpu.memory_space<vmem>>, vector<1x32xf32>
    %cst = arith.constant dense<0.000000e+00> : vector<2x32xf32>
    %3 = vector.multi_reduction <add>, %0, %cst [0] : vector<2x2x32xf32> to vector<2x32xf32>
    %4 = vector.extract_strided_slice %3 {offsets = [0, 0], sizes = [1, 32], strides = [1, 1]} : vector<2x32xf32> to vector<1x32xf32>
    %cst_6 = arith.constant 0.001953125 : f32
    %5 = vector.broadcast %cst_6 : f32 to vector<1x32xf32>
    %6 = arith.mulf %4, %5 : vector<1x32xf32>
    %7 = vector.extract_strided_slice %3 {offsets = [1, 0], sizes = [1, 32], strides = [1, 1]} : vector<2x32xf32> to vector<1x32xf32>
    %cst_7 = arith.constant 0.001953125 : f32
    %8 = vector.broadcast %cst_7 : f32 to vector<1x32xf32>
    %9 = arith.mulf %7, %8 : vector<1x32xf32>
    %10 = arith.mulf %6, %6 : vector<1x32xf32>
    %11 = arith.subf %9, %10 : vector<1x32xf32>
    %cst_8 = arith.constant 0.000000e+00 : f32
    %12 = vector.broadcast %cst_8 : f32 to vector<1x32xf32>
    %13 = arith.maximumf %11, %12 : vector<1x32xf32>
    %cst_9 = arith.constant 9.99999974E-6 : f32
    %14 = vector.broadcast %cst_9 : f32 to vector<1x32xf32>
    %15 = arith.addf %13, %14 : vector<1x32xf32>
    %16 = math.rsqrt %15 : vector<1x32xf32>
    %17 = arith.mulf %1, %16 : vector<1x32xf32>
    %18 = arith.mulf %6, %17 : vector<1x32xf32>
    %19 = arith.subf %2, %18 : vector<1x32xf32>
    %c0_10 = arith.constant 0 : index
    %c0_11 = arith.constant 0 : index
    %c0_12 = arith.constant 0 : index
    %20 = vector.load %arg4[%c0_10, %c0_11, %c0_12] : memref<1x256x32xbf16, #tpu.memory_space<vmem>>, vector<1x256x32xbf16>
    %21 = vector.shape_cast %20 : vector<1x256x32xbf16> to vector<256x32xbf16>
    %22 = arith.extf %21 : vector<256x32xbf16> to vector<256x32xf32>
    %23 = vector.broadcast %17 : vector<1x32xf32> to vector<256x32xf32>
    %24 = arith.mulf %22, %23 : vector<256x32xf32>
    %25 = vector.broadcast %19 : vector<1x32xf32> to vector<256x32xf32>
    %26 = arith.addf %24, %25 : vector<256x32xf32>
    %cst_13 = arith.constant 0.000000e+00 : f32
    %27 = vector.broadcast %cst_13 : f32 to vector<256x32xf32>
    %28 = arith.maximumf %26, %27 : vector<256x32xf32>
    %29 = arith.truncf %28 : vector<256x32xf32> to vector<256x32xbf16>
    %30 = tpu.iota {dimensions = array<i32: 0>} : vector<256x1xi32>
    %c16_i32 = arith.constant 16 : i32
    %c0_i32 = arith.constant 0 : i32
    %31 = arith.cmpi eq, %c16_i32, %c0_i32 : i32
    %c1_i32 = arith.constant 1 : i32
    %32 = arith.select %31, %c1_i32, %c16_i32 : i32
    %33 = vector.broadcast %32 : i32 to vector<256x1xi32>
    %34 = arith.remsi %30, %33 : vector<256x1xi32>
    %c0_i32_14 = arith.constant 0 : i32
    %35 = vector.broadcast %c0_i32_14 : i32 to vector<256x1xi32>
    %36 = arith.cmpi ne, %34, %35 : vector<256x1xi32>
    %c0_i32_15 = arith.constant 0 : i32
    %37 = vector.broadcast %c0_i32_15 : i32 to vector<256x1xi32>
    %38 = arith.cmpi slt, %34, %37 : vector<256x1xi32>
    %c0_i32_16 = arith.constant 0 : i32
    %39 = arith.cmpi slt, %32, %c0_i32_16 : i32
    %40 = vector.broadcast %39 : i1 to vector<256x1xi1>
    %41 = vector.broadcast %40 : vector<256x1xi1> to vector<256x1xi1>
    %42 = arith.xori %38, %41 : vector<256x1xi1>
    %43 = arith.andi %42, %36 : vector<256x1xi1>
    %44 = vector.broadcast %32 : i32 to vector<256x1xi32>
    %45 = arith.addi %34, %44 : vector<256x1xi32>
    %46 = arith.select %43, %45, %34 : vector<256x1xi1>, vector<256x1xi32>
    %c0_i32_17 = arith.constant 0 : i32
    %47 = vector.broadcast %c0_i32_17 : i32 to vector<256x1xi32>
    %48 = arith.cmpi sgt, %46, %47 : vector<256x1xi32>
    %c15_i32 = arith.constant 15 : i32
    %49 = vector.broadcast %c15_i32 : i32 to vector<256x1xi32>
    %50 = arith.cmpi slt, %46, %49 : vector<256x1xi32>
    %cst_18 = arith.constant 0.000000e+00 : bf16
    %51 = vector.broadcast %cst_18 : bf16 to vector<17x32xbf16>
    %52 = vector.extract_strided_slice %29 {offsets = [0, 0], sizes = [239, 32], strides = [1, 1]} : vector<256x32xbf16> to vector<239x32xbf16>
    %53 = tpu.concatenate %51, %52 in 0 : vector<17x32xbf16>, vector<239x32xbf16> -> vector<256x32xbf16>
    %cst_19 = arith.constant 0.000000e+00 : f32
    %54 = arith.truncf %cst_19 : f32 to bf16
    %55 = vector.shape_cast %48 : vector<256x1xi1> to vector<256x1xi1>
    %56 = vector.broadcast %55 : vector<256x1xi1> to vector<256x32xi1>
    %57 = vector.broadcast %54 : bf16 to vector<256x32xbf16>
    %58 = arith.select %56, %53, %57 : vector<256x32xi1>, vector<256x32xbf16>
    %cst_20 = arith.constant 0.000000e+00 : bf16
    %59 = vector.broadcast %cst_20 : bf16 to vector<16x32xbf16>
    %60 = vector.extract_strided_slice %29 {offsets = [0, 0], sizes = [240, 32], strides = [1, 1]} : vector<256x32xbf16> to vector<240x32xbf16>
    %61 = tpu.concatenate %59, %60 in 0 : vector<16x32xbf16>, vector<240x32xbf16> -> vector<256x32xbf16>
    %cst_21 = arith.constant 0.000000e+00 : bf16
    %62 = vector.broadcast %cst_21 : bf16 to vector<15x32xbf16>
    %63 = vector.extract_strided_slice %29 {offsets = [0, 0], sizes = [241, 32], strides = [1, 1]} : vector<256x32xbf16> to vector<241x32xbf16>
    %64 = tpu.concatenate %62, %63 in 0 : vector<15x32xbf16>, vector<241x32xbf16> -> vector<256x32xbf16>
    %cst_22 = arith.constant 0.000000e+00 : f32
    %65 = arith.truncf %cst_22 : f32 to bf16
    %66 = vector.shape_cast %50 : vector<256x1xi1> to vector<256x1xi1>
    %67 = vector.broadcast %66 : vector<256x1xi1> to vector<256x32xi1>
    %68 = vector.broadcast %65 : bf16 to vector<256x32xbf16>
    %69 = arith.select %67, %64, %68 : vector<256x32xi1>, vector<256x32xbf16>
    %cst_23 = arith.constant 0.000000e+00 : bf16
    %70 = vector.broadcast %cst_23 : bf16 to vector<1x32xbf16>
    %71 = vector.extract_strided_slice %29 {offsets = [0, 0], sizes = [255, 32], strides = [1, 1]} : vector<256x32xbf16> to vector<255x32xbf16>
    %72 = tpu.concatenate %70, %71 in 0 : vector<1x32xbf16>, vector<255x32xbf16> -> vector<256x32xbf16>
    %cst_24 = arith.constant 0.000000e+00 : f32
    %73 = arith.truncf %cst_24 : f32 to bf16
    %74 = vector.shape_cast %48 : vector<256x1xi1> to vector<256x1xi1>
    %75 = vector.broadcast %74 : vector<256x1xi1> to vector<256x32xi1>
    %76 = vector.broadcast %73 : bf16 to vector<256x32xbf16>
    %77 = arith.select %75, %72, %76 : vector<256x32xi1>, vector<256x32xbf16>
    %78 = vector.extract_strided_slice %29 {offsets = [1, 0], sizes = [255, 32], strides = [1, 1]} : vector<256x32xbf16> to vector<255x32xbf16>
    %cst_25 = arith.constant 0.000000e+00 : bf16
    %79 = vector.broadcast %cst_25 : bf16 to vector<1x32xbf16>
    %80 = tpu.concatenate %78, %79 in 0 : vector<255x32xbf16>, vector<1x32xbf16> -> vector<256x32xbf16>
    %cst_26 = arith.constant 0.000000e+00 : f32
    %81 = arith.truncf %cst_26 : f32 to bf16
    %82 = vector.shape_cast %50 : vector<256x1xi1> to vector<256x1xi1>
    %83 = vector.broadcast %82 : vector<256x1xi1> to vector<256x32xi1>
    %84 = vector.broadcast %81 : bf16 to vector<256x32xbf16>
    %85 = arith.select %83, %80, %84 : vector<256x32xi1>, vector<256x32xbf16>
    %86 = vector.extract_strided_slice %29 {offsets = [15, 0], sizes = [241, 32], strides = [1, 1]} : vector<256x32xbf16> to vector<241x32xbf16>
    %cst_27 = arith.constant 0.000000e+00 : bf16
    %87 = vector.broadcast %cst_27 : bf16 to vector<15x32xbf16>
    %88 = tpu.concatenate %86, %87 in 0 : vector<241x32xbf16>, vector<15x32xbf16> -> vector<256x32xbf16>
    %cst_28 = arith.constant 0.000000e+00 : f32
    %89 = arith.truncf %cst_28 : f32 to bf16
    %90 = vector.shape_cast %48 : vector<256x1xi1> to vector<256x1xi1>
    %91 = vector.broadcast %90 : vector<256x1xi1> to vector<256x32xi1>
    %92 = vector.broadcast %89 : bf16 to vector<256x32xbf16>
    %93 = arith.select %91, %88, %92 : vector<256x32xi1>, vector<256x32xbf16>
    %94 = vector.extract_strided_slice %29 {offsets = [16, 0], sizes = [240, 32], strides = [1, 1]} : vector<256x32xbf16> to vector<240x32xbf16>
    %cst_29 = arith.constant 0.000000e+00 : bf16
    %95 = vector.broadcast %cst_29 : bf16 to vector<16x32xbf16>
    %96 = tpu.concatenate %94, %95 in 0 : vector<240x32xbf16>, vector<16x32xbf16> -> vector<256x32xbf16>
    %97 = vector.extract_strided_slice %29 {offsets = [17, 0], sizes = [239, 32], strides = [1, 1]} : vector<256x32xbf16> to vector<239x32xbf16>
    %cst_30 = arith.constant 0.000000e+00 : bf16
    %98 = vector.broadcast %cst_30 : bf16 to vector<17x32xbf16>
    %99 = tpu.concatenate %97, %98 in 0 : vector<239x32xbf16>, vector<17x32xbf16> -> vector<256x32xbf16>
    %cst_31 = arith.constant 0.000000e+00 : f32
    %100 = arith.truncf %cst_31 : f32 to bf16
    %101 = vector.shape_cast %50 : vector<256x1xi1> to vector<256x1xi1>
    %102 = vector.broadcast %101 : vector<256x1xi1> to vector<256x32xi1>
    %103 = vector.broadcast %100 : bf16 to vector<256x32xbf16>
    %104 = arith.select %102, %99, %103 : vector<256x32xi1>, vector<256x32xbf16>
    %105 = tpu.concatenate %58, %61, %69, %77, %29, %85, %93, %96, %104 in 1 : vector<256x32xbf16>, vector<256x32xbf16>, vector<256x32xbf16>, vector<256x32xbf16>, vector<256x32xbf16>, vector<256x32xbf16>, vector<256x32xbf16>, vector<256x32xbf16>, vector<256x32xbf16> -> vector<256x288xbf16>
    %c0_32 = arith.constant 0 : index
    %c0_33 = arith.constant 0 : index
    %106 = vector.load %arg5[%c0_32, %c0_33] : memref<288x32xbf16, #tpu.memory_space<vmem>>, vector<288x32xbf16>
    %cst_34 = arith.constant dense<0.000000e+00> : vector<256x32xf32>
    %107 = tpu.matmul %105, %106, %cst_34 {dimension_numbers = #tpu.dot_dimension_numbers<[1], [0], [0], [1], [0, 0, 1, 1], [], []>} : vector<256x288xbf16>, vector<288x32xbf16>, vector<256x32xf32> -> vector<256x32xf32>
    %108 = arith.truncf %107 : vector<256x32xf32> to vector<256x32xbf16>
    %c0_35 = arith.constant 0 : index
    %c0_36 = arith.constant 0 : index
    %c0_37 = arith.constant 0 : index
    %109 = vector.load %arg6[%c0_35, %c0_36, %c0_37] : memref<1x256x32xbf16, #tpu.memory_space<vmem>>, vector<1x256x32xbf16>
    %110 = vector.shape_cast %109 : vector<1x256x32xbf16> to vector<256x32xbf16>
    %111 = vector.shape_cast %108 : vector<256x32xbf16> to vector<1x256x32xbf16>
    tpu.vector_store %arg6[%c0_35, %c0_36, %c0_37], %111 {strides = array<i32>} : memref<1x256x32xbf16, #tpu.memory_space<vmem>>, vector<1x256x32xbf16>,
    %cst_38 = arith.constant dense<0.000000e+00> : vector<32xf32>
    %112 = vector.multi_reduction <add>, %107, %cst_38 [0] : vector<256x32xf32> to vector<32xf32>
    %113 = vector.shape_cast %112 : vector<32xf32> to vector<1x32xf32>
    %114 = arith.mulf %107, %107 : vector<256x32xf32>
    %cst_39 = arith.constant dense<0.000000e+00> : vector<32xf32>
    %115 = vector.multi_reduction <add>, %114, %cst_39 [0] : vector<256x32xf32> to vector<32xf32>
    %116 = vector.shape_cast %115 : vector<32xf32> to vector<1x32xf32>
    %117 = tpu.concatenate %113, %116 in 0 : vector<1x32xf32>, vector<1x32xf32> -> vector<2x32xf32>
    %c0_40 = arith.constant 0 : index
    %c0_41 = arith.constant 0 : index
    %c0_42 = arith.constant 0 : index
    %118 = vector.load %arg7[%c0_40, %c0_41, %c0_42] : memref<1x2x32xf32, #tpu.memory_space<vmem>>, vector<1x2x32xf32>
    %119 = vector.shape_cast %118 : vector<1x2x32xf32> to vector<2x32xf32>
    %120 = vector.shape_cast %117 : vector<2x32xf32> to vector<1x2x32xf32>
    tpu.vector_store %arg7[%c0_40, %c0_41, %c0_42], %120 {strides = array<i32>} : memref<1x2x32xf32, #tpu.memory_space<vmem>>, vector<1x2x32xf32>,
    return
  }
  func.func @transform_0(%arg0: i32) -> (i32, i32, i32) {
    %c0_i32 = arith.constant 0 : i32
    %c0_i32_0 = arith.constant 0 : i32
    %c0_i32_1 = arith.constant 0 : i32
    %c0_i32_2 = arith.constant 0 : i32
    return %c0_i32, %c0_i32_0, %c0_i32_1 : i32, i32, i32
  }
  func.func @transform_1(%arg0: i32) -> (i32, i32) {
    %c0_i32 = arith.constant 0 : i32
    %c0_i32_0 = arith.constant 0 : i32
    %c0_i32_1 = arith.constant 0 : i32
    return %c0_i32, %c0_i32_0 : i32, i32
  }
  func.func @transform_2(%arg0: i32) -> (i32, i32) {
    %c0_i32 = arith.constant 0 : i32
    %c0_i32_0 = arith.constant 0 : i32
    %c0_i32_1 = arith.constant 0 : i32
    return %c0_i32, %c0_i32_0 : i32, i32
  }
  func.func @transform_3(%arg0: i32) -> (i32, i32, i32) {
    %c0_i32 = arith.constant 0 : i32
    %c0_i32_0 = arith.constant 0 : i32
    %c0_i32_1 = arith.constant 0 : i32
    return %arg0, %c0_i32, %c0_i32_0 : i32, i32, i32
  }
  func.func @transform_4(%arg0: i32) -> (i32, i32) {
    %c0_i32 = arith.constant 0 : i32
    %c0_i32_0 = arith.constant 0 : i32
    %c0_i32_1 = arith.constant 0 : i32
    return %c0_i32, %c0_i32_0 : i32, i32
  }
  func.func @transform_5(%arg0: i32) -> (i32, i32, i32) {
    %c0_i32 = arith.constant 0 : i32
    %c0_i32_0 = arith.constant 0 : i32
    %c0_i32_1 = arith.constant 0 : i32
    return %arg0, %c0_i32, %c0_i32_0 : i32, i32, i32
  }
  func.func @transform_6(%arg0: i32) -> (i32, i32, i32) {
    %c0_i32 = arith.constant 0 : i32
    %c0_i32_0 = arith.constant 0 : i32
    %c0_i32_1 = arith.constant 0 : i32
    return %arg0, %c0_i32, %c0_i32_0 : i32, i32, i32
  }
}

module attributes {stable_mosaic.version = 11 : i64} {
  func.func @_bn_residual_relu_kernel(%arg0: i32, %arg1: i32, %arg2: memref<2x2x128xf32, #tpu.memory_space<vmem>>, %arg3: memref<1x128xf32, #tpu.memory_space<vmem>>, %arg4: memref<1x128xf32, #tpu.memory_space<vmem>>, %arg5: memref<1x256x128xbf16, #tpu.memory_space<vmem>>, %arg6: memref<1x256x128xbf16, #tpu.memory_space<vmem>>, %arg7: memref<1x256x128xf32, #tpu.memory_space<vmem>>) attributes {dimension_semantics = [#tpu.dimension_semantics<parallel>, #tpu.dimension_semantics<parallel>], iteration_bounds = array<i64: 2, 1>, scalar_prefetch = 0 : i64, scratch_operands = 0 : i64, tpu.core_type = #tpu.core_type<tc>, window_params = [{pipeline_mode = #tpu.pipeline_mode<synchronous>, transform_indices = @transform_0, window_bounds = array<i64: 2, 2, 128>}, {pipeline_mode = #tpu.pipeline_mode<synchronous>, transform_indices = @transform_1, window_bounds = array<i64: 1, 128>}, {pipeline_mode = #tpu.pipeline_mode<synchronous>, transform_indices = @transform_2, window_bounds = array<i64: 1, 128>}, {transform_indices = @transform_3, window_bounds = array<i64: 1, 256, 128>}, {transform_indices = @transform_4, window_bounds = array<i64: 1, 256, 128>}, {transform_indices = @transform_5, window_bounds = array<i64: 1, 256, 128>}]} {
    %c0 = arith.constant 0 : index
    %c0_0 = arith.constant 0 : index
    %c0_1 = arith.constant 0 : index
    %0 = vector.load %arg2[%c0, %c0_0, %c0_1] : memref<2x2x128xf32, #tpu.memory_space<vmem>>, vector<2x2x128xf32>
    %c0_2 = arith.constant 0 : index
    %c0_3 = arith.constant 0 : index
    %1 = vector.load %arg3[%c0_2, %c0_3] : memref<1x128xf32, #tpu.memory_space<vmem>>, vector<1x128xf32>
    %c0_4 = arith.constant 0 : index
    %c0_5 = arith.constant 0 : index
    %2 = vector.load %arg4[%c0_4, %c0_5] : memref<1x128xf32, #tpu.memory_space<vmem>>, vector<1x128xf32>
    %cst = arith.constant dense<0.000000e+00> : vector<2x128xf32>
    %3 = vector.multi_reduction <add>, %0, %cst [0] : vector<2x2x128xf32> to vector<2x128xf32>
    %4 = vector.extract_strided_slice %3 {offsets = [0, 0], sizes = [1, 128], strides = [1, 1]} : vector<2x128xf32> to vector<1x128xf32>
    %cst_6 = arith.constant 0.001953125 : f32
    %5 = vector.broadcast %cst_6 : f32 to vector<1x128xf32>
    %6 = arith.mulf %4, %5 : vector<1x128xf32>
    %7 = vector.extract_strided_slice %3 {offsets = [1, 0], sizes = [1, 128], strides = [1, 1]} : vector<2x128xf32> to vector<1x128xf32>
    %cst_7 = arith.constant 0.001953125 : f32
    %8 = vector.broadcast %cst_7 : f32 to vector<1x128xf32>
    %9 = arith.mulf %7, %8 : vector<1x128xf32>
    %10 = arith.mulf %6, %6 : vector<1x128xf32>
    %11 = arith.subf %9, %10 : vector<1x128xf32>
    %cst_8 = arith.constant 0.000000e+00 : f32
    %12 = vector.broadcast %cst_8 : f32 to vector<1x128xf32>
    %13 = arith.maximumf %11, %12 : vector<1x128xf32>
    %cst_9 = arith.constant 9.99999974E-6 : f32
    %14 = vector.broadcast %cst_9 : f32 to vector<1x128xf32>
    %15 = arith.addf %13, %14 : vector<1x128xf32>
    %16 = math.rsqrt %15 : vector<1x128xf32>
    %17 = arith.mulf %1, %16 : vector<1x128xf32>
    %18 = arith.mulf %6, %17 : vector<1x128xf32>
    %19 = arith.subf %2, %18 : vector<1x128xf32>
    %c0_10 = arith.constant 0 : index
    %c0_11 = arith.constant 0 : index
    %c0_12 = arith.constant 0 : index
    %20 = vector.load %arg5[%c0_10, %c0_11, %c0_12] : memref<1x256x128xbf16, #tpu.memory_space<vmem>>, vector<1x256x128xbf16>
    %21 = vector.shape_cast %20 : vector<1x256x128xbf16> to vector<256x128xbf16>
    %22 = arith.extf %21 : vector<256x128xbf16> to vector<256x128xf32>
    %23 = vector.broadcast %17 : vector<1x128xf32> to vector<256x128xf32>
    %24 = arith.mulf %22, %23 : vector<256x128xf32>
    %25 = vector.broadcast %19 : vector<1x128xf32> to vector<256x128xf32>
    %26 = arith.addf %24, %25 : vector<256x128xf32>
    %c0_13 = arith.constant 0 : index
    %c0_14 = arith.constant 0 : index
    %c0_15 = arith.constant 0 : index
    %27 = vector.load %arg6[%c0_13, %c0_14, %c0_15] : memref<1x256x128xbf16, #tpu.memory_space<vmem>>, vector<1x256x128xbf16>
    %28 = vector.shape_cast %27 : vector<1x256x128xbf16> to vector<256x128xbf16>
    %29 = arith.extf %28 : vector<256x128xbf16> to vector<256x128xf32>
    %30 = arith.addf %26, %29 : vector<256x128xf32>
    %cst_16 = arith.constant 0.000000e+00 : f32
    %31 = vector.broadcast %cst_16 : f32 to vector<256x128xf32>
    %32 = arith.maximumf %30, %31 : vector<256x128xf32>
    %c0_17 = arith.constant 0 : index
    %c0_18 = arith.constant 0 : index
    %c0_19 = arith.constant 0 : index
    %33 = vector.load %arg7[%c0_17, %c0_18, %c0_19] : memref<1x256x128xf32, #tpu.memory_space<vmem>>, vector<1x256x128xf32>
    %34 = vector.shape_cast %33 : vector<1x256x128xf32> to vector<256x128xf32>
    %35 = vector.shape_cast %32 : vector<256x128xf32> to vector<1x256x128xf32>
    tpu.vector_store %arg7[%c0_17, %c0_18, %c0_19], %35 {strides = array<i32>} : memref<1x256x128xf32, #tpu.memory_space<vmem>>, vector<1x256x128xf32>,
    return
  }
  func.func @transform_0(%arg0: i32, %arg1: i32) -> (i32, i32, i32) {
    %c0_i32 = arith.constant 0 : i32
    %c0_i32_0 = arith.constant 0 : i32
    %c0_i32_1 = arith.constant 0 : i32
    %c0_i32_2 = arith.constant 0 : i32
    return %c0_i32, %c0_i32_0, %c0_i32_1 : i32, i32, i32
  }
  func.func @transform_1(%arg0: i32, %arg1: i32) -> (i32, i32) {
    %c0_i32 = arith.constant 0 : i32
    %c0_i32_0 = arith.constant 0 : i32
    %c0_i32_1 = arith.constant 0 : i32
    return %c0_i32, %c0_i32_0 : i32, i32
  }
  func.func @transform_2(%arg0: i32, %arg1: i32) -> (i32, i32) {
    %c0_i32 = arith.constant 0 : i32
    %c0_i32_0 = arith.constant 0 : i32
    %c0_i32_1 = arith.constant 0 : i32
    return %c0_i32, %c0_i32_0 : i32, i32
  }
  func.func @transform_3(%arg0: i32, %arg1: i32) -> (i32, i32, i32) {
    %c0_i32 = arith.constant 0 : i32
    %c0_i32_0 = arith.constant 0 : i32
    return %arg0, %arg1, %c0_i32 : i32, i32, i32
  }
  func.func @transform_4(%arg0: i32, %arg1: i32) -> (i32, i32, i32) {
    %c0_i32 = arith.constant 0 : i32
    %c0_i32_0 = arith.constant 0 : i32
    return %arg0, %arg1, %c0_i32 : i32, i32, i32
  }
  func.func @transform_5(%arg0: i32, %arg1: i32) -> (i32, i32, i32) {
    %c0_i32 = arith.constant 0 : i32
    %c0_i32_0 = arith.constant 0 : i32
    return %arg0, %arg1, %c0_i32 : i32, i32, i32
  }
}

</mosaic_0001>

<bundles_post_ra>
// kernel: bottleneck_forward.7
= control target key start
LH: loop header
LB: loop body
LE: loop exit
PB: predicated region body
PF: predicated region fallthrough
CT: control target
= control target key end

     0   :  { %10 = vsyncpa [#allocation3], 0  ;;  %s1637_s0 = inlined_call_operand.vmem [shape: f32[2,2,128], index: 0, kind: input, shape index: {}]   ;;  %s1638_s1 = inlined_call_operand.vmem [shape: f32[1,128], index: 1, kind: input, shape index: {}]   ;;  %s1639_s2 = inlined_call_operand.vmem [shape: f32[1,128], index: 2, kind: input, shape index: {}]   ;;  %s1640_s3 = inlined_call_operand.vmem [shape: bf16[2,256,128], index: 3, kind: input, shape index: {}]   ;;  %s1641_s4 = inlined_call_operand.vmem [shape: bf16[2,256,128], index: 4, kind: input, shape index: {}]   ;;  %s1642_s5 = inlined_call_operand.hbm [shape: f32[2,256,128], index: 5, kind: output, shape index: {}]  }
   0x1   :  { %12 = vsyncpa [#allocation3 + $0x1], 0  ;;  %s1090_s18 = smov 0   ;;  %s1092_s19 = smov 0  }
   0x2   :  { %s1094_s20 = smov 0   ;;  %s1096_s21 = smov 0  }
   0x3   :  { %s1098_s22 = smov 0   ;;  %s1100_s23 = smov 0  }
   0x4 LB: > { %s740_s24 = sadd.s32 4294967295, %s1054_s23   ;;  %s741_s25 = sadd.s32 4294967294, %s1054_s23   ;;  %s1054_s23 = sphi %s1100_s23, %s18_s23   ;;  %s1050_s22 = sphi %s1098_s22, %s1691_s22   ;;  %s1046_s21 = sphi %s1096_s21, %s1690_s21   ;;  %s1042_s20 = sphi %s1094_s20, %s1689_s20   ;;  %s1038_s19 = sphi %s1092_s19, %s1688_s19   ;;  %s1034_s18 = sphi %s1090_s18, %s1687_s18  }
   0x5   : > { %s30_s26 = sadd.s32 1, %s1050_s22  ;;  %s158_s27 = sadd.s32 1, %s1042_s20 }
   0x6   : > { %p32_p0 = scmp.ge.s32.totalorder %s30_s26, 2  ;;  %p168_p1 = scmp.ne.s32.totalorder %s1042_s20, %s1038_s19 }
   0x7   : > { %p169_p2 = scmp.eq.s32.totalorder %s740_s24, 1  ;;  %p174_p3 = scmp.ne.s32.totalorder %s1038_s19, %s1034_s18 }
   0x8   : > { %s1693_s26 = smov (%p32_p0, %s30_s26), 0  ;;  %p175_p5 = scmp.eq.s32.totalorder %s741_s25, 1 }
   0x9   : > { %p1130_p4 = por %p169_p2, %p168_p1  ;;  %s153_s29 = ssub.s32 %s1050_s22, %s1693_s26 }
   0xa   : > { %p744_p6 = scmp.ge.s32.totalorder %s1054_s23, 1  ;;  %p156_p7 = scmp.eq.s32.totalorder %s153_s29, 0 }
   0xb   : > { %p1137_p8 = por %p175_p5, %p174_p3  ;;  %p228_p9 = scmp.lt.s32.totalorder %s1054_s23, 3 }
   0xc   : > { %s1143_s6 = scalar_select %p156_p7, %s1042_s20, %s158_s27  }
   0xd   : > { %p229_p10 = pnand %p744_p6, %p228_p9 }
   0xe   : > { %v290_v0 = vld [vmem:[%s1637_s0] sm:$0x3] (!%p229_p10)  ;;  %v291_v1 = vld [vmem:[%s1637_s0 + $0x2] sm:$0x3] (!%p229_p10)  ;;  %vm294_vm0 = vcmask (!%p229_p10), 1041408   ;;  %p270_p11 = scmp.lt.s32.totalorder (!%p229_p10), %s1046_s21, 1  ;;  %v311_v11 = vlaneseq (!%p229_p10) }
   0xf   : > { %232 = sbr.rel (%p229_p10) target bundleno = 112 (0x70), region = 40  ;;  %v295_v2 = vsel (!%p229_p10), %vm294_vm0, %v290_v0, 0.0  ;;  %v296_v3 = vsel (!%p229_p10), %vm294_vm0, %v291_v1, 0.0  ;;  %v1056_v9 = vmov (!%p229_p10), 1966171168   ;;  %s266_s8 = sand.u32 (!%p229_p10), 1, %s1038_s19  }
  0x10   : > { %v297_v4 = vadd.f32 (!%p229_p10), %v296_v3, %v295_v2  ;;  %v309_v10 = vunpack.c.l.s4 (!%p229_p10), %v1056_v9  ;;  %v1168_v15 = vshrl.u32 (!%p229_p10), %v311_v11, 7  ;;  %v293_v55 = vld [vmem:[%s1639_s2] sm:$0x1] (!%p229_p10)  ;;  %s745_s9 = sshll.u32 (!%p229_p10), %s266_s8, 8  ;;  %s1057_s17 = smov (!%p229_p10), [#allocation2]  }
  0x11   : > { %s1420_s10 = scalar_lea.vmem (!%p229_p10), [#allocation2], %s745_s9 }
  0x12   : > { %v1152_v5 = vmul.f32 (!%p229_p10), 0.001953125, %v297_v4  ;;  %v310_v14 = vunpack.c.0.s8 (!%p229_p10), %v309_v10  ;;  %v394_v24 = vsub.s32 (!%p229_p10), 0, %v1168_v15 }
  0x14   : > { %v299_v6 = vmul.f32 (!%p229_p10), %v1152_v5, %v1152_v5  ;;  %v1189_v22 = vsub.s32 (!%p229_p10), %v310_v14, %v1168_v15  ;;  %v292_v14 = vld [vmem:[%s1638_s1] sm:$0x1] (!%p229_p10) }
  0x16   : > { %s271_s11 = scalar_select %p270_p11, %s1046_s21, 1  ;;  %v301_v7 = vrot.slane %v299_v6, 7 }
  0x18   : > { %s755_s12 = sshll.u32 %s271_s11, 7  ;;  %v303_v8 = vsub.f32 %v1152_v5, %v301_v7  ;;  %s757_s11 = sshll.u32 %s1046_s21, 12 }
  0x19   : > { %s1161_s15 = scalar_lea.vmem %s1640_s3, %s755_s12  ;;  %s1166_s24 = scalar_lea.vmem %s1641_s4, %s755_s12 }
  0x1a   : > { %v304_v12 = vmax.f32 %v303_v8, 0.0  ;;  %v1171_v16 = vld [vmem:[%s1161_s15] sm:$0xff]   ;;  %v1177_v18 = vld [vmem:[%s1161_s15 + $0x8] sm:$0xff]   ;;  %v1183_v20 = vld [vmem:[%s1161_s15 + $0x10] sm:$0xff]   ;;  %s643_s12 = sshll.u32 %s1420_s10, 4  ;;  %s1581_s14 = scalar_lea.hbm %s1642_s5, %s757_s11  ;;  %s1585_s12 = int_to_ptr.vmem [resolvable:$true] %s643_s12 }
  0x1b   : > { %v1174_v17 = vld [vmem:[%s1166_s24] sm:$0xff]   ;;  %v1180_v19 = vld [vmem:[%s1166_s24 + $0x8] sm:$0xff]   ;;  %v1186_v21 = vld [vmem:[%s1166_s24 + $0x10] sm:$0xff]   ;;  %v760_v23 = vunpack.c.l.bf16 %v1171_v16  ;;  %v761_v28 = vunpack.c.h.bf16 %v1171_v16  ;;  %v764_v30 = vunpack.c.l.bf16 %v1177_v18  ;;  %v765_v34 = vunpack.c.h.bf16 %v1177_v18  ;;  %s976_s16 = scalar_lea.vmem %s1585_s12, 4096 }
  0x1c   : > { %v305_v13 = vadd.f32 1e-05, %v304_v12  ;;  %v824_v25 = vunpack.c.l.bf16 %v1174_v17  ;;  %v1195_v26 = vld [vmem:[%s1161_s15 + $0x18] sm:$0xff]   ;;  %v825_v29 = vunpack.c.h.bf16 %v1174_v17  ;;  %v828_v31 = vunpack.c.l.bf16 %v1180_v19  ;;  %v1205_v32 = vld [vmem:[%s1161_s15 + $0x20] sm:$0xff]   ;;  %v1215_v38 = vld [vmem:[%s1161_s15 + $0x28] sm:$0xff]   ;;  %p977_p12 = scmp.ne.s32.totalorder %s1585_s12, %s976_s16 }
  0x1d   : > { %v1198_v27 = vld [vmem:[%s1166_s24 + $0x18] sm:$0xff]   ;;  %v1208_v33 = vld [vmem:[%s1166_s24 + $0x20] sm:$0xff]   ;;  %v768_v36 = vunpack.c.l.bf16 %v1183_v20  ;;  %v1218_v39 = vld [vmem:[%s1166_s24 + $0x28] sm:$0xff]   ;;  %v769_v40 = vunpack.c.h.bf16 %v1183_v20  ;;  %v772_v42 = vunpack.c.l.bf16 %v1195_v26  ;;  %v773_v46 = vunpack.c.h.bf16 %v1195_v26 }
  0x1e   : > { %974 = vrsqrt.f32 %v305_v13  ;;  %v1225_v44 = vld [vmem:[%s1161_s15 + $0x30] sm:$0xff]   ;;  %v776_v48 = vunpack.c.l.bf16 %v1205_v32  ;;  %v1235_v50 = vld [vmem:[%s1161_s15 + $0x38] sm:$0xff]   ;;  %v777_v52 = vunpack.c.h.bf16 %v1205_v32  ;;  %v780_v54 = vunpack.c.l.bf16 %v1215_v38  ;;  %v1245_v56 = vld [vmem:[%s1161_s15 + $0x40] sm:$0xff]   ;;  %p978_p13 = pnand %p977_p12, %p1130_p4 }
  0x1f   : > { %v1228_v45 = vld [vmem:[%s1166_s24 + $0x30] sm:$0xff]   ;;  %v1238_v51 = vld [vmem:[%s1166_s24 + $0x38] sm:$0xff]   ;;  %v781_v57 = vunpack.c.h.bf16 %v1215_v38  ;;  %v784_v59 = vunpack.c.l.bf16 %v1225_v44  ;;  %v1252_v61 = vld [vmem:[%s1166_s24 + $0x40] sm:$0xff]   ;;  %v785_v0 = vunpack.c.h.bf16 %v1225_v44 }
  0x20   : > { %v1255_v62 = vld [vmem:[%s1161_s15 + $0x48] sm:$0xff]   ;;  %v1269_v10 = vld [vmem:[%s1161_s15 + $0x50] sm:$0xff]   ;;  %v1279_v3 = vld [vmem:[%s1161_s15 + $0x58] sm:$0xff]   ;;  %p979_p0 = pneg %p978_p13 }
  0x21   : > { %v1262_v4 = vld [vmem:[%s1166_s24 + $0x48] sm:$0xff]   ;;  %v1272_v11 = vld [vmem:[%s1166_s24 + $0x50] sm:$0xff]   ;;  %v1282_v1 = vld [vmem:[%s1166_s24 + $0x58] sm:$0xff]  }
  0x22   : > { %v1288_v13 = vld [vmem:[%s1161_s15 + $0x60] sm:$0xff]   ;;  %v1301_v60 = vld [vmem:[%s1161_s15 + $0x68] sm:$0xff]   ;;  %v1311_v2 = vld [vmem:[%s1161_s15 + $0x70] sm:$0xff]  }
  0x23   : > { %v1291_v58 = vld [vmem:[%s1166_s24 + $0x60] sm:$0xff]   ;;  %v1304_v12 = vld [vmem:[%s1166_s24 + $0x68] sm:$0xff]   ;;  %v1327_v49 = vld [vmem:[%s1166_s24 + $0x78] sm:$0xff]  }
  0x28   : > { %v975_v63 = vpop.eup %974 }
  0x29   : > { %v314_v6 = vrot.slane %v975_v63, %v1189_v22  ;;  %v1324_v63 = vld [vmem:[%s1161_s15 + $0x78] sm:$0xff]   ;;  %s1591_s15 = scalar_lea.sflag [#allocation3], %s266_s8 }
  0x2a   : > { %v820_v37 = vunpack.c.l.bf16 %v1324_v63  ;;  %v821_v47 = vunpack.c.h.bf16 %v1324_v63 }
  0x2b   : > { %v315_v8 = vcombine.high %v314_v6, %v314_v6  ;;  %v1314_v6 = vld [vmem:[%s1166_s24 + $0x70] sm:$0xff]   ;;  %s980_s24 = sshll.u32 %s1057_s17, 4  ;;  %s981_s24 = int_to_ptr.vmem [resolvable:$false] %s980_s24 }
  0x2c   : > { %v1685_v63 = vunpack.c.h.bf16 %v1314_v6  ;;  %s982_s25 = scalar_lea.vmem %s981_s24, 8192  ;;  %p983_p1 = scmp.lt.s32.totalorder %s1585_s12, %s981_s24 }
  0x2d   : > { %v322_v53 = vrot.slane %v315_v8, %v1189_v22  ;;  %v817_v8 = vunpack.c.h.bf16 %v1311_v2  ;;  %p984_p2 = scmp.lt.s32.totalorder %s982_s25, %s976_s16 }
  0x2f   : > { %v324_v41 = vmul.f32 %v322_v53, %v292_v14  ;;  %v880_v14 = vunpack.c.l.bf16 %v1314_v6  ;;  %v885_v53 = vunpack.c.h.bf16 %v1327_v49  ;;  %p985_p3 = por %p984_p2, %p983_p1 }
  0x31   : > { %v325_v22 = vmul.f32 %v324_v41, %v1152_v5  ;;  %v1339_v7 = vrot.slane %v324_v41, %v394_v24  ;;  %p986_p5 = pnand %p985_p3, %p979_p0 }
  0x33   : > { %v326_v35 = vsub.f32 %v293_v55, %v325_v22  ;;  %v397_v5 = vmul.f32 %v760_v23, %v1339_v7  ;;  %v398_v41 = vmul.f32 %v761_v28, %v1339_v7  ;;  %v399_v43 = vmul.f32 %v764_v30, %v1339_v7 }
  0x34   : > { %v400_v9 = vmul.f32 %v765_v34, %v1339_v7  ;;  %v401_v55 = vmul.f32 %v768_v36, %v1339_v7  ;;  %v402_v23 = vmul.f32 %v769_v40, %v1339_v7  ;;  %v403_v16 = vmul.f32 %v772_v42, %v1339_v7 }
  0x35   : > { %v1371_v28 = vrot.slane %v326_v35, %v394_v24  ;;  %v404_v18 = vmul.f32 %v773_v46, %v1339_v7  ;;  %v405_v30 = vmul.f32 %v776_v48, %v1339_v7  ;;  %v406_v20 = vmul.f32 %v777_v52, %v1339_v7 }
  0x36   : > { %v407_v34 = vmul.f32 %v780_v54, %v1339_v7  ;;  %v408_v15 = vmul.f32 %v781_v57, %v1339_v7  ;;  %v409_v24 = vmul.f32 %v784_v59, %v1339_v7  ;;  %v410_v26 = vmul.f32 %v785_v0, %v1339_v7 }
  0x37   : > { %v435_v32 = vadd.f32 %v1371_v28, %v397_v5  ;;  %v436_v35 = vadd.f32 %v1371_v28, %v398_v41  ;;  %v437_v36 = vadd.f32 %v1371_v28, %v399_v43  ;;  %v438_v40 = vadd.f32 %v1371_v28, %v400_v9 }
  0x38   : > { %v439_v38 = vadd.f32 %v1371_v28, %v401_v55  ;;  %v440_v42 = vadd.f32 %v1371_v28, %v402_v23  ;;  %v441_v46 = vadd.f32 %v1371_v28, %v403_v16  ;;  %v442_v48 = vadd.f32 %v1371_v28, %v404_v18 }
  0x39   : > { %v531_v44 = vadd.f32 %v824_v25, %v435_v32  ;;  %v532_v52 = vadd.f32 %v825_v29, %v436_v35  ;;  %v533_v54 = vadd.f32 %v828_v31, %v437_v36  ;;  %v1645_v43 = vunpack.c.h.bf16 %v1180_v19 }
  0x3a   : > { %v1646_v59 = vunpack.c.l.bf16 %v1186_v21  ;;  %v1647_v9 = vunpack.c.h.bf16 %v1186_v21  ;;  %v1648_v5 = vunpack.c.l.bf16 %v1198_v27  ;;  %v1649_v25 = vunpack.c.h.bf16 %v1198_v27 }
  0x3b   : > { %v534_v57 = vadd.f32 %v1645_v43, %v438_v40  ;;  %v563_v17 = vmax.f32 %v531_v44, 0.0  ;;  %v564_v29 = vmax.f32 %v532_v52, 0.0  ;;  %v565_v23 = vmax.f32 %v533_v54, 0.0 }
  0x3c   : > { %v535_v0 = vadd.f32 %v1646_v59, %v439_v38  ;;  %v536_v22 = vadd.f32 %v1647_v9, %v440_v42  ;;  %v537_v41 = vadd.f32 %v1648_v5, %v441_v46  ;;  %v538_v55 = vadd.f32 %v1649_v25, %v442_v48 }
  0x3d   : > { %v566_v16 = vmax.f32 %v534_v57, 0.0  ;;  %595 = vst [vmem:[%s1420_s10] sm:$0xff] %v563_v17  ;;  %596 = vst [vmem:[%s1420_s10 + $0x8] sm:$0xff] %v564_v29  ;;  %v443_v21 = vadd.f32 %v1371_v28, %v405_v30  ;;  %v444_v27 = vadd.f32 %v1371_v28, %v406_v20  ;;  %v445_v35 = vadd.f32 %v1371_v28, %v407_v34 }
  0x3e   : > { %v567_v31 = vmax.f32 %v535_v0, 0.0  ;;  %v568_v18 = vmax.f32 %v536_v22, 0.0  ;;  %v569_v19 = vmax.f32 %v537_v41, 0.0  ;;  %v570_v32 = vmax.f32 %v538_v55, 0.0  ;;  %597 = vst [vmem:[%s1420_s10 + $0x10] sm:$0xff] %v565_v23 }
  0x3f   : > { %598 = vst [vmem:[%s1420_s10 + $0x18] sm:$0xff] %v566_v16  ;;  %v446_v36 = vadd.f32 %v1371_v28, %v408_v15  ;;  %v447_v40 = vadd.f32 %v1371_v28, %v409_v24  ;;  %v448_v38 = vadd.f32 %v1371_v28, %v410_v26  ;;  %v1650_v42 = vunpack.c.l.bf16 %v1235_v50 }
  0x40   : > { %599 = vst [vmem:[%s1420_s10 + $0x20] sm:$0xff] %v567_v31  ;;  %600 = vst [vmem:[%s1420_s10 + $0x28] sm:$0xff] %v568_v18  ;;  %v1651_v30 = vunpack.c.h.bf16 %v1235_v50  ;;  %v1652_v34 = vunpack.c.l.bf16 %v1208_v33  ;;  %v1653_v15 = vunpack.c.h.bf16 %v1208_v33  ;;  %v1654_v52 = vunpack.c.l.bf16 %v1218_v39 }
  0x41   : > { %601 = vst [vmem:[%s1420_s10 + $0x30] sm:$0xff] %v569_v19  ;;  %602 = vst [vmem:[%s1420_s10 + $0x38] sm:$0xff] %v570_v32  ;;  %v411_v46 = vmul.f32 %v1650_v42, %v1339_v7  ;;  %v1655_v26 = vunpack.c.h.bf16 %v1218_v39  ;;  %v1656_v43 = vunpack.c.l.bf16 %v1228_v45  ;;  %v1657_v57 = vunpack.c.h.bf16 %v1228_v45 }
  0x42   : > { %v412_v20 = vmul.f32 %v1651_v30, %v1339_v7  ;;  %v539_v48 = vadd.f32 %v1652_v34, %v443_v21  ;;  %v540_v44 = vadd.f32 %v1653_v15, %v444_v27  ;;  %v541_v24 = vadd.f32 %v1654_v52, %v445_v35 }
  0x43   : > { %v542_v54 = vadd.f32 %v1655_v26, %v446_v36  ;;  %v543_v50 = vadd.f32 %v1656_v43, %v447_v40  ;;  %v544_v59 = vadd.f32 %v1657_v57, %v448_v38  ;;  %v449_v0 = vadd.f32 %v1371_v28, %v411_v46 }
  0x44   : > { %v450_v33 = vadd.f32 %v1371_v28, %v412_v20  ;;  %v571_v9 = vmax.f32 %v539_v48, 0.0  ;;  %v572_v22 = vmax.f32 %v540_v44, 0.0  ;;  %v573_v5 = vmax.f32 %v541_v24, 0.0 }
  0x45   : > { %v574_v41 = vmax.f32 %v542_v54, 0.0  ;;  %v575_v39 = vmax.f32 %v543_v50, 0.0  ;;  %v576_v25 = vmax.f32 %v544_v59, 0.0  ;;  %v1658_v55 = vunpack.c.l.bf16 %v1238_v51 }
  0x46   : > { %v1659_v29 = vunpack.c.h.bf16 %v1238_v51  ;;  %603 = vst [vmem:[%s1420_s10 + $0x40] sm:$0xff] %v571_v9  ;;  %604 = vst [vmem:[%s1420_s10 + $0x48] sm:$0xff] %v572_v22  ;;  %v1660_v45 = vunpack.c.l.bf16 %v1245_v56  ;;  %v1661_v31 = vunpack.c.h.bf16 %v1245_v56  ;;  %v1662_v19 = vunpack.c.l.bf16 %v1255_v62 }
  0x47   : > { %v545_v17 = vadd.f32 %v1658_v55, %v449_v0  ;;  %605 = vst [vmem:[%s1420_s10 + $0x50] sm:$0xff] %v573_v5  ;;  %606 = vst [vmem:[%s1420_s10 + $0x58] sm:$0xff] %v574_v41  ;;  %v1663_v51 = vunpack.c.h.bf16 %v1255_v62  ;;  %v1664_v36 = vunpack.c.l.bf16 %v1269_v10  ;;  %v1665_v56 = vunpack.c.h.bf16 %v1269_v10 }
  0x48   : > { %v546_v23 = vadd.f32 %v1659_v29, %v450_v33  ;;  %v413_v16 = vmul.f32 %v1660_v45, %v1339_v7  ;;  %v414_v18 = vmul.f32 %v1661_v31, %v1339_v7  ;;  %v415_v32 = vmul.f32 %v1662_v19, %v1339_v7  ;;  %607 = vst [vmem:[%s1420_s10 + $0x60] sm:$0xff] %v575_v39 }
  0x49   : > { %v416_v21 = vmul.f32 %v1663_v51, %v1339_v7  ;;  %608 = vst [vmem:[%s1420_s10 + $0x68] sm:$0xff] %v576_v25  ;;  %v577_v27 = vmax.f32 %v545_v17, 0.0  ;;  %v417_v40 = vmul.f32 %v1664_v36, %v1339_v7  ;;  %v418_v38 = vmul.f32 %v1665_v56, %v1339_v7 }
  0x4a   : > { %v578_v35 = vmax.f32 %v546_v23, 0.0  ;;  %v451_v42 = vadd.f32 %v1371_v28, %v413_v16  ;;  %v452_v46 = vadd.f32 %v1371_v28, %v414_v18  ;;  %v453_v30 = vadd.f32 %v1371_v28, %v415_v32 }
  0x4b   : > { %v454_v62 = vadd.f32 %v1371_v28, %v416_v21  ;;  %609 = vst [vmem:[%s1420_s10 + $0x70] sm:$0xff] %v577_v27  ;;  %v455_v20 = vadd.f32 %v1371_v28, %v417_v40  ;;  %v456_v34 = vadd.f32 %v1371_v28, %v418_v38  ;;  %v1666_v48 = vunpack.c.l.bf16 %v1279_v3 }
  0x4c   : > { %610 = vst [vmem:[%s1420_s10 + $0x78] sm:$0xff] %v578_v35  ;;  %v1667_v10 = vunpack.c.h.bf16 %v1279_v3  ;;  %v1668_v52 = vunpack.c.l.bf16 %v1252_v61  ;;  %v1669_v26 = vunpack.c.h.bf16 %v1252_v61  ;;  %v1670_v43 = vunpack.c.l.bf16 %v1262_v4 }
  0x4d   : > { %v419_v15 = vmul.f32 %v1666_v48, %v1339_v7  ;;  %v1671_v57 = vunpack.c.h.bf16 %v1262_v4  ;;  %v1672_v0 = vunpack.c.l.bf16 %v1272_v11  ;;  %v1673_v33 = vunpack.c.h.bf16 %v1272_v11 }
  0x4e   : > { %v420_v44 = vmul.f32 %v1667_v10, %v1339_v7  ;;  %v547_v24 = vadd.f32 %v1668_v52, %v451_v42  ;;  %v548_v54 = vadd.f32 %v1669_v26, %v452_v46  ;;  %v549_v50 = vadd.f32 %v1670_v43, %v453_v30 }
  0x4f   : > { %v550_v59 = vadd.f32 %v1671_v57, %v454_v62  ;;  %v551_v3 = vadd.f32 %v1672_v0, %v455_v20  ;;  %v552_v9 = vadd.f32 %v1673_v33, %v456_v34  ;;  %v457_v22 = vadd.f32 %v1371_v28, %v419_v15 }
  0x50   : > { %v458_v61 = vadd.f32 %v1371_v28, %v420_v44  ;;  %v579_v5 = vmax.f32 %v547_v24, 0.0  ;;  %v580_v41 = vmax.f32 %v548_v54, 0.0  ;;  %v581_v39 = vmax.f32 %v549_v50, 0.0 }
  0x51   : > { %v582_v25 = vmax.f32 %v550_v59, 0.0  ;;  %v583_v4 = vmax.f32 %v551_v3, 0.0  ;;  %v584_v55 = vmax.f32 %v552_v9, 0.0  ;;  %v1674_v17 = vunpack.c.l.bf16 %v1282_v1 }
  0x52   : > { %v1675_v23 = vunpack.c.h.bf16 %v1282_v1  ;;  %611 = vst [vmem:[%s1420_s10 + $0x80] sm:$0xff] %v579_v5  ;;  %612 = vst [vmem:[%s1420_s10 + $0x88] sm:$0xff] %v580_v41  ;;  %v1676_v11 = vunpack.c.l.bf16 %v1288_v13  ;;  %v1677_v31 = vunpack.c.h.bf16 %v1288_v13  ;;  %v1678_v19 = vunpack.c.l.bf16 %v1301_v60 }
  0x53   : > { %v553_v29 = vadd.f32 %v1674_v17, %v457_v22  ;;  %613 = vst [vmem:[%s1420_s10 + $0x90] sm:$0xff] %v581_v39  ;;  %614 = vst [vmem:[%s1420_s10 + $0x98] sm:$0xff] %v582_v25  ;;  %v1679_v1 = vunpack.c.h.bf16 %v1301_v60  ;;  %v1680_v35 = vunpack.c.l.bf16 %v1311_v2  ;;  %v426_v13 = vmul.f32 %v817_v8, %v1339_v7 }
  0x54   : > { %v554_v45 = vadd.f32 %v1675_v23, %v458_v61  ;;  %v421_v16 = vmul.f32 %v1676_v11, %v1339_v7  ;;  %v422_v18 = vmul.f32 %v1677_v31, %v1339_v7  ;;  %v423_v32 = vmul.f32 %v1678_v19, %v1339_v7  ;;  %615 = vst [vmem:[%s1420_s10 + $0xa0] sm:$0xff] %v583_v4 }
  0x55   : > { %v424_v51 = vmul.f32 %v1679_v1, %v1339_v7  ;;  %616 = vst [vmem:[%s1420_s10 + $0xa8] sm:$0xff] %v584_v55  ;;  %v585_v21 = vmax.f32 %v553_v29, 0.0  ;;  %v425_v36 = vmul.f32 %v1680_v35, %v1339_v7  ;;  %v464_v46 = vadd.f32 %v1371_v28, %v426_v13 }
  0x56   : > { %v586_v27 = vmax.f32 %v554_v45, 0.0  ;;  %v459_v40 = vadd.f32 %v1371_v28, %v421_v16  ;;  %v460_v56 = vadd.f32 %v1371_v28, %v422_v18  ;;  %v461_v38 = vadd.f32 %v1371_v28, %v423_v32 }
  0x57   : > { %v462_v60 = vadd.f32 %v1371_v28, %v424_v51  ;;  %617 = vst [vmem:[%s1420_s10 + $0xb0] sm:$0xff] %v585_v21  ;;  %v463_v42 = vadd.f32 %v1371_v28, %v425_v36  ;;  %v427_v2 = vmul.f32 %v820_v37, %v1339_v7  ;;  %v428_v8 = vmul.f32 %v821_v47, %v1339_v7 }
  0x58   : > { %618 = vst [vmem:[%s1420_s10 + $0xb8] sm:$0xff] %v586_v27  ;;  %v1681_v30 = vunpack.c.l.bf16 %v1291_v58  ;;  %v1682_v20 = vunpack.c.h.bf16 %v1291_v58  ;;  %v1683_v48 = vunpack.c.l.bf16 %v1304_v12  ;;  %v1684_v10 = vunpack.c.h.bf16 %v1304_v12 }
  0x59   : > { %v559_v37 = vadd.f32 %v880_v14, %v463_v42  ;;  %v560_v47 = vadd.f32 %v1685_v63, %v464_v46  ;;  %v465_v7 = vadd.f32 %v1371_v28, %v427_v2  ;;  %v466_v58 = vadd.f32 %v1371_v28, %v428_v8 }
  0x5a   : > { %v555_v62 = vadd.f32 %v1681_v30, %v459_v40  ;;  %v556_v34 = vadd.f32 %v1682_v20, %v460_v56  ;;  %v557_v15 = vadd.f32 %v1683_v48, %v461_v38  ;;  %v558_v44 = vadd.f32 %v1684_v10, %v462_v60 }
  0x5b   : > { %v591_v14 = vmax.f32 %v559_v37, 0.0  ;;  %v592_v6 = vmax.f32 %v560_v47, 0.0  ;;  %v1686_v54 = vunpack.c.l.bf16 %v1327_v49  ;;  %v562_v50 = vadd.f32 %v885_v53, %v466_v58 }
  0x5c   : > { %v587_v52 = vmax.f32 %v555_v62, 0.0  ;;  %v588_v12 = vmax.f32 %v556_v34, 0.0  ;;  %v589_v24 = vmax.f32 %v557_v15, 0.0  ;;  %v590_v26 = vmax.f32 %v558_v44, 0.0 }
  0x5d   : > { %v561_v43 = vadd.f32 %v1686_v54, %v465_v7  ;;  %623 = vst [vmem:[%s1420_s10 + $0xe0] sm:$0xff] %v591_v14  ;;  %624 = vst [vmem:[%s1420_s10 + $0xe8] sm:$0xff] %v592_v6  ;;  %v594_v57 = vmax.f32 %v562_v50, 0.0 }
  0x5e   : > { %619 = vst [vmem:[%s1420_s10 + $0xc0] sm:$0xff] %v587_v52  ;;  %620 = vst [vmem:[%s1420_s10 + $0xc8] sm:$0xff] %v588_v12 }
  0x5f   : > { %621 = vst [vmem:[%s1420_s10 + $0xd0] sm:$0xff] %v589_v24  ;;  %622 = vst [vmem:[%s1420_s10 + $0xd8] sm:$0xff] %v590_v26  ;;  %v593_v28 = vmax.f32 %v561_v43, 0.0 }
  0x60   : > { %626 = vst [vmem:[%s1420_s10 + $0xf8] sm:$0xff] %v594_v57 }
  0x61   : > { %625 = vst [vmem:[%s1420_s10 + $0xf0] sm:$0xff] %v593_v28 }
  0x62   : > { %989 = shalt.err (!%p986_p5)
}
  0x63   : > { %s990_s27 = scalar_lea.hbm %s1581_s14, 4096  ;;  %s994_s8 = scalar_lea.hbm %s1642_s5, 8192 }
  0x64   : > { %p991_p6 = scmp.ne.s32.totalorder %s1581_s14, %s990_s27  ;;  %p995_p10 = scmp.lt.u32.totalorder %s1581_s14, %s1642_s5 }
  0x65   : > { %p996_p11 = scmp.lt.u32.totalorder %s994_s8, %s990_s27  ;;  %p998_p13 = scmp.lt.u32.totalorder %s990_s27, %s1581_s14 }
  0x66   : > { %p992_p7 = pnand %p991_p6, %p1130_p4 }
  0x67   : > { %p997_p12 = por %p996_p11, %p995_p10 }
  0x68   : > { %p993_p9 = pneg %p992_p7 }
  0x69   : > { %p999_p0 = por %p998_p13, %p997_p12 }
  0x6b   : > { %p1000_p1 = pnand %p999_p0, %p993_p9 }
  0x6d   : > { %1003 = shalt.err (!%p1000_p1)
}
  0x6e   : > { %s1058_s11 = smov 128   ;;  %s1059_s21 = smov 8  }
  0x6f   : > { %916 = dma.vmem_to_hbm [thread:$0]  (%p1130_p4), %s1585_s12, 4096, %s1581_s14, %s1591_s15, %s1058_s11, %s1058_s11, %s1059_s21  }
  0x70 PF: > { %p922_p2 = scmp.ge.s32.totalorder %s1054_s23, 2  ;;  %s658_s13 = sand.u32 1, %s1034_s18  }
  0x71   : > { %s659_s16 = scalar_lea.sflag [#allocation3], %s658_s13 }
  0x72   : > { %p919_p3 = pnand %p922_p2, %p1137_p8 }
  0x74   : > { %1029 = dma.done.wait (!%p919_p3), %s659_s16, 4096  }
  0x75   : > { %1031 = vsyncadd (!%p919_p3), %s659_s16, 4294963200  ;;  %s18_s23 = sadd.s32 1, %s1054_s23   ;;  %s1687_s18 = smov %s1038_s19 }
  0x76   : > { %p15_p5 = scmp.ge.s32.totalorder %s18_s23, 4   ;;  %s1688_s19 = smov %s1042_s20 }
  0x77   : > { %s1689_s20 = smov %s1143_s6  ;;  %s1690_s21 = smov %s1050_s22 }
  0x78   : > { %s1691_s22 = smov %s1693_s26  ;;  %17 = sbr.rel (!%p15_p5) target bundleno = 4 (0x4), region = 78 }
  0x7f   :  { %664 = vsyncpa [#allocation3], 1 }
  0x80   :  { %666 = vsyncpa [#allocation3 + $0x1], 1 }

// kernel: bottleneck_forward.6
= control target key start
LH: loop header
LB: loop body
LE: loop exit
PB: predicated region body
PF: predicated region fallthrough
CT: control target
= control target key end

     0   :  { %s1566_s21 = smov 0   ;;  %s1568_s22 = smov 0   ;;  %s1846_s0 = inlined_call_operand.vmem [shape: f32[2,2,32], index: 0, kind: input, shape index: {}]   ;;  %s1847_s1 = inlined_call_operand.vmem [shape: f32[1,32], index: 1, kind: input, shape index: {}]   ;;  %s1848_s2 = inlined_call_operand.vmem [shape: f32[1,32], index: 2, kind: input, shape index: {}]   ;;  %s1849_s3 = inlined_call_operand.vmem [shape: bf16[2,256,32], index: 3, kind: input, shape index: {}]   ;;  %s1850_s4 = inlined_call_operand.vmem [shape: bf16[32,128], index: 4, kind: input, shape index: {}]   ;;  %s1851_s5 = inlined_call_operand.vmem [shape: bf16[2,256,128], index: 5, kind: output, shape index: {0}]   ;;  %s1852_s6 = inlined_call_operand.vmem [shape: f32[2,2,128], index: 6, kind: output, shape index: {1}]  }
   0x1   :  { %s1570_s23 = smov 0  }
   0x2 LB: > { %s29_s24 = sadd.s32 1, %s1524_s22  ;;  %p1153_p0 = scmp.ge.s32.totalorder %s1528_s23, 1  ;;  %s1528_s23 = sphi %s1570_s23, %s17_s23   ;;  %s1524_s22 = sphi %s1568_s22, %s1854_s22   ;;  %s1520_s21 = sphi %s1566_s21, %s1853_s21  }
   0x3   : > { %p31_p1 = scmp.ge.s32.totalorder %s29_s24, 2  ;;  %p238_p2 = scmp.lt.s32.totalorder %s1528_s23, 3 }
   0x5   : > { %s1856_s24 = smov (%p31_p1, %s29_s24), 0  ;;  %p239_p3 = pnand %p1153_p0, %p238_p2 }
   0x6   : > { %v1502_v0 = vld [vmem:[%s1850_s4] sm:$0xff] (!%p239_p3)   ;;  %v1503_v1 = vld [vmem:[%s1850_s4 + $0x8] sm:$0xff] (!%p239_p3)   ;;  %vm312_vm0 = vcmask (!%p239_p3), 254976   ;;  %p282_p4 = scmp.lt.s32.totalorder (!%p239_p3), %s1520_s21, 1  ;;  %v1530_v13 = vmov (!%p239_p3), 1966171168   ;;  %v329_v15 = vlaneseq (!%p239_p3) }
   0x7   : > { %242 = sbr.rel (%p239_p3) target bundleno = 348 (0x15c), region = 40  ;;  %1437 = vmatprep.subr.bf16.mxu0 (!%p239_p3), %v1502_v0  ;;  %v308_v2 = vld [vmem:[%s1846_s0] sm:$0x3] (!%p239_p3)  ;;  %v309_v3 = vld [vmem:[%s1846_s0 + $0x2] sm:$0x3] (!%p239_p3)  ;;  %1473 = vmatprep.subr.bf16.mxu1 (!%p239_p3), %v1502_v0  ;;  %v327_v14 = vunpack.c.l.s4 (!%p239_p3), %v1530_v13  ;;  %vm549_vm1 = vcmask (!%p239_p3), 261120  }
   0x8   : > { %1438 = vmatpush3.bf16.msra.mxu0 (!%p239_p3), %v1502_v0  ;;  %v313_v4 = vsel (!%p239_p3), %vm312_vm0, %v308_v2, 0.0  ;;  %v314_v5 = vsel (!%p239_p3), %vm312_vm0, %v309_v3, 0.0  ;;  %1475 = vmatpush3.bf16.msra.mxu1 (!%p239_p3), %v1502_v0  ;;  %v330_v17 = vshrl.u32 (!%p239_p3), %v329_v15, 7  ;;  %v310_v29 = vld [vmem:[%s1847_s1] sm:$0x1] (!%p239_p3)  ;;  %vm1025_vm2 = vcmask (!%p239_p3), 1040384  }
   0x9   : > { %1439 = vmatprep.subr.bf16.mxu0 (!%p239_p3), %v1503_v1  ;;  %v315_v6 = vadd.f32 (!%p239_p3), %v314_v5, %v313_v4  ;;  %1474 = vmatprep.subr.bf16.mxu1 (!%p239_p3), %v1503_v1  ;;  %v328_v16 = vunpack.c.0.s8 (!%p239_p3), %v327_v14  ;;  %v311_v52 = vld [vmem:[%s1848_s2] sm:$0x1] (!%p239_p3) }
   0xa   : > { %v412_v26 = vsub.s32 (!%p239_p3), 0, %v330_v17 }
   0xb   : > { %v316_v7 = vmul.f32 (!%p239_p3), 0.001953125, %v315_v6  ;;  %v331_v18 = vsub.s32 (!%p239_p3), %v328_v16, %v330_v17 }
   0xc   : > { %1440 = vmatpush3.bf16.msra.mxu0 (!%p239_p3), %v1503_v1  ;;  %1476 = vmatpush3.bf16.msra.mxu1 (!%p239_p3), %v1503_v1 }
   0xd   : > { %v317_v8 = vmul.f32 (!%p239_p3), %v316_v7, %v316_v7 }
   0xe   : > { %s1858_s21 = smov (!%p282_p4, %s1520_s21), 1 }
   0xf   : > { %v319_v9 = vrot.slane %v317_v8, 7  ;;  %s1211_s9 = sshll.u32 %s1858_s21, 7  ;;  %s1158_s20 = sshll.u32 %s1858_s21, 1 }
  0x10   : > { %s1608_s12 = scalar_lea.vmem %s1849_s3, %s1211_s9  ;;  %s1773_s19 = scalar_lea.vmem %s1851_s5, %s1211_s9 }
  0x11   : > { %v321_v10 = vsub.f32 %v316_v7, %v319_v9  ;;  %v1246_v21 = vld [vmem:[%s1608_s12] sm:$0xff]   ;;  %v1389_v22 = vld [vmem:[%s1608_s12 + $0x8] sm:$0xff]   ;;  %v1390_v23 = vld [vmem:[%s1608_s12 + $0x10] sm:$0xff]   ;;  %s305_s27 = scalar_lea.vmem %s1852_s6, %s1158_s20 }
  0x12   : > { %v1391_v24 = vld [vmem:[%s1608_s12 + $0x18] sm:$0xff]   ;;  %v1392_v27 = vld [vmem:[%s1608_s12 + $0x20] sm:$0xff]   ;;  %v1393_v28 = vld [vmem:[%s1608_s12 + $0x28] sm:$0xff]   ;;  %v1247_v30 = vunpack.c.l.bf16 %v1246_v21  ;;  %v1248_v31 = vunpack.c.h.bf16 %v1246_v21  ;;  %v1251_v32 = vunpack.c.l.bf16 %v1389_v22  ;;  %v1252_v33 = vunpack.c.h.bf16 %v1389_v22 }
  0x13   : > { %v322_v11 = vmax.f32 %v321_v10, 0.0  ;;  %v1394_v34 = vld [vmem:[%s1608_s12 + $0x30] sm:$0xff]   ;;  %v1255_v36 = vunpack.c.l.bf16 %v1390_v23  ;;  %v1256_v37 = vunpack.c.h.bf16 %v1390_v23  ;;  %v1259_v38 = vunpack.c.l.bf16 %v1391_v24  ;;  %v1621_v39 = vld [vmem:[%s1608_s12 + $0x38] sm:$0xff]   ;;  %v1624_v40 = vld [vmem:[%s1608_s12 + $0x40] sm:$0xff]  }
  0x14   : > { %v1260_v41 = vunpack.c.h.bf16 %v1391_v24  ;;  %v1263_v42 = vunpack.c.l.bf16 %v1392_v27  ;;  %v1264_v43 = vunpack.c.h.bf16 %v1392_v27  ;;  %v1267_v44 = vunpack.c.l.bf16 %v1393_v28  ;;  %v1627_v45 = vld [vmem:[%s1608_s12 + $0x48] sm:$0xff]   ;;  %v1630_v50 = vld [vmem:[%s1608_s12 + $0x50] sm:$0xff]   ;;  %v1633_v51 = vld [vmem:[%s1608_s12 + $0x58] sm:$0xff]  }
  0x15   : > { %v323_v12 = vadd.f32 1e-05, %v322_v11  ;;  %v1268_v47 = vunpack.c.h.bf16 %v1393_v28  ;;  %v1271_v48 = vunpack.c.l.bf16 %v1394_v34  ;;  %v1272_v49 = vunpack.c.h.bf16 %v1394_v34  ;;  %v1678_v34 = vld [vmem:[%s1608_s12 + $0x68] sm:$0xff]  }
  0x16   : > { %v1275_v53 = vunpack.c.l.bf16 %v1621_v39  ;;  %v1276_v54 = vunpack.c.h.bf16 %v1621_v39  ;;  %v1279_v55 = vunpack.c.l.bf16 %v1624_v40  ;;  %v1280_v56 = vunpack.c.h.bf16 %v1624_v40 }
  0x17   : > { %1504 = vrsqrt.f32 %v323_v12  ;;  %v1283_v59 = vunpack.c.l.bf16 %v1627_v45  ;;  %v1284_v60 = vunpack.c.h.bf16 %v1627_v45  ;;  %v1287_v61 = vunpack.c.l.bf16 %v1630_v50 }
  0x18   : > { %v1288_v62 = vunpack.c.h.bf16 %v1630_v50  ;;  %v1291_v63 = vunpack.c.l.bf16 %v1633_v51  ;;  %v1292_v0 = vunpack.c.h.bf16 %v1633_v51 }
  0x21   : > { %v1505_v19 = vpop.eup %1504 }
  0x22   : > { %v332_v20 = vrot.slane %v1505_v19, %v331_v18 }
  0x24   : > { %v333_v25 = vcombine.high %v332_v20, %v332_v20 }
  0x26   : > { %v340_v35 = vrot.slane %v333_v25, %v331_v18 }
  0x28   : > { %v342_v46 = vmul.f32 %v340_v35, %v310_v29  ;;  %v1675_v29 = vld [vmem:[%s1608_s12 + $0x60] sm:$0xff]  }
  0x2a   : > { %v343_v57 = vmul.f32 %v342_v46, %v316_v7  ;;  %v1642_v58 = vrot.slane %v342_v46, %v412_v26  ;;  %v1295_v46 = vunpack.c.l.bf16 %v1675_v29 }
  0x2c   : > { %v344_v1 = vsub.f32 %v311_v52, %v343_v57  ;;  %v415_v2 = vmul.f32 %v1247_v30, %v1642_v58  ;;  %v416_v3 = vmul.f32 %v1248_v31, %v1642_v58  ;;  %v417_v4 = vmul.f32 %v1251_v32, %v1642_v58 }
  0x2d   : > { %v418_v5 = vmul.f32 %v1252_v33, %v1642_v58  ;;  %v419_v6 = vmul.f32 %v1255_v36, %v1642_v58  ;;  %v420_v7 = vmul.f32 %v1256_v37, %v1642_v58  ;;  %v421_v8 = vmul.f32 %v1259_v38, %v1642_v58 }
  0x2e   : > { %v1657_v9 = vrot.slane %v344_v1, %v412_v26  ;;  %v422_v10 = vmul.f32 %v1260_v41, %v1642_v58  ;;  %v423_v11 = vmul.f32 %v1263_v42, %v1642_v58  ;;  %v424_v12 = vmul.f32 %v1264_v43, %v1642_v58  ;;  %v1683_v41 = vld [vmem:[%s1608_s12 + $0x70] sm:$0xff]  }
  0x2f   : > { %v425_v13 = vmul.f32 %v1267_v44, %v1642_v58  ;;  %v426_v14 = vmul.f32 %v1268_v47, %v1642_v58  ;;  %v427_v15 = vmul.f32 %v1271_v48, %v1642_v58  ;;  %v428_v16 = vmul.f32 %v1272_v49, %v1642_v58 }
  0x30   : > { %v453_v17 = vadd.f32 %v1657_v9, %v415_v2  ;;  %v454_v18 = vadd.f32 %v1657_v9, %v416_v3  ;;  %v455_v19 = vadd.f32 %v1657_v9, %v417_v4  ;;  %v456_v20 = vadd.f32 %v1657_v9, %v418_v5 }
  0x31   : > { %v457_v21 = vadd.f32 %v1657_v9, %v419_v6  ;;  %v458_v22 = vadd.f32 %v1657_v9, %v420_v7  ;;  %v459_v23 = vadd.f32 %v1657_v9, %v421_v8  ;;  %v460_v24 = vadd.f32 %v1657_v9, %v422_v10 }
  0x32   : > { %v485_v25 = vmax.f32 %v453_v17, 0.0  ;;  %v486_v26 = vmax.f32 %v454_v18, 0.0  ;;  %v487_v27 = vmax.f32 %v455_v19, 0.0  ;;  %v488_v28 = vmax.f32 %v456_v20, 0.0 }
  0x33   : > { %v489_v30 = vmax.f32 %v457_v21, 0.0  ;;  %v490_v31 = vmax.f32 %v458_v22, 0.0  ;;  %v491_v32 = vmax.f32 %v459_v23, 0.0  ;;  %v492_v33 = vmax.f32 %v460_v24, 0.0 }
  0x34   : > { %v517_v35 = vpack.c.bf16 %v486_v26, %v485_v25  ;;  %v518_v36 = vpack.c.bf16 %v488_v28, %v487_v27  ;;  %v461_v37 = vadd.f32 %v1657_v9, %v423_v11  ;;  %v462_v38 = vadd.f32 %v1657_v9, %v424_v12 }
  0x35   : > { %v519_v42 = vpack.c.bf16 %v490_v31, %v489_v30  ;;  %v463_v43 = vadd.f32 %v1657_v9, %v425_v13  ;;  %v464_v44 = vadd.f32 %v1657_v9, %v426_v14  ;;  %v1296_v49 = vunpack.c.h.bf16 %v1675_v29 }
  0x36   : > { %1441 = vmatprep.mubr.msk.bf16.mxu0 %vm549_vm1, %v517_v35  ;;  %v493_v47 = vmax.f32 %v461_v37, 0.0  ;;  %v494_v48 = vmax.f32 %v462_v38, 0.0  ;;  %v1299_v52 = vunpack.c.l.bf16 %v1678_v34  ;;  %v465_v57 = vadd.f32 %v1657_v9, %v427_v15 }
  0x37   : > { %1442 = vmatmul.mubr.msk.bf16.vlgmr.msra.gmra.mrb[0].mxu0 %vm549_vm1, %v518_v36  ;;  %v466_v1 = vadd.f32 %v1657_v9, %v428_v16  ;;  %v1300_v2 = vunpack.c.h.bf16 %v1678_v34  ;;  %v1303_v3 = vunpack.c.l.bf16 %v1683_v41  ;;  %v520_v4 = vpack.c.bf16 %v492_v33, %v491_v32  ;;  %v1403_v34 = vld [vmem:[%s1608_s12 + $0x78] sm:$0xff]  }
  0x38   : > { %1445 = vmatprep.mubr.msk.bf16.mxu0 %vm549_vm1, %v519_v42  ;;  %v495_v5 = vmax.f32 %v463_v43, 0.0  ;;  %v431_v6 = vmul.f32 %v1279_v55, %v1642_v58  ;;  %v1304_v7 = vunpack.c.h.bf16 %v1683_v41  ;;  %v496_v8 = vmax.f32 %v464_v44, 0.0 }
  0x39   : > { %v429_v10 = vmul.f32 %v1275_v53, %v1642_v58  ;;  %v430_v11 = vmul.f32 %v1276_v54, %v1642_v58  ;;  %v432_v12 = vmul.f32 %v1280_v56, %v1642_v58  ;;  %v521_v13 = vpack.c.bf16 %v494_v48, %v493_v47 }
  0x3a   : > { %v469_v14 = vadd.f32 %v1657_v9, %v431_v6  ;;  %v433_v55 = vmul.f32 %v1283_v59, %v1642_v58  ;;  %v434_v15 = vmul.f32 %v1284_v60, %v1642_v58  ;;  %v497_v53 = vmax.f32 %v465_v57, 0.0 }
  0x3b   : > { %v498_v16 = vmax.f32 %v466_v1, 0.0  ;;  %v470_v39 = vadd.f32 %v1657_v9, %v432_v12  ;;  %v435_v40 = vmul.f32 %v1287_v61, %v1642_v58  ;;  %v436_v59 = vmul.f32 %v1288_v62, %v1642_v58 }
  0x3c   : > { %v501_v54 = vmax.f32 %v469_v14, 0.0  ;;  %v471_v56 = vadd.f32 %v1657_v9, %v433_v55  ;;  %v472_v17 = vadd.f32 %v1657_v9, %v434_v15  ;;  %v522_v18 = vpack.c.bf16 %v496_v8, %v495_v5 }
  0x3d   : > { %v502_v45 = vmax.f32 %v470_v39, 0.0  ;;  %v473_v60 = vadd.f32 %v1657_v9, %v435_v40  ;;  %v437_v19 = vmul.f32 %v1291_v63, %v1642_v58  ;;  %v474_v61 = vadd.f32 %v1657_v9, %v436_v59 }
  0x3e   : > { %v503_v20 = vmax.f32 %v471_v56, 0.0  ;;  %v504_v21 = vmax.f32 %v472_v17, 0.0  ;;  %v438_v22 = vmul.f32 %v1292_v0, %v1642_v58  ;;  %v439_v24 = vmul.f32 %v1295_v46, %v1642_v58 }
  0x3f   : > { %1446 = vmatmul.mubr.msk.bf16.gmra.mrb[4].mxu0 %vm549_vm1, %v520_v4  ;;  %v525_v50 = vpack.c.bf16 %v502_v45, %v501_v54  ;;  %v505_v62 = vmax.f32 %v473_v60, 0.0  ;;  %v475_v23 = vadd.f32 %v1657_v9, %v437_v19  ;;  %v506_v25 = vmax.f32 %v474_v61, 0.0 }
  0x40   : > { %1449 = vmatprep.mubr.msk.bf16.mxu0 %vm549_vm1, %v521_v13  ;;  %v526_v63 = vpack.c.bf16 %v504_v21, %v503_v20  ;;  %v476_v26 = vadd.f32 %v1657_v9, %v438_v22  ;;  %v440_v27 = vmul.f32 %v1296_v49, %v1642_v58  ;;  %v467_v51 = vadd.f32 %v1657_v9, %v429_v10 }
  0x41   : > { %1457 = vmatprep.mubr.msk.bf16.mxu1 %vm549_vm1, %v525_v50  ;;  %v507_v0 = vmax.f32 %v475_v23, 0.0  ;;  %v477_v28 = vadd.f32 %v1657_v9, %v439_v24  ;;  %v441_v29 = vmul.f32 %v1299_v52, %v1642_v58  ;;  %v527_v30 = vpack.c.bf16 %v506_v25, %v505_v62 }
  0x42   : > { %1458 = vmatmul.mubr.msk.bf16.vlgmr.msra.gmra.mrb[0].mxu1 %vm549_vm1, %v526_v63  ;;  %v508_v31 = vmax.f32 %v476_v26, 0.0  ;;  %v478_v32 = vadd.f32 %v1657_v9, %v440_v27  ;;  %v442_v33 = vmul.f32 %v1300_v2, %v1642_v58  ;;  %v468_v35 = vadd.f32 %v1657_v9, %v430_v11 }
  0x43   : > { %v509_v36 = vmax.f32 %v477_v28, 0.0  ;;  %v443_v37 = vmul.f32 %v1303_v3, %v1642_v58  ;;  %v444_v38 = vmul.f32 %v1304_v7, %v1642_v58  ;;  %v523_v41 = vpack.c.bf16 %v498_v16, %v497_v53  ;;  %1461 = vmatprep.mubr.msk.bf16.mxu1 %vm549_vm1, %v527_v30 }
  0x44   : > { %v510_v42 = vmax.f32 %v478_v32, 0.0  ;;  %v1307_v43 = vunpack.c.l.bf16 %v1403_v34  ;;  %v1308_v44 = vunpack.c.h.bf16 %v1403_v34  ;;  %v499_v46 = vmax.f32 %v467_v51, 0.0 }
  0x45   : > { %v528_v47 = vpack.c.bf16 %v508_v31, %v507_v0  ;;  %v479_v48 = vadd.f32 %v1657_v9, %v441_v29  ;;  %v480_v49 = vadd.f32 %v1657_v9, %v442_v33  ;;  %v500_v52 = vmax.f32 %v468_v35, 0.0 }
  0x46   : > { %v529_v57 = vpack.c.bf16 %v510_v42, %v509_v36  ;;  %v481_v1 = vadd.f32 %v1657_v9, %v443_v37  ;;  %v482_v2 = vadd.f32 %v1657_v9, %v444_v38  ;;  %v445_v5 = vmul.f32 %v1307_v43, %v1642_v58 }
  0x47   : > { %1450 = vmatmul.mubr.msk.bf16.gmra.mrb[8].mxu0 %vm549_vm1, %v522_v18  ;;  %v511_v3 = vmax.f32 %v479_v48, 0.0  ;;  %v512_v4 = vmax.f32 %v480_v49, 0.0  ;;  %v446_v6 = vmul.f32 %v1308_v44, %v1642_v58  ;;  %v524_v7 = vpack.c.bf16 %v500_v52, %v499_v46 }
  0x48   : > { %1453 = vmatprep.mubr.msk.bf16.mxu0 %vm549_vm1, %v523_v41  ;;  %v513_v8 = vmax.f32 %v481_v1, 0.0  ;;  %v514_v10 = vmax.f32 %v482_v2, 0.0  ;;  %v483_v12 = vadd.f32 %v1657_v9, %v445_v5 }
  0x49   : > { %v530_v11 = vpack.c.bf16 %v512_v4, %v511_v3  ;;  %v484_v13 = vadd.f32 %v1657_v9, %v446_v6 }
  0x4a   : > { %1462 = vmatmul.mubr.msk.bf16.gmra.mrb[4].mxu1 %vm549_vm1, %v528_v47  ;;  %v531_v14 = vpack.c.bf16 %v514_v10, %v513_v8  ;;  %v515_v55 = vmax.f32 %v483_v12, 0.0 }
  0x4b   : > { %1465 = vmatprep.mubr.msk.bf16.mxu1 %vm549_vm1, %v529_v57  ;;  %v516_v15 = vmax.f32 %v484_v13, 0.0 }
  0x4d   : > { %v532_v58 = vpack.c.bf16 %v516_v15, %v515_v55 }
  0x4f   : > { %1454 = vmatmul.mubr.msk.bf16.gmra.mrb[12].mxu0 %vm549_vm1, %v524_v7 }
  0x52   : > { %1466 = vmatmul.mubr.msk.bf16.gmra.mrb[8].mxu1 %vm549_vm1, %v530_v11 }
  0x53   : > { %1469 = vmatprep.mubr.msk.bf16.mxu1 %vm549_vm1, %v531_v14 }
  0x5a   : > { %1470 = vmatmul.mubr.msk.bf16.gmra.mrb[12].mxu1 %vm549_vm1, %v532_v58 }
 0x10a   : > { %v1443_v53 = vpop.f32.mrb[0].mxu0 }
 0x10b   : > { %v632_v16 = vpop.f32.mrb[1].mxu0  ;;  %v958_v18 = vmul.f32 %v1443_v53, %v1443_v53 }
 0x10c   : > { %v1444_v9 = vpop.f32.mrb[2].mxu0  ;;  %v956_v54 = vmul.f32 %v632_v16, %v632_v16 }
 0x10d   : > { %v1317_v39 = vpack.c.bf16 %v1444_v9, %v1443_v53  ;;  %v635_v40 = vpop.f32.mrb[3].mxu0  ;;  %v959_v19 = vmul.f32 %v1444_v9, %v1444_v9 }
 0x10e   : > { %v1312_v56 = vpack.c.bf16 %v635_v40, %v632_v16  ;;  %v919_v17 = vadd.f32 %v635_v40, %v632_v16  ;;  %v957_v59 = vmul.f32 %v635_v40, %v635_v40 }
 0x10f   : > { %1404 = vst [vmem:[%s1773_s19 + $0x8] sm:$0xff] %v1317_v39  }
 0x110   : > { %1313 = vst [vmem:[%s1773_s19] sm:$0xff] %v1312_v56   ;;  %v920_v45 = vadd.f32 %v1443_v53, %v919_v17  ;;  %v988_v60 = vadd.f32 %v957_v59, %v956_v54 }
 0x112   : > { %v989_v20 = vadd.f32 %v988_v60, %v958_v18  ;;  %v1447_v21 = vpop.f32.mrb[4].mxu0  ;;  %v921_v61 = vadd.f32 %v1444_v9, %v920_v45 }
 0x113   : > { %v648_v22 = vpop.f32.mrb[5].mxu0  ;;  %v962_v31 = vmul.f32 %v1447_v21, %v1447_v21 }
 0x114   : > { %v922_v50 = vadd.f32 %v921_v61, %v648_v22  ;;  %v960_v62 = vmul.f32 %v648_v22, %v648_v22  ;;  %v990_v23 = vadd.f32 %v989_v20, %v959_v19  ;;  %v1448_v24 = vpop.f32.mrb[6].mxu0 }
 0x115   : > { %v1327_v63 = vpack.c.bf16 %v1448_v24, %v1447_v21  ;;  %v651_v25 = vpop.f32.mrb[7].mxu0  ;;  %v1777_v26 = vpop.f32.mrb[0].mxu1  ;;  %v963_v37 = vmul.f32 %v1448_v24, %v1448_v24 }
 0x116   : > { %v991_v27 = vadd.f32 %v990_v23, %v960_v62  ;;  %v1322_v51 = vpack.c.bf16 %v651_v25, %v648_v22  ;;  %v923_v0 = vadd.f32 %v922_v50, %v651_v25  ;;  %v961_v28 = vmul.f32 %v651_v25, %v651_v25  ;;  %v1779_v29 = vpop.f32.mrb[1].mxu1 }
 0x117   : > { %1406 = vst [vmem:[%s1773_s19 + $0x18] sm:$0xff] %v1327_v63   ;;  %v1782_v30 = vpop.f32.mrb[2].mxu1 }
 0x118   : > { %1405 = vst [vmem:[%s1773_s19 + $0x10] sm:$0xff] %v1322_v51   ;;  %v924_v32 = vadd.f32 %v1447_v21, %v923_v0  ;;  %v992_v33 = vadd.f32 %v991_v27, %v961_v28  ;;  %v1357_v34 = vpack.c.bf16 %v1782_v30, %v1777_v26  ;;  %v1787_v35 = vpop.f32.mrb[3].mxu1  ;;  %v972_v27 = vmul.f32 %v1779_v29, %v1779_v29 }
 0x119   : > { %v1352_v36 = vpack.c.bf16 %v1787_v35, %v1779_v29 }
 0x11a   : > { %v993_v38 = vadd.f32 %v992_v33, %v962_v31  ;;  %v1451_v41 = vpop.f32.mrb[8].mxu0  ;;  %v925_v42 = vadd.f32 %v1448_v24, %v924_v32  ;;  %1412 = vst [vmem:[%s1773_s19 + $0x48] sm:$0xff] %v1357_v34   ;;  %v973_v33 = vmul.f32 %v1787_v35, %v1787_v35 }
 0x11b   : > { %v664_v43 = vpop.f32.mrb[9].mxu0  ;;  %1411 = vst [vmem:[%s1773_s19 + $0x40] sm:$0xff] %v1352_v36   ;;  %v966_v7 = vmul.f32 %v1451_v41, %v1451_v41 }
 0x11c   : > { %v926_v44 = vadd.f32 %v925_v42, %v664_v43  ;;  %v964_v46 = vmul.f32 %v664_v43, %v664_v43  ;;  %v994_v47 = vadd.f32 %v993_v38, %v963_v37  ;;  %v1452_v48 = vpop.f32.mrb[10].mxu0  ;;  %v974_v37 = vmul.f32 %v1777_v26, %v1777_v26 }
 0x11d   : > { %v1337_v49 = vpack.c.bf16 %v1452_v48, %v1451_v41  ;;  %v667_v52 = vpop.f32.mrb[11].mxu0  ;;  %v1793_v57 = vpop.f32.mrb[4].mxu1  ;;  %v967_v14 = vmul.f32 %v1452_v48, %v1452_v48 }
 0x11e   : > { %v995_v1 = vadd.f32 %v994_v47, %v964_v46  ;;  %v1332_v2 = vpack.c.bf16 %v667_v52, %v664_v43  ;;  %v927_v3 = vadd.f32 %v926_v44, %v667_v52  ;;  %v965_v4 = vmul.f32 %v667_v52, %v667_v52  ;;  %v1795_v5 = vpop.f32.mrb[5].mxu1 }
 0x11f   : > { %1408 = vst [vmem:[%s1773_s19 + $0x28] sm:$0xff] %v1337_v49   ;;  %v1798_v6 = vpop.f32.mrb[6].mxu1  ;;  %v975_v44 = vmul.f32 %v1782_v30, %v1782_v30 }
 0x120   : > { %1407 = vst [vmem:[%s1773_s19 + $0x20] sm:$0xff] %v1332_v2   ;;  %v928_v8 = vadd.f32 %v1451_v41, %v927_v3  ;;  %v996_v10 = vadd.f32 %v995_v1, %v965_v4  ;;  %v1367_v11 = vpack.c.bf16 %v1798_v6, %v1793_v57  ;;  %v715_v12 = vpop.f32.mrb[7].mxu1  ;;  %v978_v2 = vmul.f32 %v1793_v57, %v1793_v57 }
 0x121   : > { %v1362_v13 = vpack.c.bf16 %v715_v12, %v1795_v5  ;;  %v977_v1 = vmul.f32 %v715_v12, %v715_v12 }
 0x122   : > { %v997_v55 = vadd.f32 %v996_v10, %v966_v7  ;;  %v1455_v15 = vpop.f32.mrb[12].mxu0  ;;  %v929_v58 = vadd.f32 %v1452_v48, %v928_v8  ;;  %1414 = vst [vmem:[%s1773_s19 + $0x58] sm:$0xff] %v1367_v11  }
 0x123   : > { %v680_v53 = vpop.f32.mrb[13].mxu0  ;;  %1413 = vst [vmem:[%s1773_s19 + $0x50] sm:$0xff] %v1362_v13   ;;  %v970_v21 = vmul.f32 %v1455_v15, %v1455_v15 }
 0x124   : > { %v930_v16 = vadd.f32 %v929_v58, %v680_v53  ;;  %v968_v9 = vmul.f32 %v680_v53, %v680_v53  ;;  %v998_v39 = vadd.f32 %v997_v55, %v967_v14  ;;  %v1456_v40 = vpop.f32.mrb[14].mxu0 }
 0x125   : > { %v1347_v54 = vpack.c.bf16 %v1456_v40, %v1455_v15  ;;  %v683_v56 = vpop.f32.mrb[15].mxu0  ;;  %v1467_v17 = vpop.f32.mrb[8].mxu1  ;;  %v971_v24 = vmul.f32 %v1456_v40, %v1456_v40 }
 0x126   : > { %v999_v59 = vadd.f32 %v998_v39, %v968_v9  ;;  %v1342_v18 = vpack.c.bf16 %v683_v56, %v680_v53  ;;  %v931_v45 = vadd.f32 %v930_v16, %v683_v56  ;;  %v969_v60 = vmul.f32 %v683_v56, %v683_v56  ;;  %v728_v19 = vpop.f32.mrb[9].mxu1 }
 0x127   : > { %1410 = vst [vmem:[%s1773_s19 + $0x38] sm:$0xff] %v1347_v54   ;;  %v1468_v20 = vpop.f32.mrb[10].mxu1  ;;  %v980_v10 = vmul.f32 %v728_v19, %v728_v19 }
 0x128   : > { %1409 = vst [vmem:[%s1773_s19 + $0x30] sm:$0xff] %v1342_v18   ;;  %v932_v61 = vadd.f32 %v1455_v15, %v931_v45  ;;  %v1000_v22 = vadd.f32 %v999_v59, %v969_v60  ;;  %v1377_v50 = vpack.c.bf16 %v1468_v20, %v1467_v17  ;;  %v731_v62 = vpop.f32.mrb[11].mxu1  ;;  %v982_v15 = vmul.f32 %v1467_v17, %v1467_v17 }
 0x129   : > { %v1372_v23 = vpack.c.bf16 %v731_v62, %v728_v19  ;;  %v981_v55 = vmul.f32 %v731_v62, %v731_v62  ;;  %v983_v53 = vmul.f32 %v1468_v20, %v1468_v20 }
 0x12a   : > { %v1001_v63 = vadd.f32 %v1000_v22, %v970_v21  ;;  %v933_v25 = vadd.f32 %v1456_v40, %v932_v61  ;;  %1416 = vst [vmem:[%s1773_s19 + $0x68] sm:$0xff] %v1377_v50  }
 0x12b   : > { %1415 = vst [vmem:[%s1773_s19 + $0x60] sm:$0xff] %v1372_v23  }
 0x12c   : > { %v934_v51 = vadd.f32 %v933_v25, %v1779_v29  ;;  %v1002_v0 = vadd.f32 %v1001_v63, %v971_v24 }
 0x12d   : > { %v1471_v28 = vpop.f32.mrb[12].mxu1 }
 0x12e   : > { %v1003_v31 = vadd.f32 %v1002_v0, %v972_v27  ;;  %v935_v32 = vadd.f32 %v934_v51, %v1787_v35  ;;  %v744_v34 = vpop.f32.mrb[13].mxu1  ;;  %v976_v35 = vmul.f32 %v1795_v5, %v1795_v5  ;;  %v986_v18 = vmul.f32 %v1471_v28, %v1471_v28 }
 0x12f   : > { %v1472_v36 = vpop.f32.mrb[14].mxu1 }
 0x130   : > { %v936_v38 = vadd.f32 %v1777_v26, %v935_v32  ;;  %v1004_v41 = vadd.f32 %v1003_v31, %v973_v33  ;;  %v1387_v42 = vpack.c.bf16 %v1472_v36, %v1471_v28  ;;  %v747_v29 = vpop.f32.mrb[15].mxu1  ;;  %v987_v60 = vmul.f32 %v1472_v36, %v1472_v36 }
 0x131   : > { %v1382_v43 = vpack.c.bf16 %v747_v29, %v744_v34  ;;  %v985_v59 = vmul.f32 %v747_v29, %v747_v29 }
 0x132   : > { %v1005_v46 = vadd.f32 %v1004_v41, %v974_v37  ;;  %v937_v47 = vadd.f32 %v1782_v30, %v936_v38  ;;  %1418 = vst [vmem:[%s1773_s19 + $0x78] sm:$0xff] %v1387_v42   ;;  %v979_v30 = vmul.f32 %v1798_v6, %v1798_v6 }
 0x133   : > { %1417 = vst [vmem:[%s1773_s19 + $0x70] sm:$0xff] %v1382_v43  }
 0x134   : > { %v938_v48 = vadd.f32 %v937_v47, %v1795_v5  ;;  %v1006_v49 = vadd.f32 %v1005_v46, %v975_v44 }
 0x136   : > { %v1007_v52 = vadd.f32 %v1006_v49, %v976_v35  ;;  %v939_v26 = vadd.f32 %v938_v48, %v715_v12 }
 0x138   : > { %v940_v3 = vadd.f32 %v1793_v57, %v939_v26  ;;  %v1008_v4 = vadd.f32 %v1007_v52, %v977_v1  ;;  %v984_v57 = vmul.f32 %v744_v34, %v744_v34 }
 0x13a   : > { %v1009_v7 = vadd.f32 %v1008_v4, %v978_v2  ;;  %v941_v8 = vadd.f32 %v1798_v6, %v940_v3 }
 0x13c   : > { %v942_v11 = vadd.f32 %v941_v8, %v728_v19  ;;  %v1010_v13 = vadd.f32 %v1009_v7, %v979_v30 }
 0x13e   : > { %v1011_v5 = vadd.f32 %v1010_v13, %v980_v10  ;;  %v943_v14 = vadd.f32 %v942_v11, %v731_v62 }
 0x140   : > { %v944_v12 = vadd.f32 %v1467_v17, %v943_v14  ;;  %v1012_v58 = vadd.f32 %v1011_v5, %v981_v55 }
 0x142   : > { %v1013_v16 = vadd.f32 %v1012_v58, %v982_v15  ;;  %v945_v9 = vadd.f32 %v1468_v20, %v944_v12 }
 0x144   : > { %v946_v39 = vadd.f32 %v945_v9, %v744_v34  ;;  %v1014_v40 = vadd.f32 %v1013_v16, %v983_v53 }
 0x146   : > { %v1015_v54 = vadd.f32 %v1014_v40, %v984_v57  ;;  %v947_v56 = vadd.f32 %v946_v39, %v747_v29 }
 0x148   : > { %v948_v6 = vadd.f32 %v1471_v28, %v947_v56  ;;  %v1016_v45 = vadd.f32 %v1015_v54, %v985_v59 }
 0x14a   : > { %v949_v19 = vadd.f32 %v1472_v36, %v948_v6  ;;  %v1017_v21 = vadd.f32 %v1016_v45, %v986_v18 }
 0x14c   : > { %v950_v61 = vrot.slane %v949_v19, 4  ;;  %v1018_v22 = vadd.f32 %v1017_v21, %v987_v60 }
 0x14e   : > { %v951_v17 = vadd.f32 %v950_v61, %v949_v19  ;;  %v1019_v50 = vrot.slane %v1018_v22, 4 }
 0x150   : > { %v952_v62 = vrot.slane %v951_v17, 2  ;;  %v1020_v23 = vadd.f32 %v1019_v50, %v1018_v22 }
 0x152   : > { %v953_v20 = vadd.f32 %v952_v62, %v951_v17  ;;  %v1021_v24 = vrot.slane %v1020_v23, 2 }
 0x154   : > { %v954_v63 = vrot.slane %v953_v20, 1  ;;  %v1022_v25 = vadd.f32 %v1021_v24, %v1020_v23 }
 0x156   : > { %v1023_v27 = vrot.slane %v1022_v25, 1  ;;  %v955_v51 = vadd.f32 %v954_v63, %v953_v20 }
 0x158   : > { %v1024_v0 = vadd.f32 %v1023_v27, %v1022_v25 }
 0x15a   : > { %v1026_v28 = vsel %vm1025_vm2, %v955_v51, %v1024_v0 }
 0x15b   : > { %1027 = vst [vmem:[%s305_s27] sm:$0x3] %v1026_v28 }
 0x15c PF: > { %s17_s23 = sadd.s32 1, %s1528_s23   ;;  %s1853_s21 = smov %s1524_s22 }
 0x15d   : > { %p14_p5 = scmp.ge.s32.totalorder %s17_s23, 4   ;;  %s1854_s22 = smov %s1856_s24 }
 0x15f   :  { %16 = sbr.rel (!%p14_p5) target bundleno = 2 (0x2), region = 82 }

// kernel: bottleneck_forward.4
= control target key start
LH: loop header
LB: loop body
LE: loop exit
PB: predicated region body
PF: predicated region fallthrough
CT: control target
= control target key end

     0   :  { %s1319_s12 = smov 0   ;;  %s1321_s13 = smov 0   ;;  %s1647_s0 = inlined_call_operand.vmem [shape: bf16[2,256,128], index: 0, kind: input, shape index: {}]   ;;  %s1648_s1 = inlined_call_operand.vmem [shape: bf16[128,32], index: 1, kind: input, shape index: {}]   ;;  %s1649_s2 = inlined_call_operand.vmem [shape: bf16[2,256,32], index: 2, kind: output, shape index: {0}]   ;;  %s1650_s3 = inlined_call_operand.vmem [shape: f32[2,2,32], index: 3, kind: output, shape index: {1}]  }
   0x1   :  { %s1323_s14 = smov 0  }
   0x2 LB: > { %s26_s15 = sadd.s32 1, %s1293_s13  ;;  %p1041_p0 = scmp.ge.s32.totalorder %s1297_s14, 1  ;;  %s1297_s14 = sphi %s1323_s14, %s14_s14   ;;  %s1293_s13 = sphi %s1321_s13, %s1652_s13   ;;  %s1289_s12 = sphi %s1319_s12, %s1651_s12  }
   0x3   : > { %p28_p1 = scmp.ge.s32.totalorder %s26_s15, 2  ;;  %p163_p2 = scmp.lt.s32.totalorder %s1297_s14, 3 }
   0x5   : > { %s1654_s15 = smov (%p28_p1, %s26_s15), 0  ;;  %p164_p3 = pnand %p1041_p0, %p163_p2 }
   0x6   : > { %v1251_v0 = vld [vmem:[%s1648_s1] sm:$0xff] (!%p164_p3)   ;;  %p201_p4 = scmp.lt.s32.totalorder (!%p164_p3), %s1289_s12, 1  ;;  %v1252_v1 = vld [vmem:[%s1648_s1 + $0x8] sm:$0xff] (!%p164_p3)   ;;  %v1253_v2 = vld [vmem:[%s1648_s1 + $0x10] sm:$0xff] (!%p164_p3)   ;;  %vm708_vm0 = vcmask (!%p164_p3), 257024   ;;  %vm741_vm1 = vcmask (!%p164_p3), 261120  }
   0x7   : > { %167 = sbr.rel (%p164_p3) target bundleno = 333 (0x14d), region = 28  ;;  %1163 = vmatprep.subr.bf16.mxu0 (!%p164_p3), %v1251_v0  ;;  %1211 = vmatprep.subr.bf16.mxu1 (!%p164_p3), %v1251_v0  ;;  %v1254_v3 = vld [vmem:[%s1648_s1 + $0x18] sm:$0xff] (!%p164_p3)   ;;  %v1255_v5 = vld [vmem:[%s1648_s1 + $0x20] sm:$0xff] (!%p164_p3)   ;;  %v1256_v6 = vld [vmem:[%s1648_s1 + $0x28] sm:$0xff] (!%p164_p3)   ;;  %vm912_vm2 = vcmask (!%p164_p3), 1040384   ;;  %vm914_vm3 = vcmask (!%p164_p3), 254976  }
   0x8   : > { %1164 = vmatpush3.bf16.msra.mxu0 (!%p164_p3), %v1251_v0  ;;  %1219 = vmatpush3.bf16.msra.mxu1 (!%p164_p3), %v1251_v0  ;;  %v1257_v8 = vld [vmem:[%s1648_s1 + $0x30] sm:$0xff] (!%p164_p3)   ;;  %v1258_v9 = vld [vmem:[%s1648_s1 + $0x38] sm:$0xff] (!%p164_p3)  }
   0x9   : > { %1165 = vmatprep.subr.bf16.mxu0 (!%p164_p3), %v1252_v1  ;;  %1212 = vmatprep.subr.bf16.mxu1 (!%p164_p3), %v1252_v1 }
   0xc   : > { %1166 = vmatpush3.bf16.msra.mxu0 (!%p164_p3), %v1252_v1  ;;  %1220 = vmatpush3.bf16.msra.mxu1 (!%p164_p3), %v1252_v1 }
   0xd   : > { %1167 = vmatprep.subr.bf16.mxu0 (!%p164_p3), %v1253_v2  ;;  %1213 = vmatprep.subr.bf16.mxu1 (!%p164_p3), %v1253_v2 }
   0xe   : > { %s1656_s12 = smov (!%p201_p4, %s1289_s12), 1 }
   0xf   : > { %s1105_s22 = sshll.u32 %s1656_s12, 7  ;;  %s1046_s16 = sshll.u32 %s1656_s12, 1 }
  0x10   : > { %s1354_s25 = scalar_lea.vmem %s1647_s0, %s1105_s22  ;;  %1168 = vmatpush3.bf16.msra.mxu0 %v1253_v2  ;;  %1221 = vmatpush3.bf16.msra.mxu1 %v1253_v2  ;;  %s1392_s11 = scalar_lea.vmem %s1649_s2, %s1105_s22 }
  0x11   : > { %v1259_v4 = vld [vmem:[%s1354_s25] sm:$0xff]   ;;  %1169 = vmatprep.subr.bf16.mxu0 %v1254_v3  ;;  %1214 = vmatprep.subr.bf16.mxu1 %v1254_v3  ;;  %v1260_v10 = vld [vmem:[%s1354_s25 + $0x8] sm:$0xff]   ;;  %v1261_v12 = vld [vmem:[%s1354_s25 + $0x10] sm:$0xff]   ;;  %s224_s19 = scalar_lea.vmem %s1650_s3, %s1046_s16 }
  0x12   : > { %1179 = vmatprep.mubr.bf16.mxu0 %v1259_v4  ;;  %v1267_v7 = vld [vmem:[%s1354_s25 + $0x40] sm:$0xff]   ;;  %v1268_v11 = vld [vmem:[%s1354_s25 + $0x48] sm:$0xff]   ;;  %v1269_v13 = vld [vmem:[%s1354_s25 + $0x50] sm:$0xff]  }
  0x13   : > { %1195 = vmatprep.mubr.bf16.mxu1 %v1267_v7  ;;  %v1262_v14 = vld [vmem:[%s1354_s25 + $0x18] sm:$0xff]   ;;  %v1263_v16 = vld [vmem:[%s1354_s25 + $0x20] sm:$0xff]   ;;  %v1264_v18 = vld [vmem:[%s1354_s25 + $0x28] sm:$0xff]  }
  0x14   : > { %1170 = vmatpush3.bf16.msra.mxu0 %v1254_v3  ;;  %1222 = vmatpush3.bf16.msra.mxu1 %v1254_v3  ;;  %v1270_v15 = vld [vmem:[%s1354_s25 + $0x58] sm:$0xff]   ;;  %v1271_v17 = vld [vmem:[%s1354_s25 + $0x60] sm:$0xff]   ;;  %v1272_v19 = vld [vmem:[%s1354_s25 + $0x68] sm:$0xff]  }
  0x15   : > { %1171 = vmatprep.subr.bf16.mxu0 %v1255_v5  ;;  %1215 = vmatprep.subr.bf16.mxu1 %v1255_v5  ;;  %v1265_v20 = vld [vmem:[%s1354_s25 + $0x30] sm:$0xff]   ;;  %v1266_v22 = vld [vmem:[%s1354_s25 + $0x38] sm:$0xff]  }
  0x16   : > { %v1273_v21 = vld [vmem:[%s1354_s25 + $0x70] sm:$0xff]   ;;  %v1274_v23 = vld [vmem:[%s1354_s25 + $0x78] sm:$0xff]  }
  0x18   : > { %1172 = vmatpush3.bf16.msra.mxu0 %v1255_v5  ;;  %1223 = vmatpush3.bf16.msra.mxu1 %v1255_v5 }
  0x19   : > { %1173 = vmatprep.subr.bf16.mxu0 %v1256_v6  ;;  %1216 = vmatprep.subr.bf16.mxu1 %v1256_v6 }
  0x1c   : > { %1174 = vmatpush3.bf16.msra.mxu0 %v1256_v6  ;;  %1224 = vmatpush3.bf16.msra.mxu1 %v1256_v6 }
  0x1d   : > { %1175 = vmatprep.subr.bf16.mxu0 %v1257_v8  ;;  %1217 = vmatprep.subr.bf16.mxu1 %v1257_v8 }
  0x20   : > { %1176 = vmatpush3.bf16.msra.mxu0 %v1257_v8  ;;  %1225 = vmatpush3.bf16.msra.mxu1 %v1257_v8 }
  0x21   : > { %1177 = vmatprep.subr.bf16.mxu0 %v1258_v9  ;;  %1218 = vmatprep.subr.bf16.mxu1 %v1258_v9 }
  0x24   : > { %1178 = vmatpush3.bf16.msra.mxu0 %v1258_v9  ;;  %1226 = vmatpush3.bf16.msra.mxu1 %v1258_v9 }
  0x27   : > { %1180 = vmatmul.mubr.bf16.vlgmr.msra.gmra.mrb[0].mxu0 %v1260_v10  ;;  %1196 = vmatmul.mubr.bf16.vlgmr.msra.gmra.mrb[0].mxu1 %v1268_v11 }
  0x28   : > { %1183 = vmatprep.mubr.bf16.mxu0 %v1261_v12  ;;  %1199 = vmatprep.mubr.bf16.mxu1 %v1269_v13 }
  0x2f   : > { %1184 = vmatmul.mubr.bf16.gmra.mrb[4].mxu0 %v1262_v14  ;;  %1200 = vmatmul.mubr.bf16.gmra.mrb[4].mxu1 %v1270_v15 }
  0x30   : > { %1187 = vmatprep.mubr.bf16.mxu0 %v1263_v16  ;;  %1203 = vmatprep.mubr.bf16.mxu1 %v1271_v17 }
  0x37   : > { %1188 = vmatmul.mubr.bf16.gmra.mrb[8].mxu0 %v1264_v18  ;;  %1204 = vmatmul.mubr.bf16.gmra.mrb[8].mxu1 %v1272_v19 }
  0x38   : > { %1191 = vmatprep.mubr.bf16.mxu0 %v1265_v20  ;;  %1207 = vmatprep.mubr.bf16.mxu1 %v1273_v21 }
  0x3f   : > { %1192 = vmatmul.mubr.bf16.gmra.mrb[12].mxu0 %v1266_v22  ;;  %1208 = vmatmul.mubr.bf16.gmra.mrb[12].mxu1 %v1274_v23 }
  0xfa   : > { %v1181_v24 = vpop.f32.mrb[0].mxu0  ;;  %v1394_v25 = vpop.f32.mrb[0].mxu1 }
  0xfb   : > { %v1109_v26 = vpack.c.bf16 %v1181_v24, %v1181_v24  ;;  %v453_v27 = vpop.f32.mrb[1].mxu0  ;;  %v1125_v28 = vpack.c.bf16 %v1394_v25, %v1394_v25  ;;  %v1398_v29 = vpop.f32.mrb[1].mxu1  ;;  %v813_v34 = vmul.f32 %v1181_v24, %v1181_v24  ;;  %v745_v45 = vsel %vm741_vm1, %v1181_v24, 0.0 }
  0xfc   : > { %v1107_v30 = vpack.c.bf16 %v453_v27, %v453_v27  ;;  %v811_v31 = vmul.f32 %v453_v27, %v453_v27  ;;  %v1182_v32 = vpop.f32.mrb[2].mxu0  ;;  %v1400_v33 = vpop.f32.mrb[2].mxu1  ;;  %v742_v38 = vsel %vm741_vm1, %v453_v27, 0.0  ;;  %v1123_v44 = vpack.c.bf16 %v1398_v29, %v1398_v29 }
  0xfd   : > { %711 = vst.msk [vmem:[%s1392_s11 + $0x8] sm:$0xf] %vm708_vm0, %v1109_v26  ;;  %v1110_v35 = vpack.c.bf16 %v1182_v32, %v1182_v32  ;;  %v456_v36 = vpop.f32.mrb[3].mxu0  ;;  %727 = vst.msk [vmem:[%s1392_s11 + $0x48] sm:$0xf] %vm708_vm0, %v1125_v28  ;;  %v1406_v37 = vpop.f32.mrb[3].mxu1  ;;  %v814_v42 = vmul.f32 %v1182_v32, %v1182_v32  ;;  %v1126_v48 = vpack.c.bf16 %v1400_v33, %v1400_v33 }
  0xfe   : > { %709 = vst.msk [vmem:[%s1392_s11] sm:$0xf] %vm708_vm0, %v1107_v30  ;;  %v1108_v39 = vpack.c.bf16 %v456_v36, %v456_v36  ;;  %v743_v40 = vsel %vm741_vm1, %v456_v36, 0.0  ;;  %v812_v41 = vmul.f32 %v456_v36, %v456_v36  ;;  %v843_v46 = vsel %vm741_vm1, %v811_v31, 0.0  ;;  %725 = vst.msk [vmem:[%s1392_s11 + $0x40] sm:$0xf] %vm708_vm0, %v1123_v44 }
  0xff   : > { %712 = vst.msk [vmem:[%s1392_s11 + $0xc] sm:$0xf] %vm708_vm0, %v1110_v35  ;;  %v744_v43 = vadd.f32 %v743_v40, %v742_v38  ;;  %v846_v51 = vsel %vm741_vm1, %v813_v34, 0.0  ;;  %728 = vst.msk [vmem:[%s1392_s11 + $0x4c] sm:$0xf] %vm708_vm0, %v1126_v48  ;;  %v1124_v53 = vpack.c.bf16 %v1406_v37, %v1406_v37  ;;  %v747_v55 = vsel %vm741_vm1, %v1182_v32, 0.0 }
 0x100   : > { %710 = vst.msk [vmem:[%s1392_s11 + $0x4] sm:$0xf] %vm708_vm0, %v1108_v39  ;;  %v844_v47 = vsel %vm741_vm1, %v812_v41, 0.0  ;;  %v848_v56 = vsel %vm741_vm1, %v814_v42, 0.0 }
 0x101   : > { %v746_v49 = vadd.f32 %v745_v45, %v744_v43  ;;  %v845_v50 = vadd.f32 %v844_v47, %v843_v46  ;;  %726 = vst.msk [vmem:[%s1392_s11 + $0x44] sm:$0xf] %vm708_vm0, %v1124_v53 }
 0x102   : > { %v1185_v52 = vpop.f32.mrb[4].mxu0  ;;  %v1430_v54 = vpop.f32.mrb[4].mxu1 }
 0x103   : > { %v847_v57 = vadd.f32 %v846_v51, %v845_v50  ;;  %v1113_v58 = vpack.c.bf16 %v1185_v52, %v1185_v52  ;;  %v469_v59 = vpop.f32.mrb[5].mxu0  ;;  %v1434_v60 = vpop.f32.mrb[5].mxu1  ;;  %v748_v62 = vadd.f32 %v747_v55, %v746_v49  ;;  %v817_v10 = vmul.f32 %v1185_v52, %v1185_v52 }
 0x104   : > { %v1111_v61 = vpack.c.bf16 %v469_v59, %v469_v59  ;;  %v749_v63 = vsel %vm741_vm1, %v469_v59, 0.0  ;;  %v815_v0 = vmul.f32 %v469_v59, %v469_v59  ;;  %v1186_v1 = vpop.f32.mrb[6].mxu0  ;;  %v1439_v2 = vpop.f32.mrb[6].mxu1  ;;  %v1129_v15 = vpack.c.bf16 %v1430_v54, %v1430_v54 }
 0x105   : > { %715 = vst.msk [vmem:[%s1392_s11 + $0x18] sm:$0xf] %vm708_vm0, %v1113_v58  ;;  %v849_v3 = vadd.f32 %v848_v56, %v847_v57  ;;  %v1114_v4 = vpack.c.bf16 %v1186_v1, %v1186_v1  ;;  %v472_v5 = vpop.f32.mrb[7].mxu0  ;;  %v1443_v6 = vpop.f32.mrb[7].mxu1  ;;  %v750_v7 = vadd.f32 %v749_v63, %v748_v62  ;;  %v753_v16 = vsel %vm741_vm1, %v1185_v52, 0.0 }
 0x106   : > { %713 = vst.msk [vmem:[%s1392_s11 + $0x10] sm:$0xf] %vm708_vm0, %v1111_v61  ;;  %v850_v8 = vsel %vm741_vm1, %v815_v0, 0.0  ;;  %v1112_v9 = vpack.c.bf16 %v472_v5, %v472_v5  ;;  %v751_v12 = vsel %vm741_vm1, %v472_v5, 0.0  ;;  %v816_v13 = vmul.f32 %v472_v5, %v472_v5  ;;  %731 = vst.msk [vmem:[%s1392_s11 + $0x58] sm:$0xf] %vm708_vm0, %v1129_v15 }
 0x107   : > { %v851_v11 = vadd.f32 %v850_v8, %v849_v3  ;;  %716 = vst.msk [vmem:[%s1392_s11 + $0x1c] sm:$0xf] %vm708_vm0, %v1114_v4  ;;  %v752_v14 = vadd.f32 %v751_v12, %v750_v7  ;;  %v818_v17 = vmul.f32 %v1186_v1, %v1186_v1  ;;  %v1127_v19 = vpack.c.bf16 %v1434_v60, %v1434_v60 }
 0x108   : > { %714 = vst.msk [vmem:[%s1392_s11 + $0x14] sm:$0xf] %vm708_vm0, %v1112_v9  ;;  %v852_v18 = vsel %vm741_vm1, %v816_v13, 0.0  ;;  %v854_v24 = vsel %vm741_vm1, %v817_v10, 0.0  ;;  %v755_v26 = vsel %vm741_vm1, %v1186_v1, 0.0  ;;  %v1130_v53 = vpack.c.bf16 %v1439_v2, %v1439_v2 }
 0x109   : > { %v754_v20 = vadd.f32 %v753_v16, %v752_v14  ;;  %v853_v21 = vadd.f32 %v852_v18, %v851_v11  ;;  %729 = vst.msk [vmem:[%s1392_s11 + $0x50] sm:$0xf] %vm708_vm0, %v1127_v19  ;;  %v856_v39 = vsel %vm741_vm1, %v818_v17, 0.0  ;;  %v1128_v62 = vpack.c.bf16 %v1443_v6, %v1443_v6 }
 0x10a   : > { %v1189_v22 = vpop.f32.mrb[8].mxu0  ;;  %v1461_v23 = vpop.f32.mrb[8].mxu1  ;;  %732 = vst.msk [vmem:[%s1392_s11 + $0x5c] sm:$0xf] %vm708_vm0, %v1130_v53 }
 0x10b   : > { %v1117_v27 = vpack.c.bf16 %v1189_v22, %v1189_v22  ;;  %v485_v28 = vpop.f32.mrb[9].mxu0  ;;  %v1467_v30 = vpop.f32.mrb[9].mxu1  ;;  %v855_v31 = vadd.f32 %v854_v24, %v853_v21  ;;  %v756_v34 = vadd.f32 %v755_v26, %v754_v20  ;;  %v821_v47 = vmul.f32 %v1189_v22, %v1189_v22  ;;  %730 = vst.msk [vmem:[%s1392_s11 + $0x54] sm:$0xf] %vm708_vm0, %v1128_v62 }
 0x10c   : > { %v1115_v32 = vpack.c.bf16 %v485_v28, %v485_v28  ;;  %v757_v35 = vsel %vm741_vm1, %v485_v28, 0.0  ;;  %v1190_v36 = vpop.f32.mrb[10].mxu0  ;;  %v1470_v38 = vpop.f32.mrb[10].mxu1  ;;  %v819_v40 = vmul.f32 %v485_v28, %v485_v28  ;;  %v761_v55 = vsel %vm741_vm1, %v1189_v22, 0.0 }
 0x10d   : > { %719 = vst.msk [vmem:[%s1392_s11 + $0x28] sm:$0xf] %vm708_vm0, %v1117_v27  ;;  %v1118_v41 = vpack.c.bf16 %v1190_v36, %v1190_v36  ;;  %v488_v42 = vpop.f32.mrb[11].mxu0  ;;  %v1475_v43 = vpop.f32.mrb[11].mxu1  ;;  %v758_v44 = vadd.f32 %v757_v35, %v756_v34  ;;  %v857_v45 = vadd.f32 %v856_v39, %v855_v31  ;;  %v822_v56 = vmul.f32 %v1190_v36, %v1190_v36 }
 0x10e   : > { %717 = vst.msk [vmem:[%s1392_s11 + $0x20] sm:$0xf] %vm708_vm0, %v1115_v32  ;;  %v1116_v46 = vpack.c.bf16 %v488_v42, %v488_v42  ;;  %v858_v48 = vsel %vm741_vm1, %v819_v40, 0.0  ;;  %v759_v49 = vsel %vm741_vm1, %v488_v42, 0.0  ;;  %v820_v50 = vmul.f32 %v488_v42, %v488_v42 }
 0x10f   : > { %720 = vst.msk [vmem:[%s1392_s11 + $0x2c] sm:$0xf] %vm708_vm0, %v1118_v41  ;;  %v859_v51 = vadd.f32 %v858_v48, %v857_v45  ;;  %v760_v52 = vadd.f32 %v759_v49, %v758_v44  ;;  %v862_v0 = vsel %vm741_vm1, %v821_v47, 0.0  ;;  %v763_v1 = vsel %vm741_vm1, %v1190_v36, 0.0 }
 0x110   : > { %718 = vst.msk [vmem:[%s1392_s11 + $0x24] sm:$0xf] %vm708_vm0, %v1116_v46  ;;  %v860_v57 = vsel %vm741_vm1, %v820_v50, 0.0  ;;  %v864_v13 = vsel %vm741_vm1, %v822_v56, 0.0  ;;  %v1133_v31 = vpack.c.bf16 %v1461_v23, %v1461_v23  ;;  %v827_v36 = vmul.f32 %v1398_v29, %v1398_v29 }
 0x111   : > { %v762_v58 = vadd.f32 %v761_v55, %v760_v52  ;;  %v861_v59 = vadd.f32 %v860_v57, %v859_v51  ;;  %v1131_v41 = vpack.c.bf16 %v1467_v30, %v1467_v30  ;;  %v773_v45 = vsel %vm741_vm1, %v1398_v29, 0.0 }
 0x112   : > { %v1193_v61 = vpop.f32.mrb[12].mxu0  ;;  %v1493_v63 = vpop.f32.mrb[12].mxu1  ;;  %735 = vst.msk [vmem:[%s1392_s11 + $0x68] sm:$0xf] %vm708_vm0, %v1133_v31  ;;  %v1134_v46 = vpack.c.bf16 %v1470_v38, %v1470_v38  ;;  %v1132_v49 = vpack.c.bf16 %v1475_v43, %v1475_v43  ;;  %v874_v51 = vsel %vm741_vm1, %v827_v36, 0.0  ;;  %v828_v52 = vmul.f32 %v1406_v37, %v1406_v37 }
 0x113   : > { %v1121_v3 = vpack.c.bf16 %v1193_v61, %v1193_v61  ;;  %v501_v4 = vpop.f32.mrb[13].mxu0  ;;  %v1497_v5 = vpop.f32.mrb[13].mxu1  ;;  %v863_v7 = vadd.f32 %v862_v0, %v861_v59  ;;  %v764_v9 = vadd.f32 %v763_v1, %v762_v58  ;;  %v825_v21 = vmul.f32 %v1193_v61, %v1193_v61  ;;  %733 = vst.msk [vmem:[%s1392_s11 + $0x60] sm:$0xf] %vm708_vm0, %v1131_v41 }
 0x114   : > { %v1119_v8 = vpack.c.bf16 %v501_v4, %v501_v4  ;;  %v765_v10 = vsel %vm741_vm1, %v501_v4, 0.0  ;;  %v1194_v11 = vpop.f32.mrb[14].mxu0  ;;  %v1502_v12 = vpop.f32.mrb[14].mxu1  ;;  %v823_v14 = vmul.f32 %v501_v4, %v501_v4  ;;  %v769_v32 = vsel %vm741_vm1, %v1193_v61, 0.0  ;;  %736 = vst.msk [vmem:[%s1392_s11 + $0x6c] sm:$0xf] %vm708_vm0, %v1134_v46 }
 0x115   : > { %723 = vst.msk [vmem:[%s1392_s11 + $0x38] sm:$0xf] %vm708_vm0, %v1121_v3  ;;  %v1122_v15 = vpack.c.bf16 %v1194_v11, %v1194_v11  ;;  %v504_v16 = vpop.f32.mrb[15].mxu0  ;;  %v1507_v17 = vpop.f32.mrb[15].mxu1  ;;  %v766_v18 = vadd.f32 %v765_v10, %v764_v9  ;;  %v865_v19 = vadd.f32 %v864_v13, %v863_v7  ;;  %v826_v34 = vmul.f32 %v1194_v11, %v1194_v11 }
 0x116   : > { %721 = vst.msk [vmem:[%s1392_s11 + $0x30] sm:$0xf] %vm708_vm0, %v1119_v8  ;;  %v1120_v20 = vpack.c.bf16 %v504_v16, %v504_v16  ;;  %v866_v22 = vsel %vm741_vm1, %v823_v14, 0.0  ;;  %v767_v24 = vsel %vm741_vm1, %v504_v16, 0.0  ;;  %v824_v26 = vmul.f32 %v504_v16, %v504_v16  ;;  %734 = vst.msk [vmem:[%s1392_s11 + $0x64] sm:$0xf] %vm708_vm0, %v1132_v49 }
 0x117   : > { %724 = vst.msk [vmem:[%s1392_s11 + $0x3c] sm:$0xf] %vm708_vm0, %v1122_v15  ;;  %v867_v27 = vadd.f32 %v866_v22, %v865_v19  ;;  %v768_v28 = vadd.f32 %v767_v24, %v766_v18  ;;  %v870_v42 = vsel %vm741_vm1, %v825_v21, 0.0  ;;  %v771_v44 = vsel %vm741_vm1, %v1194_v11, 0.0 }
 0x118   : > { %722 = vst.msk [vmem:[%s1392_s11 + $0x34] sm:$0xf] %vm708_vm0, %v1120_v20  ;;  %v868_v35 = vsel %vm741_vm1, %v824_v26, 0.0  ;;  %v872_v50 = vsel %vm741_vm1, %v826_v34, 0.0  ;;  %v1137_v29 = vpack.c.bf16 %v1493_v63, %v1493_v63  ;;  %v829_v56 = vmul.f32 %v1394_v25, %v1394_v25 }
 0x119   : > { %v770_v39 = vadd.f32 %v769_v32, %v768_v28  ;;  %v869_v40 = vadd.f32 %v868_v35, %v867_v27  ;;  %v775_v57 = vsel %vm741_vm1, %v1406_v37, 0.0  ;;  %v1135_v58 = vpack.c.bf16 %v1497_v5, %v1497_v5 }
 0x11a   : > { %739 = vst.msk [vmem:[%s1392_s11 + $0x78] sm:$0xf] %vm708_vm0, %v1137_v29  ;;  %v777_v59 = vsel %vm741_vm1, %v1394_v25, 0.0  ;;  %v1138_v0 = vpack.c.bf16 %v1502_v12, %v1502_v12  ;;  %v830_v1 = vmul.f32 %v1400_v33, %v1400_v33  ;;  %v876_v3 = vsel %vm741_vm1, %v828_v52, 0.0 }
 0x11b   : > { %v871_v47 = vadd.f32 %v870_v42, %v869_v40  ;;  %v772_v48 = vadd.f32 %v771_v44, %v770_v39  ;;  %v831_v37 = vmul.f32 %v1434_v60, %v1434_v60  ;;  %737 = vst.msk [vmem:[%s1392_s11 + $0x70] sm:$0xf] %vm708_vm0, %v1135_v58  ;;  %v1136_v4 = vpack.c.bf16 %v1507_v17, %v1507_v17 }
 0x11c   : > { %740 = vst.msk [vmem:[%s1392_s11 + $0x7c] sm:$0xf] %vm708_vm0, %v1138_v0  ;;  %v878_v8 = vsel %vm741_vm1, %v829_v56, 0.0  ;;  %v779_v9 = vsel %vm741_vm1, %v1400_v33, 0.0  ;;  %v781_v10 = vsel %vm741_vm1, %v1434_v60, 0.0  ;;  %v880_v14 = vsel %vm741_vm1, %v830_v1, 0.0 }
 0x11d   : > { %v774_v53 = vadd.f32 %v773_v45, %v772_v48  ;;  %v873_v55 = vadd.f32 %v872_v50, %v871_v47  ;;  %738 = vst.msk [vmem:[%s1392_s11 + $0x74] sm:$0xf] %vm708_vm0, %v1136_v4  ;;  %v882_v15 = vsel %vm741_vm1, %v831_v37, 0.0  ;;  %v832_v16 = vmul.f32 %v1443_v6, %v1443_v6 }
 0x11e   : > { %v833_v20 = vmul.f32 %v1430_v54, %v1430_v54  ;;  %v783_v33 = vsel %vm741_vm1, %v1443_v6, 0.0  ;;  %v785_v22 = vsel %vm741_vm1, %v1430_v54, 0.0  ;;  %v834_v24 = vmul.f32 %v1439_v2, %v1439_v2 }
 0x11f   : > { %v875_v61 = vadd.f32 %v874_v51, %v873_v55  ;;  %v776_v62 = vadd.f32 %v775_v57, %v774_v53  ;;  %v884_v26 = vsel %vm741_vm1, %v832_v16, 0.0  ;;  %v835_v27 = vmul.f32 %v1467_v30, %v1467_v30 }
 0x120   : > { %v886_v32 = vsel %vm741_vm1, %v833_v20, 0.0  ;;  %v787_v6 = vsel %vm741_vm1, %v1439_v2, 0.0  ;;  %v789_v34 = vsel %vm741_vm1, %v1467_v30, 0.0  ;;  %v888_v36 = vsel %vm741_vm1, %v834_v24, 0.0 }
 0x121   : > { %v778_v7 = vadd.f32 %v777_v59, %v776_v62  ;;  %v877_v25 = vadd.f32 %v876_v3, %v875_v61  ;;  %v890_v39 = vsel %vm741_vm1, %v835_v27, 0.0  ;;  %v836_v40 = vmul.f32 %v1475_v43, %v1475_v43 }
 0x122   : > { %v837_v44 = vmul.f32 %v1461_v23, %v1461_v23  ;;  %v791_v2 = vsel %vm741_vm1, %v1475_v43, 0.0  ;;  %v793_v30 = vsel %vm741_vm1, %v1461_v23, 0.0  ;;  %v838_v47 = vmul.f32 %v1470_v38, %v1470_v38 }
 0x123   : > { %v879_v11 = vadd.f32 %v878_v8, %v877_v25  ;;  %v780_v13 = vadd.f32 %v779_v9, %v778_v7  ;;  %v892_v48 = vsel %vm741_vm1, %v836_v40, 0.0  ;;  %v839_v49 = vmul.f32 %v1497_v5, %v1497_v5 }
 0x124   : > { %v894_v52 = vsel %vm741_vm1, %v837_v44, 0.0  ;;  %v795_v43 = vsel %vm741_vm1, %v1470_v38, 0.0  ;;  %v797_v29 = vsel %vm741_vm1, %v1497_v5, 0.0  ;;  %v896_v55 = vsel %vm741_vm1, %v838_v47, 0.0 }
 0x125   : > { %v782_v18 = vadd.f32 %v781_v10, %v780_v13  ;;  %v881_v19 = vadd.f32 %v880_v14, %v879_v11  ;;  %v898_v56 = vsel %vm741_vm1, %v839_v49, 0.0  ;;  %v840_v57 = vmul.f32 %v1507_v17, %v1507_v17 }
 0x126   : > { %v841_v61 = vmul.f32 %v1493_v63, %v1493_v63  ;;  %v799_v38 = vsel %vm741_vm1, %v1507_v17, 0.0  ;;  %v801_v5 = vsel %vm741_vm1, %v1493_v63, 0.0  ;;  %v842_v1 = vmul.f32 %v1502_v12, %v1502_v12 }
 0x127   : > { %v883_v60 = vadd.f32 %v882_v15, %v881_v19  ;;  %v784_v21 = vadd.f32 %v783_v33, %v782_v18  ;;  %v900_v3 = vsel %vm741_vm1, %v840_v57, 0.0  ;;  %v803_v25 = vsel %vm741_vm1, %v1502_v12, 0.0 }
 0x128   : > { %v902_v7 = vsel %vm741_vm1, %v841_v61, 0.0  ;;  %v904_v9 = vsel %vm741_vm1, %v842_v1, 0.0 }
 0x129   : > { %v786_v28 = vadd.f32 %v785_v22, %v784_v21  ;;  %v885_v31 = vadd.f32 %v884_v26, %v883_v60 }
 0x12b   : > { %v887_v35 = vadd.f32 %v886_v32, %v885_v31  ;;  %v788_v54 = vadd.f32 %v787_v6, %v786_v28 }
 0x12d   : > { %v790_v41 = vadd.f32 %v789_v34, %v788_v54  ;;  %v889_v42 = vadd.f32 %v888_v36, %v887_v35 }
 0x12f   : > { %v891_v45 = vadd.f32 %v890_v39, %v889_v42  ;;  %v792_v46 = vadd.f32 %v791_v2, %v790_v41 }
 0x131   : > { %v794_v50 = vadd.f32 %v793_v30, %v792_v46  ;;  %v893_v51 = vadd.f32 %v892_v48, %v891_v45 }
 0x133   : > { %v895_v53 = vadd.f32 %v894_v52, %v893_v51  ;;  %v796_v23 = vadd.f32 %v795_v43, %v794_v50 }
 0x135   : > { %v798_v58 = vadd.f32 %v797_v29, %v796_v23  ;;  %v897_v59 = vadd.f32 %v896_v55, %v895_v53 }
 0x137   : > { %v899_v62 = vadd.f32 %v898_v56, %v897_v59  ;;  %v800_v0 = vadd.f32 %v799_v38, %v798_v58 }
 0x139   : > { %v802_v37 = vadd.f32 %v801_v5, %v800_v0  ;;  %v901_v4 = vadd.f32 %v900_v3, %v899_v62 }
 0x13b   : > { %v804_v8 = vadd.f32 %v803_v25, %v802_v37  ;;  %v903_v17 = vadd.f32 %v902_v7, %v901_v4 }
 0x13d   : > { %v805_v10 = vrot.slane %v804_v8, 4  ;;  %v905_v11 = vadd.f32 %v904_v9, %v903_v17 }
 0x13f   : > { %v806_v63 = vadd.f32 %v805_v10, %v804_v8  ;;  %v906_v13 = vrot.slane %v905_v11, 4 }
 0x141   : > { %v807_v14 = vrot.slane %v806_v63, 2  ;;  %v907_v15 = vadd.f32 %v906_v13, %v905_v11 }
 0x143   : > { %v808_v16 = vadd.f32 %v807_v14, %v806_v63  ;;  %v908_v18 = vrot.slane %v907_v15, 2 }
 0x145   : > { %v809_v19 = vrot.slane %v808_v16, 1  ;;  %v909_v20 = vadd.f32 %v908_v18, %v907_v15 }
 0x147   : > { %v910_v33 = vrot.slane %v909_v20, 1  ;;  %v810_v12 = vadd.f32 %v809_v19, %v808_v16 }
 0x149   : > { %v911_v60 = vadd.f32 %v910_v33, %v909_v20 }
 0x14b   : > { %v913_v21 = vsel %vm912_vm2, %v810_v12, %v911_v60 }
 0x14c   : > { %915 = vst.msk [vmem:[%s224_s19] sm:$0x3] %vm914_vm3, %v913_v21 }
 0x14d PF: > { %s14_s14 = sadd.s32 1, %s1297_s14   ;;  %s1651_s12 = smov %s1293_s13 }
 0x14e   : > { %p11_p5 = scmp.ge.s32.totalorder %s14_s14, 4   ;;  %s1652_s13 = smov %s1654_s15 }
 0x150   :  { %13 = sbr.rel (!%p11_p5) target bundleno = 2 (0x2), region = 70 }

// kernel: bottleneck_forward.5
= control target key start
LH: loop header
LB: loop body
LE: loop exit
PB: predicated region body
PF: predicated region fallthrough
CT: control target
= control target key end

     0   :  { %s3604_s21 = smov 0   ;;  %s5525_s0 = inlined_call_operand.vmem [shape: f32[2,2,32], index: 0, kind: input, shape index: {}]   ;;  %s5526_s1 = inlined_call_operand.vmem [shape: f32[1,32], index: 1, kind: input, shape index: {}]   ;;  %s5527_s2 = inlined_call_operand.vmem [shape: f32[1,32], index: 2, kind: input, shape index: {}]   ;;  %s5528_s3 = inlined_call_operand.vmem [shape: bf16[2,256,32], index: 3, kind: input, shape index: {}]   ;;  %s5529_s4 = inlined_call_operand.vmem [shape: bf16[288,32], index: 4, kind: input, shape index: {}]   ;;  %s5530_s5 = inlined_call_operand.vmem [shape: bf16[2,256,32], index: 5, kind: output, shape index: {0}]   ;;  %s5531_s6 = inlined_call_operand.vmem [shape: f32[2,2,32], index: 6, kind: output, shape index: {1}]  }
   0x1 LB: > { %s3117_s22 = sadd.s32 4294967295, %s3561_s21   ;;  %p3121_p0 = scmp.ge.s32.totalorder %s3561_s21, 1  ;;  %s3561_s21 = sphi %s3604_s21, %s17_s21  }
   0x2   : > { %p215_p1 = scmp.lt.s32.totalorder %s3561_s21, 3 }
   0x4   : > { %p216_p2 = pnand %p3121_p0, %p215_p1 }
   0x6   : > { %219 = sbr.rel (%p216_p2) target bundleno = 619 (0x26b), region = 40 }
   0xd   : > { %v266_v0 = vld [vmem:[%s5525_s0] sm:$0x3]  ;;  %vm5532_vm0 = vcmask 254976   ;;  %v5537_v1 = vmov 0   ;;  %s3564_s25 = smov 32   ;;  %p249_p3 = scmp.lt.s32.totalorder %s3117_s22, 1  ;;  %v287_v10 = vlaneseq }
   0xe   : > { %1684 = vrot.lane.b32.xlu0 %v5537_v1, %s3564_s25  ;;  %v267_v2 = vld [vmem:[%s5525_s0 + $0x2] sm:$0x3]  ;;  %v271_v3 = vsel %vm5532_vm0, %v266_v0, 0.0  ;;  %v3565_v14 = vmov 1966171168   ;;  %vm3566_vm2 = vmmov 1  }
   0xf   : > { %v272_v4 = vsel %vm5532_vm0, %v267_v2, 0.0  ;;  %s6006_s22 = smov (!%p249_p3, %s3117_s22), 1  ;;  %v3629_v13 = vshrl.u32 %v287_v10, 7  ;;  %v285_v15 = vunpack.c.l.s4 %v3565_v14  ;;  %v3535_v25 = vld [vmem:[%s5529_s4 + $0x40] sm:$0xff]   ;;  %vm3654_vm3 = vmpackc.low %vm3566_vm2, %vm3566_vm2  ;;  %v3537_v39 = vld [vmem:[%s5529_s4 + $0x48] sm:$0xff]   ;;  %vm1375_vm14 = vcmask 1047552  }
  0x10   : > { %v273_v5 = vadd.f32 %v272_v4, %v271_v3  ;;  %s3226_s28 = sshll.u32 %s6006_s22, 7  ;;  %3339 = vmatprep.subr.bf16.mxu0 %v3535_v25  ;;  %3505 = vmatprep.subr.bf16.mxu1 %v3535_v25  ;;  %v3536_v35 = vld [vmem:[%s5529_s4] sm:$0xff]   ;;  %v3698_v42 = vsel %vm3654_vm3, 65537, %v5537_v1  ;;  %v3538_v52 = vld [vmem:[%s5529_s4 + $0x8] sm:$0xff]   ;;  %v3539_v3 = vld [vmem:[%s5529_s4 + $0x50] sm:$0xff]   ;;  %vm5533_vm15 = vcmask 1040384  }
  0x11   : > { %v493_v16 = vadd.s32 8, %v3629_v13  ;;  %v495_v17 = vadd.s32 24, %v3629_v13  ;;  %v286_v18 = vunpack.c.0.s8 %v285_v15  ;;  %v494_v19 = vadd.s32 16, %v3629_v13  ;;  %s3640_s7 = scalar_lea.vmem %s5528_s3, %s3226_s28  ;;  %3340 = vmatpush3.bf16.msra.mxu0 %v3536_v35  ;;  %3513 = vmatpush3.bf16.msra.mxu1 %v3536_v35  ;;  %v268_v47 = vld [vmem:[%s5526_s1] sm:$0x1]  ;;  %v3540_v10 = vld [vmem:[%s5529_s4 + $0x10] sm:$0xff]   ;;  %s5295_s12 = scalar_lea.vmem %s5530_s5, %s3226_s28 }
  0x12   : > { %v3622_v6 = vmul.f32 0.001953125, %v273_v5  ;;  %v528_v22 = vand.u32 15, %v3629_v13  ;;  %v3648_v26 = vld [vmem:[%s3640_s7 + $0x8] sm:$0xff]   ;;  %v3659_v29 = vld [vmem:[%s3640_s7] sm:$0xff]   ;;  %v3662_v30 = vld [vmem:[%s3640_s7 + $0x10] sm:$0xff]   ;;  %v370_v40 = vsub.s32 0, %v3629_v13  ;;  %3341 = vmatprep.subr.bf16.mxu0 %v3537_v39  ;;  %3506 = vmatprep.subr.bf16.mxu1 %v3537_v39 }
  0x13   : > { %v535_v20 = vand.u32 15, %v493_v16  ;;  %v549_v21 = vand.u32 15, %v495_v17  ;;  %v289_v23 = vsub.s32 %v286_v18, %v3629_v13  ;;  %v542_v24 = vand.u32 15, %v494_v19  ;;  %v3669_v33 = vld [vmem:[%s3640_s7 + $0x58] sm:$0xff]   ;;  %v3679_v37 = vld [vmem:[%s3640_s7 + $0x68] sm:$0xff]   ;;  %v3335_v56 = vld [vmem:[%s3640_s7 + $0x60] sm:$0xff]  }
  0x14   : > { %v275_v7 = vmul.f32 %v3622_v6, %v3622_v6  ;;  %vm3671_vm5 = vcmp.gt.s32.totalorder %v528_v22, 0  ;;  %v3693_v41 = vld [vmem:[%s3640_s7 + $0x18] sm:$0xff]   ;;  %v3266_v44 = vunpack.c.l.bf16 %v3648_v26  ;;  %v3267_v45 = vunpack.c.h.bf16 %v3648_v26  ;;  %v269_v4 = vld [vmem:[%s5527_s2] sm:$0x1]  ;;  %s3567_s17 = smov 96   ;;  %s3568_s30 = smov 64  }
  0x15   : > { %vm3650_vm1 = vcmp.lt.s32.totalorder %v535_v20, 15  ;;  %vm3664_vm4 = vcmp.lt.s32.totalorder %v549_v21, 15  ;;  %vm3684_vm7 = vcmp.gt.s32.totalorder %v542_v24, 0  ;;  %v3262_v46 = vunpack.c.l.bf16 %v3659_v29  ;;  %vm1592_vm9 = vmpackc.low %vm3671_vm5, %vm3671_vm5  ;;  %3342 = vmatpush3.bf16.msra.mxu0 %v3538_v52  ;;  %3514 = vmatpush3.bf16.msra.mxu1 %v3538_v52  ;;  %v3549_v28 = vld [vmem:[%s5529_s4 + $0x78] sm:$0xff]   ;;  %s3126_s28 = sshll.u32 %s6006_s22, 1 }
  0x16   : > { %v277_v8 = vrot.slane %v275_v7, 7  ;;  %vm1443_vm6 = vmpackc.low %vm3650_vm1, %vm3650_vm1  ;;  %v3263_v48 = vunpack.c.h.bf16 %v3659_v29  ;;  %v3270_v49 = vunpack.c.l.bf16 %v3662_v30  ;;  %v3271_v50 = vunpack.c.h.bf16 %v3662_v30  ;;  %3343 = vmatprep.subr.bf16.mxu0 %v3539_v3  ;;  %3507 = vmatprep.subr.bf16.mxu1 %v3539_v3  ;;  %v3542_v29 = vld [vmem:[%s5529_s4 + $0x18] sm:$0xff]   ;;  %v3545_v3 = vld [vmem:[%s5529_s4 + $0x68] sm:$0xff]   ;;  %s262_s15 = scalar_lea.vmem %s5531_s6, %s3126_s28 }
  0x17   : > { %vm1445_vm8 = vmpackc.low %vm3664_vm4, %vm3664_vm4  ;;  %v517_v51 = vadd.s32 200, %v3629_v13  ;;  %v3306_v54 = vunpack.c.l.bf16 %v3669_v33  ;;  %v3307_v55 = vunpack.c.h.bf16 %v3669_v33  ;;  %v516_v57 = vadd.s32 192, %v3629_v13 }
  0x18   : > { %v279_v9 = vsub.f32 %v3622_v6, %v277_v8  ;;  %vm1174_vm10 = vmpackc.low %vm3684_vm7, %vm3684_vm7  ;;  %v3314_v58 = vunpack.c.l.bf16 %v3679_v37  ;;  %v3315_v59 = vunpack.c.h.bf16 %v3679_v37  ;;  %v3274_v60 = vunpack.c.l.bf16 %v3693_v41 }
  0x19   : > { %v3735_v61 = vsel %vm1443_vm6, 65537, %v5537_v1  ;;  %v3743_v63 = vsel %vm1445_vm8, 65537, %v5537_v1  ;;  %v3751_v0 = vsel %vm1592_vm9, 65537, %v5537_v1  ;;  %v3759_v2 = vsel %vm1174_vm10, 65537, %v5537_v1  ;;  %3344 = vmatpush3.bf16.msra.mxu0 %v3540_v10  ;;  %3515 = vmatpush3.bf16.msra.mxu1 %v3540_v10 }
  0x1a   : > { %v280_v11 = vmax.f32 %v279_v9, 0.0  ;;  %v3275_v5 = vunpack.c.h.bf16 %v3693_v41  ;;  %v3310_v7 = vunpack.c.l.bf16 %v3335_v56  ;;  %v3311_v8 = vunpack.c.h.bf16 %v3335_v56 }
  0x1b   : > { %v703_v9 = vand.u32 15, %v517_v51  ;;  %v3142_v14 = vcombine.low %v3698_v42, %v3735_v61  ;;  %v696_v15 = vand.u32 15, %v516_v57  ;;  %v3143_v16 = vcombine.low %v3698_v42, %v3743_v63 }
  0x1c   : > { %v281_v12 = vadd.f32 1e-05, %v280_v11  ;;  %v3158_v17 = vcombine.low %v3751_v0, %v3698_v42  ;;  %v3127_v18 = vcombine.low %v3759_v2, %v3698_v42  ;;  %vm5536_vm13 = vsmask.f32 7424  ;;  %v3889_v2 = vld [vmem:[%s3640_s7 + $0x70] sm:$0xff]  }
  0x1d   : > { %vm3797_vm11 = vcmp.lt.s32.totalorder %v703_v9, 15  ;;  %vm3811_vm12 = vcmp.gt.s32.totalorder %v696_v15, 0  ;;  %vm5539_vm1 = vsmask.f32 256  ;;  %v3546_v9 = vld [vmem:[%s5529_s4 + $0x28] sm:$0xff]   ;;  %vm3860_vm2 = vcmp.ne.s16.totalorder %v3142_v14, 0  ;;  %vm3902_vm6 = vmand %vm1375_vm14, %vm5536_vm13 }
  0x1e   : > { %3553 = vrsqrt.f32 %v281_v12  ;;  %vm3874_vm3 = vcmp.ne.s16.totalorder %v3127_v18, 0  ;;  %vm1467_vm4 = vmpackc.low %vm3797_vm11, %vm3797_vm11  ;;  %v3548_v18 = vld [vmem:[%s5529_s4 + $0x30] sm:$0xff]   ;;  %vm3910_vm7 = vcmp.ne.s16.totalorder %v3143_v16, 0  ;;  %vm3917_vm8 = vcmp.ne.s16.totalorder %v3158_v17, 0 }
  0x1f   : > { %vm1196_vm5 = vmpackc.low %vm3811_vm12, %vm3811_vm12  ;;  %v3934_v0 = vsel %vm1467_vm4, 65537, %v5537_v1 }
  0x20   : > { %vm3924_vm9 = vmand %vm5533_vm15, %vm5539_vm1  ;;  %v3942_v17 = vsel %vm1196_vm5, 65537, %v5537_v1 }
  0x28   : > { %v3554_v32 = vpop.eup %3553 }
  0x29   : > { %v290_v36 = vrot.slane %v3554_v32, %v289_v23 }
  0x2b   : > { %v291_v43 = vcombine.high %v290_v36, %v290_v36 }
  0x2d   : > { %v298_v53 = vrot.slane %v291_v43, %v289_v23  ;;  %v3541_v23 = vld [vmem:[%s5529_s4 + $0x58] sm:$0xff]  }
  0x2e   : > { %3345 = vmatprep.subr.bf16.mxu0 %v3541_v23  ;;  %3508 = vmatprep.subr.bf16.mxu1 %v3541_v23 }
  0x2f   : > { %v300_v62 = vmul.f32 %v298_v53, %v268_v47  ;;  %3346 = vmatpush3.bf16.msra.mxu0 %v3542_v29  ;;  %3516 = vmatpush3.bf16.msra.mxu1 %v3542_v29 }
  0x31   : > { %v301_v11 = vmul.f32 %v300_v62, %v3622_v6  ;;  %v3774_v12 = vrot.slane %v300_v62, %v370_v40  ;;  %v3785_v6 = vadd.s32 40, %v3629_v13 }
  0x33   : > { %v302_v19 = vsub.f32 %v269_v4, %v301_v11  ;;  %v375_v20 = vmul.f32 %v3266_v44, %v3774_v12  ;;  %v376_v21 = vmul.f32 %v3267_v45, %v3774_v12  ;;  %v373_v22 = vmul.f32 %v3262_v46, %v3774_v12  ;;  %v3543_v44 = vld [vmem:[%s5529_s4 + $0x60] sm:$0xff]  }
  0x34   : > { %v374_v24 = vmul.f32 %v3263_v48, %v3774_v12  ;;  %v377_v25 = vmul.f32 %v3270_v49, %v3774_v12  ;;  %v378_v26 = vmul.f32 %v3271_v50, %v3774_v12  ;;  %v395_v27 = vmul.f32 %v3306_v54, %v3774_v12  ;;  %v3544_v49 = vld [vmem:[%s5529_s4 + $0x20] sm:$0xff]   ;;  %3347 = vmatprep.subr.bf16.mxu0 %v3543_v44 }
  0x35   : > { %v3806_v30 = vrot.slane %v302_v19, %v370_v40  ;;  %v396_v31 = vmul.f32 %v3307_v55, %v3774_v12  ;;  %v399_v32 = vmul.f32 %v3314_v58, %v3774_v12  ;;  %v400_v33 = vmul.f32 %v3315_v59, %v3774_v12  ;;  %3509 = vmatprep.subr.bf16.mxu1 %v3543_v44 }
  0x36   : > { %v379_v35 = vmul.f32 %v3274_v60, %v3774_v12  ;;  %v380_v36 = vmul.f32 %v3275_v5, %v3774_v12  ;;  %v397_v37 = vmul.f32 %v3310_v7, %v3774_v12  ;;  %v398_v38 = vmul.f32 %v3311_v8, %v3774_v12  ;;  %3348 = vmatpush3.bf16.msra.mxu0 %v3544_v49 }
  0x37   : > { %v413_v39 = vadd.f32 %v3806_v30, %v375_v20  ;;  %v414_v40 = vadd.f32 %v3806_v30, %v376_v21  ;;  %v411_v41 = vadd.f32 %v3806_v30, %v373_v22  ;;  %v412_v43 = vadd.f32 %v3806_v30, %v374_v24  ;;  %3517 = vmatpush3.bf16.msra.mxu1 %v3544_v49 }
  0x38   : > { %v415_v45 = vadd.f32 %v3806_v30, %v377_v25  ;;  %v416_v46 = vadd.f32 %v3806_v30, %v378_v26  ;;  %v433_v47 = vadd.f32 %v3806_v30, %v395_v27  ;;  %v434_v48 = vadd.f32 %v3806_v30, %v396_v31  ;;  %3349 = vmatprep.subr.bf16.mxu0 %v3545_v3 }
  0x39   : > { %v445_v50 = vmax.f32 %v413_v39, 0.0  ;;  %v446_v51 = vmax.f32 %v414_v40, 0.0  ;;  %v443_v52 = vmax.f32 %v411_v41, 0.0  ;;  %v444_v53 = vmax.f32 %v412_v43, 0.0  ;;  %3510 = vmatprep.subr.bf16.mxu1 %v3545_v3 }
  0x3a   : > { %v447_v54 = vmax.f32 %v415_v45, 0.0  ;;  %v448_v55 = vmax.f32 %v416_v46, 0.0  ;;  %v465_v56 = vmax.f32 %v433_v47, 0.0  ;;  %v466_v57 = vmax.f32 %v434_v48, 0.0  ;;  %3350 = vmatpush3.bf16.msra.mxu0 %v3546_v9 }
  0x3b   : > { %v3833_v58 = vpack.c.bf16 %v446_v51, %v445_v50  ;;  %v3835_v59 = vpack.c.bf16 %v444_v53, %v443_v52  ;;  %v437_v60 = vadd.f32 %v3806_v30, %v399_v32  ;;  %v438_v62 = vadd.f32 %v3806_v30, %v400_v33  ;;  %3518 = vmatpush3.bf16.msra.mxu1 %v3546_v9  ;;  %v3550_v50 = vld [vmem:[%s5529_s4 + $0x38] sm:$0xff]  }
  0x3c   : > { %v3842_v4 = vpack.c.bf16 %v448_v55, %v447_v54  ;;  %v3844_v5 = vpack.c.bf16 %v466_v57, %v465_v56  ;;  %v417_v7 = vadd.f32 %v3806_v30, %v379_v35  ;;  %v418_v8 = vadd.f32 %v3806_v30, %v380_v36 }
  0x3d   : > { %1909 = vrot.lane.b32.xlu0 %v3833_v58, %s3567_s17  ;;  %1686 = vrot.lane.b32.xlu1 %v3835_v59, %s3564_s25  ;;  %v469_v10 = vmax.f32 %v437_v60, 0.0  ;;  %v470_v11 = vmax.f32 %v438_v62, 0.0  ;;  %v435_v15 = vadd.f32 %v3806_v30, %v397_v37  ;;  %v436_v19 = vadd.f32 %v3806_v30, %v398_v38 }
  0x3e   : > { %v5609_v20 = vmov 0  ;;  %v977_v21 = vshll.u32 %v3835_v59, 16  ;;  %v974_v22 = vshrl.u32 %v3835_v59, 16  ;;  %v563_v23 = vand.u32 15, %v3785_v6  ;;  %v3547_v6 = vld [vmem:[%s5529_s4 + $0x70] sm:$0xff]  }
  0x3f   : > { %v5610_v20 = vsel %vm3860_vm2, 4294967295, %v5609_v20  ;;  %v3868_v24 = vadd.s32 32, %v3629_v13  ;;  %v449_v25 = vmax.f32 %v417_v7, 0.0  ;;  %v450_v26 = vmax.f32 %v418_v8, 0.0  ;;  %3351 = vmatprep.subr.bf16.mxu0 %v3547_v6  ;;  %3511 = vmatprep.subr.bf16.mxu1 %v3547_v6 }
  0x40   : > { %5611 = vst [vmem:[#allocation2_spill] sm:$0xff] %v5610_v20  ;;  %v984_v61 = vshll.u32 %v3833_v58, 16  ;;  %v467_v27 = vmax.f32 %v435_v15, 0.0  ;;  %v468_v29 = vmax.f32 %v436_v19, 0.0  ;;  %v1310_v31 = vrot.slane %v977_v21, 1  ;;  %3352 = vmatpush3.bf16.msra.mxu0 %v3548_v18  ;;  %3519 = vmatpush3.bf16.msra.mxu1 %v3548_v18  ;;  %v3327_v19 = vld [vmem:[%s3640_s7 + $0x20] sm:$0xff]  }
  0x41   : > { %v981_v32 = vshrl.u32 %v3833_v58, 16  ;;  %1911 = vrot.lane.b32.xlu0 %v3842_v4, %s3567_s17  ;;  %1708 = vrot.lane.b32.xlu1 %v3844_v5, %s3564_s25  ;;  %v3898_v33 = vpack.c.bf16 %v470_v11, %v469_v10  ;;  %v992_v36 = vshll.u32 %v3842_v4, 16  ;;  %v5616_v37 = vmov 0 }
  0x42   : > { %v5617_v37 = vsel %vm3910_vm7, 4294967295, %v5616_v37  ;;  %v976_v38 = vrot.slane %v974_v22, 7  ;;  %v989_v40 = vshrl.u32 %v3842_v4, 16  ;;  %v1311_v41 = vor.u32 %v1310_v31, %v974_v22  ;;  %3353 = vmatprep.subr.bf16.mxu0 %v3549_v28  ;;  %3512 = vmatprep.subr.bf16.mxu1 %v3549_v28 }
  0x43   : > { %5618 = vst [vmem:[#allocation3_spill] sm:$0xff] %v5617_v37  ;;  %v1312_v43 = vrot.slane %v984_v61, 1  ;;  %v983_v44 = vrot.slane %v981_v32, 7  ;;  %v3318_v45 = vunpack.c.l.bf16 %v3889_v2  ;;  %v3319_v46 = vunpack.c.h.bf16 %v3889_v2 }
  0x44   : > { %v979_v16 = vor.u32 %v977_v21, %v976_v38  ;;  %v3949_v47 = vpack.c.bf16 %v450_v26, %v449_v25  ;;  %v3951_v48 = vpack.c.bf16 %v468_v29, %v467_v27  ;;  %v1377_v49 = vsel %vm3902_vm6, 0, %v1310_v31  ;;  %3354 = vmatpush3.bf16.msra.mxu0 %v3550_v50  ;;  %3520 = vmatpush3.bf16.msra.mxu1 %v3550_v50 }
  0x45   : > { %v3955_v34 = vrot.slane %v989_v40, 7  ;;  %1688 = vrot.lane.b32.xlu0 %v3833_v58, %s3564_s25  ;;  %1933 = vrot.lane.b32.xlu1 %v3898_v33, %s3567_s17  ;;  %v1314_v51 = vor.u32 %v1312_v43, %v981_v32  ;;  %v1315_v52 = vrot.slane %v992_v36, 1  ;;  %v986_v53 = vor.u32 %v984_v61, %v983_v44 }
  0x46   : > { %v3966_v54 = vsel %vm3924_vm9, 0, %v979_v16  ;;  %v3969_v55 = vsel %vm5536_vm13, %v1311_v41, %v1312_v43  ;;  %v1072_v57 = vshll.u32 %v3951_v48, 16  ;;  %v3154_v60 = vcombine.low %v3698_v42, %v3934_v0 }
  0x47   : > { %v3138_v62 = vcombine.low %v3942_v17, %v3698_v42  ;;  %vm3979_vm10 = vcmp.lt.s32.totalorder %v563_v23, 15  ;;  %v556_v7 = vand.u32 15, %v3868_v24  ;;  %v519_v8 = vadd.s32 216, %v3629_v13 }
  0x48   : > { %v1570_v9 = vsel %vm3860_vm2, %v1377_v49, 0  ;;  %v994_v10 = vor.u32 %v992_v36, %v3955_v34  ;;  %v1069_v11 = vshrl.u32 %v3951_v48, 16  ;;  %v518_v15 = vadd.s32 208, %v3629_v13  ;;  %vm1447_vm11 = vmpackc.low %vm3979_vm10, %vm3979_vm10 }
  0x49   : > { %1913 = vrot.lane.b32.xlu0 %v3949_v47, %s3567_s17  ;;  %1710 = vrot.lane.b32.xlu1 %v3951_v48, %s3564_s25  ;;  %v1619_v21 = vsel %vm3860_vm2, %v3969_v55, 0  ;;  %v3999_v22 = vsel %vm5536_vm13, %v1314_v51, %v1315_v52  ;;  %v4002_v23 = vsel %vm5539_vm1, %v976_v38, %v986_v53  ;;  %v1000_v24 = vshll.u32 %v3949_v47, 16 }
  0x4a   : > { %5625 = vst [vmem:[#allocation4_spill] sm:$0xff] %v3999_v22  ;;  %v1080_v25 = vshll.u32 %v3898_v33, 16  ;;  %v4008_v26 = vrot.slane %v1072_v57, 1  ;;  %v1077_v61 = vshrl.u32 %v3898_v33, 16  ;;  %v1317_v6 = vor.u32 %v1315_v52, %v989_v40 }
  0x4b   : > { %v4013_v27 = vrot.slane %v1000_v24, 1  ;;  %v1061_v29 = vshrl.u32 %v3844_v5, 16  ;;  %v717_v31 = vand.u32 15, %v519_v8  ;;  %v3278_v32 = vunpack.c.l.bf16 %v3327_v19 }
  0x4c   : > { %v1620_v2 = vsel %vm3910_vm7, %v3999_v22, 0  ;;  %v1637_v18 = vsel %vm3917_vm8, %v4002_v23, 0  ;;  %v4023_v36 = vsel %vm5539_vm1, %v983_v44, %v994_v10  ;;  %v1064_v38 = vshll.u32 %v3844_v5, 16  ;;  %v3338_v10 = vld [vmem:[%s3640_s7 + $0x78] sm:$0xff]  }
  0x4d   : > { %1732 = vrot.lane.b32.xlu1 %v1570_v9, %s3568_s30  ;;  %1828 = vrot.lane.b32.xlu0 %v1619_v21, %s3564_s25  ;;  %v4030_v40 = vsel %vm5536_vm13, %v1317_v6, %v4013_v27  ;;  %v4035_v41 = vrot.slane %v1061_v29, 7  ;;  %v401_v43 = vmul.f32 %v3318_v45, %v3774_v12  ;;  %v402_v44 = vmul.f32 %v3319_v46, %v3774_v12 }
  0x4e   : > { %5626 = vst [vmem:[#allocation5_spill] sm:$0xff] %v4030_v40  ;;  %v1347_v0 = vor.u32 %v4008_v26, %v1069_v11  ;;  %v4040_v16 = vrot.slane %v1080_v25, 1  ;;  %v4044_v28 = vrot.slane %v1077_v61, 7  ;;  %vm4049_vm12 = vcmp.ne.s16.totalorder %v3154_v60, 0 }
  0x4f   : > { %v5627_v50 = vmov 0  ;;  %vm4053_vm14 = vcmp.gt.s32.totalorder %v556_v7, 0  ;;  %v4058_v46 = vor.u32 %v1064_v38, %v4035_v41  ;;  %v3279_v51 = vunpack.c.h.bf16 %v3327_v19 }
  0x50   : > { %v5628_v50 = vsel %vm4049_vm12, 4294967295, %v5627_v50  ;;  %v1479_v52 = vsel %vm1447_vm11, 65537, %v5537_v1  ;;  %v439_v53 = vadd.f32 %v3806_v30, %v401_v43  ;;  %v440_v3 = vadd.f32 %v3806_v30, %v402_v44  ;;  %vm1176_vm5 = vmpackc.low %vm4053_vm14, %vm4053_vm14 }
  0x51   : > { %5629 = vst [vmem:[#allocation6_spill] sm:$0xff] %v5628_v50  ;;  %v710_v8 = vand.u32 15, %v518_v15  ;;  %1830 = vrot.lane.b32.xlu0 %v1620_v2, %s3564_s25  ;;  %1876 = vrot.lane.b32.xlu1 %v1637_v18, %s3568_s30  ;;  %v1638_v60 = vsel %vm3874_vm3, %v4023_v36, 0  ;;  %v1600_v7 = vsel %vm3917_vm8, %v3966_v54, 0  ;;  %v1071_v9 = vrot.slane %v1069_v11, 7 }
  0x52   : > { %vm4071_vm4 = vcmp.lt.s32.totalorder %v717_v31, 15  ;;  %v4077_v15 = vsel %vm5536_vm13, %v1347_v0, %v4040_v16  ;;  %v1082_v19 = vor.u32 %v1080_v25, %v4044_v28  ;;  %v4080_v21 = vrot.slane %v1064_v38, 1 }
  0x53   : > { %5634 = vst [vmem:[#allocation7_spill] sm:$0xff] %v4077_v15  ;;  %v997_v6 = vshrl.u32 %v3949_v47, 16  ;;  %v471_v39 = vmax.f32 %v439_v53, 0.0  ;;  %v472_v11 = vmax.f32 %v440_v3, 0.0  ;;  %v381_v31 = vmul.f32 %v3278_v32, %v3774_v12  ;;  %vm1469_vm11 = vmpackc.low %vm4071_vm4, %vm4071_vm4 }
  0x54   : > { %v382_v2 = vmul.f32 %v3279_v51, %v3774_v12  ;;  %v499_v18 = vadd.s32 56, %v3629_v13  ;;  %vm4094_vm8 = vcmp.ne.s16.totalorder %v3138_v62, 0  ;;  %v3144_v38 = vcombine.low %v3698_v42, %v1479_v52 }
  0x55   : > { %1878 = vrot.lane.b32.xlu0 %v1638_v60, %s3568_s30  ;;  %1780 = vrot.lane.b32.xlu1 %v1600_v7, %s3567_s17  ;;  %v1206_v43 = vsel %vm1176_vm5, 65537, %v5537_v1  ;;  %vm4100_vm10 = vcmp.gt.s32.totalorder %v710_v8, 0  ;;  %v1631_v44 = vsel %vm4049_vm12, %v4077_v15, 0  ;;  %v1571_v17 = vsel %vm3910_vm7, %v3969_v55, 0 }
  0x56   : > { %v1344_v62 = vor.u32 %v4080_v21, %v1061_v29  ;;  %v4113_v0 = vrot.slane %v997_v6, 7  ;;  %v4119_v45 = vsel %vm5539_vm1, %v1071_v9, %v1082_v19  ;;  %v4121_v51 = vpack.c.bf16 %v472_v11, %v471_v39  ;;  %vm1198_vm4 = vmpackc.low %vm4100_vm10, %vm4100_vm10 }
  0x57   : > { %5639 = vst [vmem:[#allocation8_spill] sm:$0xff] %v4119_v45  ;;  %v419_v52 = vadd.f32 %v3806_v30, %v381_v31  ;;  %v420_v55 = vadd.f32 %v3806_v30, %v382_v2  ;;  %v577_v53 = vand.u32 15, %v499_v18  ;;  %v498_v29 = vadd.s32 48, %v3629_v13 }
  0x58   : > { %5640 = vst [vmem:[#allocation9_spill] sm:$0xff] %v4121_v51  ;;  %v1601_v3 = vsel %vm3874_vm3, %v4002_v23, 0  ;;  %vm4131_vm14 = vcmp.ne.s16.totalorder %v3144_v38, 0  ;;  %v5641_v8 = vmov 0  ;;  %v3128_v60 = vcombine.low %v1206_v43, %v3698_v42 }
  0x59   : > { %1852 = vrot.lane.b32.xlu0 %v1631_v44, %s3564_s25  ;;  %1734 = vrot.lane.b32.xlu1 %v1571_v17, %s3568_s30  ;;  %v5642_v8 = vsel %vm4131_vm14, 4294967295, %v5641_v8  ;;  %v1501_v7 = vsel %vm1469_vm11, 65537, %v5537_v1  ;;  %v1649_v19 = vsel %vm4094_vm8, %v4119_v45, 0  ;;  %v4143_v39 = vsel %vm5536_vm13, %v1344_v62, %v4008_v26 }
  0x5a   : > { %5643 = vst [vmem:[#allocation10_spill] sm:$0xff] %v5642_v8  ;;  %v1002_v11 = vor.u32 %v1000_v24, %v4113_v0  ;;  %v1074_v31 = vor.u32 %v1072_v57, %v1071_v9  ;;  %v1088_v2 = vshll.u32 %v4121_v51, 16  ;;  %v5534_v18 = vshrl.u32 %v4121_v51, 16 }
  0x5b   : > { %v451_v38 = vmax.f32 %v419_v52, 0.0  ;;  %v452_v43 = vmax.f32 %v420_v55, 0.0  ;;  %vm4155_vm5 = vcmp.lt.s32.totalorder %v577_v53, 15  ;;  %v570_v44 = vand.u32 15, %v498_v29 }
  0x5c   : > { %v3322_v17 = vunpack.c.l.bf16 %v3338_v10  ;;  %vm4161_vm11 = vcmp.ne.s16.totalorder %v3128_v60, 0  ;;  %v3155_v24 = vcombine.low %v3698_v42, %v1501_v7  ;;  %v1228_v9 = vsel %vm1198_vm4, 65537, %v5537_v1  ;;  %vm1449_vm10 = vmpackc.low %vm4155_vm5, %vm4155_vm5 }
  0x5d   : > { %1900 = vrot.lane.b32.xlu0 %v1649_v19, %s3568_s30  ;;  %1782 = vrot.lane.b32.xlu1 %v1601_v3, %s3567_s17  ;;  %v3323_v32 = vunpack.c.h.bf16 %v3338_v10  ;;  %v1621_v62 = vsel %vm4131_vm14, %v4030_v40, 0  ;;  %v1582_v52 = vsel %vm4049_vm12, %v4143_v39, 0  ;;  %v4175_v55 = vsel %vm5539_vm1, %v3955_v34, %v1002_v11 }
  0x5e   : > { %5648 = vst [vmem:[#allocation11_spill] sm:$0xff] %v4175_v55  ;;  %v4179_v53 = vsel %vm5539_vm1, %v4035_v41, %v1074_v31  ;;  %v1350_v29 = vor.u32 %v4040_v16, %v1077_v61  ;;  %v4184_v3 = vrot.slane %v1088_v2, 1  ;;  %v4188_v60 = vrot.slane %v5534_v18, 7  ;;  %v3328_v31 = vld [vmem:[%s3640_s7 + $0x28] sm:$0xff]  }
  0x5f   : > { %v4190_v7 = vpack.c.bf16 %v452_v43, %v451_v38  ;;  %vm4197_vm4 = vcmp.ne.s16.totalorder %v3155_v24, 0  ;;  %v5650_v34 = vmov 0  ;;  %v3139_v61 = vcombine.low %v1228_v9, %v3698_v42 }
  0x60   : > { %v5651_v34 = vsel %vm4197_vm4, 4294967295, %v5650_v34  ;;  %vm4202_vm0 = vcmp.gt.s32.totalorder %v570_v44, 0  ;;  %v1639_v16 = vsel %vm4161_vm11, %v4175_v55, 0  ;;  %v1612_v10 = vsel %vm4094_vm8, %v4179_v53, 0 }
  0x61   : > { %5649 = vst [vmem:[#allocation12_spill] sm:$0xff] %v4190_v7  ;;  %1832 = vrot.lane.b32.xlu0 %v1621_v62, %s3564_s25  ;;  %1756 = vrot.lane.b32.xlu1 %v1582_v52, %s3568_s30  ;;  %5652 = vst [vmem:[#allocation13_spill] sm:$0xff] %v5651_v34  ;;  %v1481_v19 = vsel %vm1449_vm10, 65537, %v5537_v1  ;;  %v403_v11 = vmul.f32 %v3322_v17, %v3774_v12  ;;  %v4217_v38 = vsel %vm5536_vm13, %v1350_v29, %v4184_v3  ;;  %vm5694_vm7 = vsmask.f32 7424 }
  0x62   : > { %5655 = vst [vmem:[#allocation14_spill] sm:$0xff] %v4217_v38  ;;  %v1090_v43 = vor.u32 %v1088_v2, %v4188_v60  ;;  %v1008_v26 = vshll.u32 %v4190_v7, 16  ;;  %v404_v44 = vmul.f32 %v3323_v32, %v3774_v12  ;;  %v521_v24 = vadd.s32 232, %v3629_v13  ;;  %vm1178_vm10 = vmpackc.low %vm4202_vm0, %vm4202_vm0 }
  0x63   : > { %v520_v9 = vadd.s32 224, %v3629_v13  ;;  %vm4226_vm5 = vcmp.ne.s16.totalorder %v3139_v61, 0  ;;  %v3145_v62 = vcombine.low %v3698_v42, %v1481_v19  ;;  %v3282_v52 = vunpack.c.l.bf16 %v3328_v31 }
  0x64   : > { %v3283_v2 = vunpack.c.h.bf16 %v3328_v31  ;;  %v1632_v32 = vsel %vm4197_vm4, %v4217_v38, 0  ;;  %v1572_v29 = vsel %vm4131_vm14, %v3999_v22, 0  ;;  %v441_v61 = vadd.f32 %v3806_v30, %v403_v11 }
  0x65   : > { %1880 = vrot.lane.b32.xlu0 %v1639_v16, %s3568_s30  ;;  %1804 = vrot.lane.b32.xlu1 %v1612_v10, %s3567_s17  ;;  %v1320_v16 = vor.u32 %v4013_v27, %v997_v6  ;;  %v4246_v10 = vsel %vm5539_vm1, %v4044_v28, %v1090_v43  ;;  %v4248_v19 = vrot.slane %v1008_v26, 1  ;;  %v5535_v31 = vshrl.u32 %v4190_v7, 16 }
  0x66   : > { %5658 = vst [vmem:[#allocation15_spill] sm:$0xff] %v4246_v10  ;;  %v442_v49 = vadd.f32 %v3806_v30, %v404_v44  ;;  %v731_v56 = vand.u32 15, %v521_v24  ;;  %vm4254_vm15 = vcmp.ne.s16.totalorder %v3145_v62, 0  ;;  %v5659_v27 = vmov 0 }
  0x67   : > { %v5660_v27 = vsel %vm4254_vm15, 4294967295, %v5659_v27  ;;  %v1208_v6 = vsel %vm1178_vm10, 65537, %v5537_v1  ;;  %v724_v28 = vand.u32 15, %v520_v9  ;;  %v1650_v41 = vsel %vm4226_vm5, %v4246_v10, 0 }
  0x68   : > { %5661 = vst [vmem:[#allocation16_spill] sm:$0xff] %v5660_v27  ;;  %v1602_v11 = vsel %vm4161_vm11, %v4023_v36, 0  ;;  %v383_v43 = vmul.f32 %v3282_v52, %v3774_v12  ;;  %v384_v44 = vmul.f32 %v3283_v2, %v3774_v12  ;;  %v4269_v24 = vsel %vm5536_vm13, %v1320_v16, %v4248_v19  ;;  %v3333_v2 = vld [vmem:[%s3640_s7 + $0x50] sm:$0xff]  }
  0x69   : > { %1854 = vrot.lane.b32.xlu0 %v1632_v32, %s3564_s25  ;;  %1736 = vrot.lane.b32.xlu1 %v1572_v29, %s3568_s30  ;;  %5662 = vst [vmem:[#allocation17_spill] sm:$0xff] %v4269_v24  ;;  %v4273_v62 = vrot.slane %v5535_v31, 7  ;;  %v473_v9 = vmax.f32 %v441_v61, 0.0  ;;  %v474_v32 = vmax.f32 %v442_v49, 0.0  ;;  %vm4275_vm0 = vcmp.lt.s32.totalorder %v731_v56, 15 }
  0x6a   : > { %v501_v18 = vadd.s32 72, %v3629_v13  ;;  %v3129_v52 = vcombine.low %v1208_v6, %v3698_v42  ;;  %v1622_v16 = vsel %vm4254_vm15, %v4269_v24, 0  ;;  %v1583_v56 = vsel %vm4197_vm4, %v4077_v15, 0  ;;  %vm1471_vm10 = vmpackc.low %vm4275_vm0, %vm4275_vm0 }
  0x6b   : > { %v421_v49 = vadd.f32 %v3806_v30, %v383_v43  ;;  %v422_v61 = vadd.f32 %v3806_v30, %v384_v44  ;;  %v1010_v31 = vor.u32 %v1008_v26, %v4273_v62  ;;  %vm4298_vm13 = vcmp.gt.s32.totalorder %v724_v28, 0 }
  0x6c   : > { %v3302_v1 = vunpack.c.l.bf16 %v3333_v2  ;;  %vm4304_vm1 = vcmp.ne.s16.totalorder %v3129_v52, 0  ;;  %v5670_v26 = vmov 0   ;;  %vm1200_vm0 = vmpackc.low %vm4298_vm13, %vm4298_vm13  ;;  %vm5671_vm4 = vsmask.f32 256 }
  0x6d   : > { %1902 = vrot.lane.b32.xlu0 %v1650_v41, %s3568_s30  ;;  %1784 = vrot.lane.b32.xlu1 %v1602_v11, %s3567_s17  ;;  %v4293_v41 = vpack.c.bf16 %v474_v32, %v473_v9  ;;  %v591_v11 = vand.u32 15, %v501_v18  ;;  %v1503_v44 = vsel %vm1471_vm10, 65537, %v5670_v26  ;;  %v453_v28 = vmax.f32 %v421_v49, 0.0 }
  0x6e   : > { %v454_v9 = vmax.f32 %v422_v61, 0.0  ;;  %v4314_v18 = vsel %vm5671_vm4, %v4113_v0, %v1010_v31  ;;  %v3303_v52 = vunpack.c.h.bf16 %v3333_v2  ;;  %v3156_v0 = vcombine.low %v3698_v42, %v1503_v44 }
  0x6f   : > { %5665 = vst [vmem:[#allocation18_spill] sm:$0xff] %v4293_v41  ;;  %5672 = vst [vmem:[#allocation19_spill] sm:$0xff] %v4314_v18  ;;  %v1355_v32 = vshll.u32 %v4293_v41, 16  ;;  %vm4318_vm12 = vcmp.lt.s32.totalorder %v591_v11, 15  ;;  %v1230_v31 = vsel %vm1200_vm0, 65537, %v5670_v26  ;;  %v500_v49 = vadd.s32 64, %v3629_v13 }
  0x70   : > { %v1613_v61 = vsel %vm4226_vm5, %v4119_v45, 0  ;;  %v5675_v6 = vshrl.u32 %v4121_v51, 16  ;;  %v394_v44 = vmul.f32 %v3303_v52, %v3774_v12  ;;  %v5676_v34 = vshrl.u32 %v4293_v41, 16  ;;  %vm1451_vm13 = vmpackc.low %vm4318_vm12, %vm4318_vm12 }
  0x71   : > { %1834 = vrot.lane.b32.xlu0 %v1622_v16, %s3564_s25  ;;  %1758 = vrot.lane.b32.xlu1 %v1583_v56, %s3568_s30  ;;  %v393_v56 = vmul.f32 %v3302_v1, %v3774_v12  ;;  %v1640_v1 = vsel %vm4304_vm1, %v4314_v18, 0  ;;  %v4343_v29 = vrot.slane %v1355_v32, 1  ;;  %v4349_v2 = vpack.c.bf16 %v454_v9, %v453_v28 }
  0x72   : > { %v1353_v11 = vor.u32 %v4184_v3, %v5675_v6  ;;  %v4347_v50 = vrot.slane %v5676_v34, 7  ;;  %v432_v37 = vadd.f32 %v3806_v30, %v394_v44  ;;  %v3140_v3 = vcombine.low %v1230_v31, %v3698_v42 }
  0x73   : > { %5677 = vst [vmem:[#allocation20_spill] sm:$0xff] %v4349_v2  ;;  %v431_v15 = vadd.f32 %v3806_v30, %v393_v56  ;;  %v584_v52 = vand.u32 15, %v500_v49  ;;  %v1573_v28 = vsel %vm4254_vm15, %v4030_v40, 0  ;;  %v1483_v9 = vsel %vm1451_vm13, 65537, %v5670_v26  ;;  %v3329_v49 = vld [vmem:[%s3640_s7 + $0x30] sm:$0xff]  }
  0x74   : > { %v464_v16 = vmax.f32 %v432_v37, 0.0  ;;  %vm5678_vm12 = vsmask.f32 7424  ;;  %vm4367_vm4 = vcmp.ne.s16.totalorder %v3156_v0, 0  ;;  %v5680_v6 = vmov 0 }
  0x75   : > { %1690 = vrot.lane.b32.xlu0 %v3842_v4, %s3564_s25  ;;  %1935 = vrot.lane.b32.xlu1 %v4121_v51, %s3567_s17  ;;  %v463_v34 = vmax.f32 %v431_v15, 0.0  ;;  %v4365_v56 = vsel %vm5678_vm12, %v1353_v11, %v4343_v29  ;;  %v5681_v6 = vsel %vm4367_vm4, 4294967295, %v5680_v6  ;;  %v1016_v31 = vshll.u32 %v4349_v2, 16 }
  0x76   : > { %5679 = vst [vmem:[#allocation21_spill] sm:$0xff] %v4365_v56  ;;  %5682 = vst [vmem:[#allocation22_spill] sm:$0xff] %v5681_v6  ;;  %v523_v15 = vadd.s32 248, %v3629_v13  ;;  %v1603_v37 = vsel %vm4304_vm1, %v4175_v55, 0  ;;  %vm4383_vm10 = vcmp.ne.s16.totalorder %v3140_v3, 0  ;;  %v5683_v0 = vmov 0 }
  0x77   : > { %v5684_v0 = vsel %vm4383_vm10, 4294967295, %v5683_v0  ;;  %vm4388_vm0 = vcmp.gt.s32.totalorder %v584_v52, 0  ;;  %v1633_v44 = vsel %vm4367_vm4, %v4365_v56, 0  ;;  %vm5689_vm13 = vsmask.f32 256 }
  0x78   : > { %5685 = vst [vmem:[#allocation23_spill] sm:$0xff] %v5684_v0  ;;  %v4404_v52 = vrot.slane %v1016_v31, 1  ;;  %v3287_v40 = vunpack.c.h.bf16 %v3329_v49  ;;  %v745_v8 = vand.u32 15, %v523_v15  ;;  %v522_v20 = vadd.s32 240, %v3629_v13 }
  0x79   : > { %1882 = vrot.lane.b32.xlu0 %v1640_v1, %s3568_s30  ;;  %1806 = vrot.lane.b32.xlu1 %v1613_v61, %s3567_s17  ;;  %v1589_v1 = vor.u32 %v4347_v50, %v1355_v32  ;;  %v4375_v61 = vpack.c.bf16 %v464_v16, %v463_v34  ;;  %v3146_v32 = vcombine.low %v3698_v42, %v1483_v9  ;;  %v5688_v34 = vshrl.u32 %v4190_v7, 16 }
  0x7a   : > { %v5554_v16 = vshrl.u32 %v4349_v2, 16  ;;  %v3286_v9 = vunpack.c.l.bf16 %v3329_v49  ;;  %v502_v15 = vadd.s32 80, %v3629_v13  ;;  %vm5693_vm15 = vsmask.f32 256 }
  0x7b   : > { %v5553_v3 = vshrl.u32 %v4375_v61, 16  ;;  %v4402_v27 = vsel %vm5689_vm13, %v4188_v60, %v1589_v1  ;;  %vm4413_vm12 = vcmp.ne.s16.totalorder %v3146_v32, 0  ;;  %vm1180_vm13 = vmpackc.low %vm4388_vm0, %vm4388_vm0  ;;  %v386_v11 = vmul.f32 %v3287_v40, %v3774_v12 }
  0x7c   : > { %v1651_v60 = vsel %vm4383_vm10, %v4402_v27, 0  ;;  %v4425_v1 = vrot.slane %v5554_v16, 7  ;;  %v385_v32 = vmul.f32 %v3286_v9, %v3774_v12  ;;  %vm4443_vm0 = vcmp.lt.s32.totalorder %v745_v8, 15 }
  0x7d   : > { %1915 = vrot.lane.b32.xlu0 %v4190_v7, %s3567_s17  ;;  %1738 = vrot.lane.b32.xlu1 %v1573_v28, %s3568_s30  ;;  %v1323_v28 = vor.u32 %v4248_v19, %v5688_v34  ;;  %v4409_v22 = vrot.slane %v5553_v3, 7  ;;  %v5690_v19 = vmov 0  ;;  %v1210_v34 = vsel %vm1180_vm13, 65537, %v5670_v26 }
  0x7e   : > { %v5691_v19 = vsel %vm4413_vm12, 4294967295, %v5690_v19  ;;  %v503_v16 = vadd.s32 88, %v3629_v13  ;;  %v598_v8 = vand.u32 15, %v502_v15  ;;  %v1018_v9 = vor.u32 %v1016_v31, %v4425_v1 }
  0x7f   : > { %5692 = vst [vmem:[#allocation24_spill] sm:$0xff] %v5691_v19  ;;  %v4431_v49 = vsel %vm5693_vm15, %v4409_v22, %v4058_v46  ;;  %v738_v46 = vand.u32 15, %v522_v20  ;;  %v3130_v20 = vcombine.low %v1210_v34, %v3698_v42  ;;  %vm1473_vm15 = vmpackc.low %vm4443_vm0, %vm4443_vm0  ;;  %vm5702_vm0 = vsmask.f32 256  ;;  %v3330_v34 = vld [vmem:[%s3640_s7 + $0x38] sm:$0xff]  }
  0x80   : > { %v605_v6 = vand.u32 15, %v503_v16  ;;  %v1505_v31 = vsel %vm1473_vm15, 65537, %v5670_v26  ;;  %vm4471_vm13 = vcmp.gt.s32.totalorder %v598_v8, 0  ;;  %v4477_v3 = vsel %vm5702_vm0, %v4273_v62, %v1018_v9 }
  0x81   : > { %1856 = vrot.lane.b32.xlu0 %v1633_v44, %s3564_s25  ;;  %1786 = vrot.lane.b32.xlu1 %v1603_v37, %s3567_s17  ;;  %v4435_v37 = vsel %vm5694_vm7, %v1323_v28, %v4404_v52  ;;  %v1584_v28 = vsel %vm4367_vm4, %v4217_v38, 0  ;;  %v424_v44 = vadd.f32 %v3806_v30, %v386_v11  ;;  %vm4464_vm7 = vcmp.gt.s32.totalorder %v738_v46, 0  ;;  %5703 = vst [vmem:[#allocation26_spill] sm:$0xff] %v4477_v3 }
  0x82   : > { %5695 = vst [vmem:[#allocation25_spill] sm:$0xff] %v4435_v37  ;;  %v1623_v40 = vsel %vm4413_vm12, %v4435_v37, 0  ;;  %vm4479_vm4 = vcmp.ne.s16.totalorder %v3130_v20, 0  ;;  %vm1202_vm14 = vmpackc.low %vm4464_vm7, %vm4464_vm7  ;;  %vm4487_vm15 = vcmp.lt.s32.totalorder %v605_v6, 15  ;;  %v1614_v62 = vsel %vm4383_vm10, %v4246_v10, 0 }
  0x83   : > { %v456_v11 = vmax.f32 %v424_v44, 0.0  ;;  %v3157_v55 = vcombine.low %v3698_v42, %v1505_v31  ;;  %v5709_v44 = vshrl.u32 %v4293_v41, 16  ;;  %vm1182_vm7 = vmpackc.low %vm4471_vm13, %vm4471_vm13  ;;  %v1641_v6 = vsel %vm4479_vm4, %v4477_v3, 0 }
  0x84   : > { %v3290_v8 = vunpack.c.l.bf16 %v3330_v34  ;;  %v3291_v9 = vunpack.c.h.bf16 %v3330_v34  ;;  %vm1453_vm0 = vmpackc.low %vm4487_vm15, %vm4487_vm15  ;;  %v1604_v35 = vsel %vm4479_vm4, %v4314_v18, 0  ;;  %v506_v31 = vadd.s32 112, %v3629_v13 }
  0x85   : > { %1904 = vrot.lane.b32.xlu0 %v1651_v60, %s3568_s30  ;;  %1712 = vrot.lane.b32.xlu1 %v3898_v33, %s3564_s25  ;;  %v423_v60 = vadd.f32 %v3806_v30, %v385_v32  ;;  %v5704_v32 = vmov 0  ;;  %vm4520_vm13 = vcmp.ne.s16.totalorder %v3157_v55, 0  ;;  %v5781_v14 = vshll.u32 %v4375_v61, 16 }
  0x86   : > { %v5705_v32 = vsel %vm4479_vm4, 4294967295, %v5704_v32  ;;  %v387_v34 = vmul.f32 %v3290_v8, %v3774_v12  ;;  %v388_v46 = vmul.f32 %v3291_v9, %v3774_v12  ;;  %v1636_v8 = vsel %vm3924_vm9, %v4347_v50, 0  ;;  %v3331_v50 = vld [vmem:[%s3640_s7 + $0x40] sm:$0xff]  }
  0x87   : > { %5706 = vst [vmem:[#allocation27_spill] sm:$0xff] %v5705_v32  ;;  %v455_v16 = vmax.f32 %v423_v60, 0.0  ;;  %v1574_v60 = vsel %vm4413_vm12, %v4269_v24, 0  ;;  %v5716_v24 = vshrl.u32 %v4349_v2, 16 }
  0x88   : > { %v425_v38 = vadd.f32 %v3806_v30, %v387_v34  ;;  %v4594_v34 = vld [vmem:[%s5529_s4 + $0x80] sm:$0xff]  }
  0x89   : > { %1836 = vrot.lane.b32.xlu0 %v1623_v40, %s3564_s25  ;;  %1760 = vrot.lane.b32.xlu1 %v1584_v28, %s3568_s30  ;;  %v1616_v40 = vor.u32 %v5709_v44, %v4343_v29  ;;  %v1232_v28 = vsel %vm1202_vm14, 65537, %v5670_v26  ;;  %v4509_v20 = vpack.c.bf16 %v456_v11, %v455_v16  ;;  %v1212_v29 = vsel %vm1182_vm7, 65537, %v5670_v26 }
  0x8a   : > { %v3141_v16 = vcombine.low %v1232_v28, %v3698_v42  ;;  %v1485_v11 = vsel %vm1453_vm0, 65537, %v5670_v26  ;;  %v3131_v55 = vcombine.low %v1212_v29, %v3698_v42  ;;  %v5713_v28 = vmov 0  ;;  %3469 = vmatprep.subr.bf16.mxu1 %v4594_v34 }
  0x8b   : > { %v4526_v15 = vsel %vm3902_vm6, %v1616_v40, 0  ;;  %v1024_v44 = vshll.u32 %v4509_v20, 16  ;;  %v3147_v9 = vcombine.low %v3698_v42, %v1485_v11  ;;  %v1021_v29 = vshrl.u32 %v4509_v20, 16 }
  0x8c   : > { %5712 = vst [vmem:[#allocation28_spill] sm:$0xff] %v4526_v15  ;;  %v1634_v40 = vsel %vm4520_vm13, %v4526_v15, 0  ;;  %vm4545_vm6 = vcmp.ne.s16.totalorder %v3141_v16, 0  ;;  %v1326_v16 = vor.u32 %v4404_v52, %v5716_v24  ;;  %vm4559_vm14 = vcmp.ne.s16.totalorder %v3131_v55, 0 }
  0x8d   : > { %1692 = vrot.lane.b32.xlu0 %v3949_v47, %s3564_s25  ;;  %1937 = vrot.lane.b32.xlu1 %v4293_v41, %s3567_s17  ;;  %v5714_v28 = vsel %vm4545_vm6, 4294967295, %v5713_v28  ;;  %v1327_v15 = vrot.slane %v1024_v44, 1  ;;  %v5717_v41 = vmov 0  ;;  %v1652_v24 = vsel %vm4545_vm6, %v1636_v8, 0 }
  0x8e   : > { %5715 = vst [vmem:[#allocation29_spill] sm:$0xff] %v5714_v28  ;;  %v5718_v41 = vsel %vm4559_vm14, 4294967295, %v5717_v41  ;;  %vm4574_vm9 = vcmp.ne.s16.totalorder %v3147_v9, 0  ;;  %v5720_v52 = vmov 0  ;;  %vm5725_vm7 = vsmask.f32 7424 }
  0x8f   : > { %5719 = vst [vmem:[#allocation30_spill] sm:$0xff] %v5718_v41  ;;  %v5721_v52 = vsel %vm4574_vm9, 4294967295, %v5720_v52  ;;  %v3294_v8 = vunpack.c.l.bf16 %v3331_v50  ;;  %v3295_v9 = vunpack.c.h.bf16 %v3331_v50 }
  0x90   : > { %5722 = vst [vmem:[#allocation31_spill] sm:$0xff] %v5721_v52 }
  0x91   : > { %1884 = vrot.lane.b32.xlu0 %v1641_v6, %s3568_s30  ;;  %1808 = vrot.lane.b32.xlu1 %v1614_v62, %s3567_s17  ;;  %v504_v62 = vadd.s32 96, %v3629_v13  ;;  %v505_v6 = vadd.s32 104, %v3629_v13  ;;  %v389_v50 = vmul.f32 %v3294_v8, %v3774_v12  ;;  %v626_v8 = vand.u32 15, %v506_v31 }
  0x93   : > { %v612_v19 = vand.u32 15, %v504_v62  ;;  %v619_v63 = vand.u32 15, %v505_v6  ;;  %v457_v62 = vmax.f32 %v425_v38, 0.0  ;;  %v1585_v38 = vsel %vm4520_vm13, %v4365_v56, 0 }
  0x94   : > { %vm5729_vm13 = vsmask.f32 256 }
  0x95   : > { %1917 = vrot.lane.b32.xlu0 %v4349_v2, %s3567_s17  ;;  %1740 = vrot.lane.b32.xlu1 %v1574_v60, %s3568_s30  ;;  %v426_v60 = vadd.f32 %v3806_v30, %v388_v46  ;;  %v4578_v46 = vrot.slane %v1021_v29, 7  ;;  %vm4580_vm15 = vcmp.gt.s32.totalorder %v612_v19, 0  ;;  %vm4587_vm0 = vcmp.lt.s32.totalorder %v619_v63, 15  ;;  %v3332_v19 = vld [vmem:[%s3640_s7 + $0x48] sm:$0xff]  }
  0x96   : > { %vm1455_vm12 = vmpackc.low %vm4587_vm0, %vm4587_vm0  ;;  %v3298_v11 = vunpack.c.l.bf16 %v3332_v19  ;;  %v3299_v56 = vunpack.c.h.bf16 %v3332_v19  ;;  %v427_v19 = vadd.f32 %v3806_v30, %v389_v50 }
  0x97   : > { %v458_v55 = vmax.f32 %v426_v60, 0.0 }
  0x98   : > { %v392_v10 = vmul.f32 %v3299_v56, %v3774_v12 }
  0x99   : > { %1858 = vrot.lane.b32.xlu0 %v1634_v40, %s3564_s25  ;;  %1788 = vrot.lane.b32.xlu1 %v1604_v35, %s3567_s17  ;;  %v4585_v40 = vsel %vm5725_vm7, %v1326_v16, %v1327_v15  ;;  %vm1184_vm7 = vmpackc.low %vm4580_vm15, %vm4580_vm15  ;;  %v1026_v16 = vor.u32 %v1024_v44, %v4578_v46  ;;  %v4610_v63 = vpack.c.bf16 %v458_v55, %v457_v62  ;;  %v1487_v44 = vsel %vm1455_vm12, 65537, %v5670_v26 }
  0x9a   : > { %5726 = vst [vmem:[#allocation32_spill] sm:$0xff] %v4585_v40  ;;  %v1624_v60 = vsel %vm4574_vm9, %v4585_v40, 0  ;;  %v1214_v6 = vsel %vm1184_vm7, 65537, %v5670_v26  ;;  %v507_v35 = vadd.s32 120, %v3629_v13  ;;  %v3148_v31 = vcombine.low %v3698_v42, %v1487_v44 }
  0x9b   : > { %v4625_v62 = vsel %vm5729_vm13, %v4425_v1, %v1026_v16  ;;  %v1032_v55 = vshll.u32 %v4610_v63, 16  ;;  %v3132_v18 = vcombine.low %v1214_v6, %v3698_v42  ;;  %v1615_v1 = vsel %vm4545_vm6, %v4402_v27, 0 }
  0x9c   : > { %5730 = vst [vmem:[#allocation33_spill] sm:$0xff] %v4625_v62  ;;  %v1329_v16 = vor.u32 %v1327_v15, %v1021_v29  ;;  %v1642_v50 = vsel %vm4559_vm14, %v4625_v62, 0  ;;  %vm4646_vm12 = vcmp.gt.s32.totalorder %v626_v8, 0  ;;  %v5733_v6 = vmov 0  ;;  %v4663_v8 = vpop.permute.xlu0 %1684 }
  0x9d   : > { %1906 = vrot.lane.b32.xlu0 %v1652_v24, %s3568_s30  ;;  %1714 = vrot.lane.b32.xlu1 %v4121_v51, %s3564_s25  ;;  %v390_v24 = vmul.f32 %v3295_v9, %v3774_v12  ;;  %v1029_v9 = vshrl.u32 %v4610_v63, 16  ;;  %vm4652_vm15 = vcmp.ne.s16.totalorder %v3132_v18, 0  ;;  %v459_v27 = vmax.f32 %v427_v19, 0.0  ;;  %vm1186_vm0 = vmpackc.low %vm4646_vm12, %vm4646_vm12 }
  0x9e   : > { %v5734_v6 = vsel %vm4652_vm15, 4294967295, %v5733_v6  ;;  %v430_v44 = vadd.f32 %v3806_v30, %v392_v10  ;;  %v1575_v18 = vsel %vm4574_vm9, %v4435_v37, 0  ;;  %vm5738_vm13 = vsmask.f32 7424 }
  0x9f   : > { %v4650_v56 = vrot.slane %v1029_v9, 7  ;;  %5735 = vst [vmem:[#allocation34_spill] sm:$0xff] %v5734_v6  ;;  %vm4678_vm2 = vcmp.ne.s16.totalorder %v3148_v31, 0  ;;  %v5739_v19 = vmov 0  ;;  %v1605_v31 = vsel %vm4559_vm14, %v4477_v3, 0 }
  0xa0   : > { %v5740_v19 = vsel %vm4678_vm2, 4294967295, %v5739_v19  ;;  %v508_v37 = vadd.s32 128, %v3629_v13  ;;  %v5759_v51 = vshrl.u32 %v4375_v61, 16 }
  0xa1   : > { %1838 = vrot.lane.b32.xlu0 %v1624_v60, %s3564_s25  ;;  %1762 = vrot.lane.b32.xlu1 %v1585_v38, %s3568_s30  ;;  %v428_v60 = vadd.f32 %v3806_v30, %v390_v24  ;;  %v391_v38 = vmul.f32 %v3298_v11, %v3774_v12  ;;  %v1330_v11 = vrot.slane %v1032_v55, 1  ;;  %v633_v24 = vand.u32 15, %v507_v35  ;;  %5741 = vst [vmem:[#allocation35_spill] sm:$0xff] %v5740_v19 }
  0xa2   : > { %v462_v12 = vmax.f32 %v430_v44, 0.0 }
  0xa3   : > { %v460_v15 = vmax.f32 %v428_v60, 0.0  ;;  %v429_v29 = vadd.f32 %v3806_v30, %v391_v38  ;;  %vm4671_vm7 = vcmp.lt.s32.totalorder %v633_v24, 15  ;;  %v4676_v10 = vsel %vm5738_vm13, %v1329_v16, %v1330_v11 }
  0xa4   : > { %v1034_v60 = vor.u32 %v1032_v55, %v4650_v56  ;;  %vm1457_vm12 = vmpackc.low %vm4671_vm7, %vm4671_vm7  ;;  %v509_v16 = vadd.s32 136, %v3629_v13  ;;  %v1625_v55 = vsel %vm4678_vm2, %v4676_v10, 0  ;;  %v511_v24 = vadd.s32 152, %v3629_v13 }
  0xa5   : > { %1694 = vrot.lane.b32.xlu0 %v4190_v7, %s3564_s25  ;;  %1939 = vrot.lane.b32.xlu1 %v5670_v26, %s3567_s17  ;;  %v4683_v38 = vpack.c.bf16 %v460_v15, %v459_v27  ;;  %v1489_v35 = vsel %vm1457_vm12, 65537, %v5670_v26 }
  0xa6   : > { %v647_v3 = vand.u32 15, %v509_v16  ;;  %v661_v41 = vand.u32 15, %v511_v24 }
  0xa7   : > { %v1040_v44 = vshll.u32 %v4683_v38, 16 }
  0xa8   : > { %vm4738_vm13 = vcmp.lt.s32.totalorder %v647_v3, 15  ;;  %vm4745_vm12 = vcmp.lt.s32.totalorder %v661_v41, 15 }
  0xa9   : > { %1886 = vrot.lane.b32.xlu0 %v1642_v50, %s3568_s30  ;;  %1810 = vrot.lane.b32.xlu1 %v1615_v1, %s3567_s17  ;;  %v1216_v1 = vsel %vm1186_vm0, 65537, %v5670_v26  ;;  %v461_v50 = vmax.f32 %v429_v29, 0.0  ;;  %vm5742_vm0 = vsmask.f32 256  ;;  %v1333_v32 = vrot.slane %v1040_v44, 1 }
  0xaa   : > { %v4706_v29 = vsel %vm5742_vm0, %v4578_v46, %v1034_v60  ;;  %v3133_v30 = vcombine.low %v1216_v1, %v3698_v42  ;;  %v1332_v60 = vor.u32 %v1330_v11, %v1029_v9  ;;  %vm5749_vm0 = vsmask.f32 7424 }
  0xab   : > { %v4712_v52 = vpack.c.bf16 %v462_v12, %v461_v50  ;;  %v1643_v46 = vsel %vm4652_vm15, %v4706_v29, 0  ;;  %v3149_v50 = vcombine.low %v3698_v42, %v1489_v35  ;;  %v1576_v35 = vsel %vm4678_vm2, %v4585_v40, 0  ;;  %vm1459_vm2 = vmpackc.low %vm4738_vm13, %vm4738_vm13 }
  0xac   : > { %vm4727_vm7 = vcmp.ne.s16.totalorder %v3133_v30, 0  ;;  %v510_v30 = vadd.s32 144, %v3629_v13  ;;  %v4755_v3 = vsel %vm5749_vm0, %v1332_v60, %v1333_v32  ;;  %v1606_v60 = vsel %vm4652_vm15, %v4625_v62, 0  ;;  %vm1461_vm0 = vmpackc.low %vm4745_vm12, %vm4745_vm12 }
  0xad   : > { %1919 = vrot.lane.b32.xlu0 %v4509_v20, %s3567_s17  ;;  %1742 = vrot.lane.b32.xlu1 %v1575_v18, %s3568_s30  ;;  %v1037_v18 = vshrl.u32 %v4683_v38, 16  ;;  %v1048_v16 = vshll.u32 %v4712_v52, 16  ;;  %vm4757_vm9 = vcmp.ne.s16.totalorder %v3149_v50, 0  ;;  %vm5755_vm13 = vsmask.f32 256 }
  0xae   : > { %v654_v50 = vand.u32 15, %v510_v30  ;;  %v1491_v62 = vsel %vm1459_vm2, 65537, %v5670_v26  ;;  %v1045_v6 = vshrl.u32 %v4712_v52, 16  ;;  %vm5756_vm12 = vsmask.f32 7424 }
  0xaf   : > { %v4700_v27 = vpop.permute.xlu0 %1909  ;;  %v4702_v15 = vpop.permute.xlu1 %1686  ;;  %v4725_v12 = vrot.slane %v1037_v18, 7  ;;  %v1336_v41 = vrot.slane %v1048_v16, 1  ;;  %v1493_v40 = vsel %vm1461_vm0, 65537, %v5670_v26  ;;  %v3150_v30 = vcombine.low %v3698_v42, %v1491_v62 }
  0xb0   : > { %vm4810_vm2 = vcmp.gt.s32.totalorder %v654_v50, 0  ;;  %v4814_v7 = vrot.slane %v1045_v6, 7 }
  0xb1   : > { %1840 = vrot.lane.b32.xlu0 %v1625_v55, %s3564_s25  ;;  %1790 = vrot.lane.b32.xlu1 %v1605_v31, %s3567_s17  ;;  %v640_v31 = vand.u32 15, %v508_v37  ;;  %v1042_v19 = vor.u32 %v1040_v44, %v4725_v12  ;;  %v1335_v37 = vor.u32 %v1333_v32, %v1037_v18  ;;  %v1626_v32 = vsel %vm4757_vm9, %v4755_v3, 0  ;;  %vm1190_vm0 = vmpackc.low %vm4810_vm2, %vm4810_vm2 }
  0xb2   : > { %v5588_v18 = vshll.u32 %v4375_v61, 16  ;;  %v1338_v0 = vor.u32 %v1336_v41, %v1045_v6 }
  0xb3   : > { %v4720_v28 = vpop.permute.xlu0 %1911  ;;  %v4722_v1 = vpop.permute.xlu1 %1708  ;;  %vm4777_vm14 = vcmp.gt.s32.totalorder %v640_v31, 0  ;;  %v4788_v24 = vsel %vm5755_vm13, %v4650_v56, %v1042_v19  ;;  %v4793_v31 = vsel %vm5756_vm12, %v1335_v37, %v1336_v41  ;;  %v3151_v56 = vcombine.low %v3698_v42, %v1493_v40 }
  0xb4   : > { %vm1188_vm15 = vmpackc.low %vm4777_vm14, %vm4777_vm14  ;;  %v1644_v19 = vsel %vm4727_vm7, %v4788_v24, 0  ;;  %v1339_v37 = vrot.slane %v5588_v18, 1  ;;  %vm5589_vm14 = vcmask 261120   ;;  %vm5592_vm13 = vcmask 523264  }
  0xb5   : > { %1888 = vrot.lane.b32.xlu0 %v1643_v46, %s3568_s30  ;;  %1696 = vrot.lane.b32.xlu1 %v4349_v2, %s3564_s25  ;;  %v5750_v2 = vmov 0  ;;  %v1218_v45 = vsel %vm1188_vm15, 65537, %v5670_v26  ;;  %v1577_v40 = vsel %vm4757_vm9, %v4676_v10, 0  ;;  %vm4831_vm12 = vcmp.ne.s16.totalorder %v3150_v30, 0 }
  0xb6   : > { %v5751_v2 = vsel %vm4757_vm9, 4294967295, %v5750_v2  ;;  %v1341_v62 = vor.u32 %v1339_v37, %v5759_v51  ;;  %v1050_v41 = vor.u32 %v1048_v16, %v4814_v7  ;;  %v3134_v50 = vcombine.low %v1218_v45, %v3698_v42 }
  0xb7   : > { %v4750_v9 = vpop.permute.xlu0 %1688  ;;  %v4752_v46 = vpop.permute.xlu1 %1933  ;;  %5752 = vst [vmem:[#allocation36_spill] sm:$0xff] %v5751_v2  ;;  %vm4840_vm2 = vcmp.ne.s16.totalorder %v3151_v56, 0  ;;  %v1220_v30 = vsel %vm1190_vm0, 65537, %v5670_v26  ;;  %vm5766_vm9 = vcmask 261120   ;;  %v1607_v56 = vsel %vm4727_vm7, %v4706_v29, 0 }
  0xb8   : > { %vm5768_vm0 = vmmov %vm5766_vm9 }
  0xb9   : > { %1921 = vrot.lane.b32.xlu0 %v4610_v63, %s3567_s17  ;;  %1744 = vrot.lane.b32.xlu1 %v1576_v35, %s3568_s30 }
  0xbb   : > { %v4782_v11 = vpop.permute.xlu0 %1913  ;;  %v4784_v35 = vpop.permute.xlu1 %1710 }
  0xbd   : > { %1842 = vrot.lane.b32.xlu0 %v1626_v32, %s3564_s25  ;;  %1792 = vrot.lane.b32.xlu1 %v1606_v60, %s3567_s17 }
  0xbf   : > { %v1733_v60 = vpop.permute.xlu1 %1732  ;;  %v1829_v44 = vpop.permute.xlu0 %1828 }
  0xc0   : > { %v2073_v18 = vsel %vm5589_vm14, %v3835_v59, %v1829_v44  ;;  %vm5762_vm14 = vsmask.f32 7424 }
  0xc1   : > { %1890 = vrot.lane.b32.xlu0 %v1644_v19, %s3568_s30  ;;  %1698 = vrot.lane.b32.xlu1 %v4509_v20, %s3564_s25  ;;  %v4838_v19 = vsel %vm5762_vm14, %v1338_v0, %v1339_v37  ;;  %vm5765_vm15 = vmmov %vm5762_vm14  ;;  %vm5767_vm14 = vcmask 785408   ;;  %v513_v37 = vadd.s32 168, %v3629_v13 }
  0xc2   : > { %v4848_v2 = vsel %vm5765_vm15, %v1341_v62, %v4080_v21  ;;  %v1661_v16 = vsel %vm4831_vm12, %v4838_v19, 0  ;;  %vm4877_vm15 = vcmp.ne.s16.totalorder %v3134_v50, 0  ;;  %v512_v50 = vadd.s32 160, %v3629_v13 }
  0xc3   : > { %v1831_v59 = vpop.permute.xlu0 %1830  ;;  %v1877_v6 = vpop.permute.xlu1 %1876  ;;  %v1662_v21 = vsel %vm4840_vm2, %v4848_v2, 0 }
  0xc4   : > { %v2105_v44 = vsel %vm5592_vm13, %v2073_v18, %v1877_v6  ;;  %v2075_v45 = vsel %vm5766_vm9, %v3833_v58, %v1831_v59  ;;  %v1944_v18 = vsel %vm5768_vm0, 0, %v4663_v8  ;;  %v1627_v58 = vsel %vm4831_vm12, %v4793_v31, 0  ;;  %vm5772_vm0 = vmmov %vm5767_vm14 }
  0xc5   : > { %1923 = vrot.lane.b32.xlu0 %v4683_v38, %s3567_s17  ;;  %1746 = vrot.lane.b32.xlu1 %v1577_v40, %s3568_s30  ;;  %v2137_v0 = vsel %vm5767_vm14, %v2105_v44, %v4700_v27  ;;  %v1992_v27 = vsel %vm5592_vm13, %v1944_v18, %v1733_v60  ;;  %vm5769_vm9 = vsmask.f32 256  ;;  %v3135_v6 = vcombine.low %v1220_v30, %v3698_v42 }
  0xc6   : > { %2407 = vmatprep.mubr.bf16.mxu0 %v2137_v0  ;;  %v4875_v59 = vsel %vm5769_vm9, %v4725_v12, %v1050_v41  ;;  %v675_v41 = vand.u32 15, %v513_v37 }
  0xc7   : > { %v1879_v62 = vpop.permute.xlu0 %1878  ;;  %v1781_v40 = vpop.permute.xlu1 %1780  ;;  %v1645_v12 = vsel %vm4877_vm15, %v4875_v59, 0  ;;  %vm4892_vm9 = vcmp.ne.s16.totalorder %v3135_v6, 0 }
  0xc8   : > { %v2107_v44 = vsel %vm5592_vm13, %v2075_v45, %v1879_v62  ;;  %v2025_v0 = vsel %vm5767_vm14, %v1992_v27, %v1781_v40  ;;  %vm5775_vm14 = vcmask 261120   ;;  %v1578_v27 = vsel %vm4831_vm12, %v4755_v3, 0 }
  0xc9   : > { %1844 = vrot.lane.b32.xlu0 %v1627_v58, %s3564_s25  ;;  %1794 = vrot.lane.b32.xlu1 %v1607_v56, %s3567_s17  ;;  %v2140_v60 = vsel %vm5772_vm0, %v2107_v44, %v4720_v28  ;;  %v1302_v58 = vsel %vm4892_vm9, %v4788_v24, 0  ;;  %v5776_v56 = vsel %vm3874_vm3, %v3966_v54, 0  ;;  %vm5777_vm0 = vmmov %vm5775_vm14  ;;  %vm4913_vm13 = vcmp.lt.s32.totalorder %v675_v41, 15 }
  0xca   : > { %2408 = vmatmul.mubr.bf16.vlgmr.msra.gmra.mrb[0].mxu0 %v2025_v0  ;;  %v1947_v37 = vsel %vm5777_vm0, %v5776_v56, %v4702_v15  ;;  %v668_v40 = vand.u32 15, %v512_v50  ;;  %vm5783_vm0 = vcmask 785408   ;;  %v1608_v41 = vsel %vm4877_vm15, %v4788_v24, 0 }
  0xcb   : > { %2415 = vmatprep.mubr.bf16.mxu0 %v2140_v60  ;;  %v1853_v30 = vpop.permute.xlu0 %1852  ;;  %v1735_v45 = vpop.permute.xlu1 %1734  ;;  %v1058_v60 = vor.u32 %v5781_v14, %v4409_v22  ;;  %vm5784_vm12 = vmmov %vm5783_vm0  ;;  %v1628_v22 = vsel %vm4840_vm2, %v4838_v19, 0 }
  0xcc   : > { %v2097_v28 = vsel %vm5775_vm14, %v3951_v48, %v1853_v30  ;;  %vm5780_vm14 = vcmask 523264  }
  0xcd   : > { %1892 = vrot.lane.b32.xlu0 %v1645_v12, %s3568_s30  ;;  %1700 = vrot.lane.b32.xlu1 %v4610_v63, %s3564_s25  ;;  %v1994_v6 = vsel %vm5780_vm14, %v1947_v37, %v1735_v45  ;;  %vm5782_vm3 = vmmov %vm5780_vm14 }
  0xce   : > { %vm1463_vm14 = vmpackc.low %vm4913_vm13, %vm4913_vm13  ;;  %vm5787_vm13 = vsmask.f32 256 }
  0xcf   : > { %v1901_v44 = vpop.permute.xlu0 %1900  ;;  %v1783_v0 = vpop.permute.xlu1 %1782  ;;  %v1495_v56 = vsel %vm1463_vm14, 65537, %v5670_v26  ;;  %vm5791_vm14 = vcmask 523264  }
  0xd0   : > { %v2129_v54 = vsel %vm5782_vm3, %v2097_v28, %v1901_v44  ;;  %v2028_v15 = vsel %vm5783_vm0, %v1994_v6, %v1783_v0  ;;  %vm4937_vm3 = vcmp.gt.s32.totalorder %v668_v40, 0  ;;  %v4944_v28 = vsel %vm5787_vm13, %v4814_v7, %v1058_v60 }
  0xd1   : > { %1925 = vrot.lane.b32.xlu0 %v4712_v52, %s3567_s17  ;;  %1748 = vrot.lane.b32.xlu1 %v1578_v27, %s3568_s30  ;;  %v2173_v12 = vsel %vm5784_vm12, %v2129_v54, %v4752_v46  ;;  %v515_v46 = vadd.s32 184, %v3629_v13  ;;  %vm5788_vm12 = vcmask 261120   ;;  %vm1192_vm0 = vmpackc.low %vm4937_vm3, %vm4937_vm3  ;;  %v5789_v27 = vsel %vm4094_vm8, %v4431_v49, 0 }
  0xd2   : > { %2416 = vmatmul.mubr.bf16.gmra.mrb[4].mxu0 %v2028_v15  ;;  %2503 = vmatprep.mubr.bf16.mxu1 %v2173_v12  ;;  %vm5790_vm13 = vmmov %vm5788_vm12  ;;  %v1646_v62 = vsel %vm4892_vm9, %v4944_v28, 0  ;;  %v514_v40 = vadd.s32 176, %v3629_v13  ;;  %v3152_v14 = vcombine.low %v3698_v42, %v1495_v56  ;;  %v1222_v54 = vsel %vm1192_vm0, 65537, %v5670_v26 }
  0xd3   : > { %v1833_v30 = vpop.permute.xlu0 %1832  ;;  %v1757_v45 = vpop.permute.xlu1 %1756  ;;  %v1980_v7 = vsel %vm5790_vm13, %v5789_v27, %v4722_v1  ;;  %vm5792_vm3 = vmmov %vm5791_vm14  ;;  %v3552_v1 = vld [vmem:[%s5529_s4 + $0x88] sm:$0xff]   ;;  %v1579_v15 = vsel %vm4840_vm2, %v4793_v31, 0  ;;  %v1609_v56 = vsel %vm4892_vm9, %v4875_v59, 0 }
  0xd4   : > { %v2077_v37 = vsel %vm5788_vm12, %v3842_v4, %v1833_v30  ;;  %v689_v4 = vand.u32 15, %v515_v46  ;;  %v2016_v6 = vsel %vm5791_vm14, %v1980_v7, %v1757_v45  ;;  %vm5793_vm12 = vcmask 785408  }
  0xd5   : > { %1846 = vrot.lane.b32.xlu0 %v1628_v22, %s3564_s25  ;;  %1796 = vrot.lane.b32.xlu1 %v1608_v41, %s3567_s17  ;;  %vm5794_vm8 = vmmov %vm5793_vm12  ;;  %v682_v22 = vand.u32 15, %v514_v40  ;;  %vm4984_vm0 = vcmp.ne.s16.totalorder %v3152_v14, 0  ;;  %v3136_v30 = vcombine.low %v1222_v54, %v3698_v42 }
  0xd6   : > { %vm4980_vm13 = vcmp.lt.s32.totalorder %v689_v4, 15  ;;  %v1663_v51 = vsel %vm4984_vm0, %v4143_v39, 0 }
  0xd7   : > { %v1881_v44 = vpop.permute.xlu0 %1880  ;;  %v1805_v0 = vpop.permute.xlu1 %1804  ;;  %vm1465_vm14 = vmpackc.low %vm4980_vm13, %vm4980_vm13  ;;  %vm5013_vm13 = vcmp.ne.s16.totalorder %v3136_v30, 0 }
  0xd8   : > { %v2109_v60 = vsel %vm5792_vm3, %v2077_v37, %v1881_v44  ;;  %v2061_v25 = vsel %vm5793_vm12, %v2016_v6, %v1805_v0  ;;  %vm5800_vm3 = vcmask 261120   ;;  %vm5008_vm12 = vcmp.gt.s32.totalorder %v682_v22, 0 }
  0xd9   : > { %1894 = vrot.lane.b32.xlu0 %v1646_v62, %s3568_s30  ;;  %1702 = vrot.lane.b32.xlu1 %v4683_v38, %s3564_s25  ;;  %v2143_v13 = vsel %vm5794_vm8, %v2109_v60, %v4782_v11  ;;  %v5799_v11 = vsel %vm4161_vm11, %v4002_v23, 0  ;;  %vm5803_vm8 = vcmask 523264   ;;  %vm5806_vm11 = vcmask 785408  }
  0xda   : > { %2504 = vmatmul.mubr.bf16.vlgmr.msra.gmra.mrb[0].mxu1 %v2061_v25  ;;  %2423 = vmatprep.mubr.bf16.mxu0 %v2143_v13  ;;  %v1950_v45 = vsel %vm5800_vm3, %v5799_v11, %v4750_v9  ;;  %v1497_v62 = vsel %vm1465_vm14, 65537, %v5670_v26  ;;  %vm1194_vm3 = vmpackc.low %vm5008_vm12, %vm5008_vm12  ;;  %v1647_v4 = vsel %vm5013_vm13, %v4431_v49, 0  ;;  %v1580_v60 = vsel %vm4984_vm0, %v4838_v19, 0 }
  0xdb   : > { %v1855_v41 = vpop.permute.xlu0 %1854  ;;  %v1737_v50 = vpop.permute.xlu1 %1736  ;;  %3470 = vmatpush3.bf16.msra.mxu1 %v4594_v34  ;;  %v1629_v34 = vsel %vm4984_vm0, %v4848_v2, 0  ;;  %v3153_v44 = vcombine.low %v3698_v42, %v1497_v62  ;;  %v1224_v14 = vsel %vm1194_vm3, 65537, %v5670_v26  ;;  %v1306_v25 = vsel %vm4226_vm5, %v4179_v53, 0 }
  0xdc   : > { %3471 = vmatprep.subr.bf16.mxu1 %v3552_v1  ;;  %v1996_v27 = vsel %vm5803_vm8, %v1950_v45, %v1737_v50  ;;  %vm5807_vm8 = vcmask 261120   ;;  %vm5808_vm14 = vcmask 523264   ;;  %v5813_v11 = vmov 0 }
  0xdd   : > { %1927 = vrot.lane.b32.xlu0 %v4375_v61, %s3567_s17  ;;  %1750 = vrot.lane.b32.xlu1 %v1579_v15, %s3568_s30  ;;  %v2099_v0 = vsel %vm5807_vm8, %v3898_v33, %v1855_v41  ;;  %vm5041_vm12 = vcmp.ne.s16.totalorder %v3153_v44, 0  ;;  %v3137_v15 = vcombine.low %v1224_v14, %v3698_v42  ;;  %vm5811_vm3 = vmmov %vm5807_vm8  ;;  %v1610_v41 = vsel %vm5013_vm13, %v4944_v28, 0  ;;  %v5822_v14 = vld [vmem:[#allocation9_spill] sm:$0xff] }
  0xde   : > { %v1983_v17 = vsel %vm5811_vm3, %v1306_v25, %v4784_v35  ;;  %v1630_v22 = vsel %vm5041_vm12, %v4143_v39, 0  ;;  %vm5812_vm5 = vmmov %vm5808_vm14  ;;  %v5912_v39 = vld [vmem:[#allocation7_spill] sm:$0xff] }
  0xdf   : > { %v1903_v7 = vpop.permute.xlu0 %1902  ;;  %v1785_v57 = vpop.permute.xlu1 %1784  ;;  %3472 = vmatpush3.bf16.msra.mxu1 %v3552_v1  ;;  %vm5059_vm8 = vcmp.ne.s16.totalorder %v3137_v15, 0 }
  0xe0   : > { %v2031_v9 = vsel %vm5806_vm11, %v1996_v27, %v1785_v57  ;;  %v2131_v54 = vsel %vm5808_vm14, %v2099_v0, %v1903_v7  ;;  %v5814_v11 = vsel %vm5059_vm8, 4294967295, %v5813_v11  ;;  %vm5815_vm14 = vmmov %vm5806_vm11 }
  0xe1   : > { %1848 = vrot.lane.b32.xlu0 %v1629_v34, %s3564_s25  ;;  %1798 = vrot.lane.b32.xlu1 %v1609_v56, %s3567_s17  ;;  %v1648_v34 = vsel %vm5059_vm8, %v4179_v53, 0  ;;  %v1296_v56 = vsel %vm4304_vm1, %v4023_v36, 0  ;;  %v1581_v53 = vsel %vm5041_vm12, %v4848_v2, 0  ;;  %v5913_v2 = vld [vmem:[#allocation14_spill] sm:$0xff] }
  0xe2   : > { %2424 = vmatmul.mubr.bf16.gmra.mrb[8].mxu0 %v2031_v9 }
  0xe3   : > { %v1835_v40 = vpop.permute.xlu0 %1834  ;;  %v1759_v6 = vpop.permute.xlu1 %1758 }
  0xe4   : > { %v2018_v42 = vsel %vm5812_vm5, %v1983_v17, %v1759_v6 }
  0xe5   : > { %1896 = vrot.lane.b32.xlu0 %v1647_v4, %s3568_s30  ;;  %1704 = vrot.lane.b32.xlu1 %v4712_v52, %s3564_s25  ;;  %v1611_v4 = vsel %vm5059_vm8, %v4431_v49, 0 }
  0xe7   : > { %v1691_v1 = vpop.permute.xlu0 %1690  ;;  %v1936_v13 = vpop.permute.xlu1 %1935 }
  0xe8   : > { %v2176_v12 = vsel %vm5806_vm11, %v2131_v54, %v1936_v13  ;;  %vm5816_vm11 = vmmov %vm5811_vm3  ;;  %v5825_v54 = vld [vmem:[#allocation8_spill] sm:$0xff] }
  0xe9   : > { %1929 = vrot.lane.b32.xlu0 %v3844_v5, %s3567_s17  ;;  %1752 = vrot.lane.b32.xlu1 %v1580_v60, %s3568_s30  ;;  %v2079_v35 = vsel %vm5816_vm11, %v3949_v47, %v1835_v40  ;;  %vm5817_vm3 = vmmov %vm5812_vm5 }
  0xea   : > { %2511 = vmatprep.mubr.bf16.mxu1 %v2176_v12  ;;  %vm5818_vm5 = vmmov %vm5815_vm14 }
  0xeb   : > { %v1883_v50 = vpop.permute.xlu0 %1882  ;;  %v1807_v30 = vpop.permute.xlu1 %1806  ;;  %vm5821_vm1 = vmmov %vm5818_vm5 }
  0xec   : > { %v2064_v45 = vsel %vm5815_vm14, %v2018_v42, %v1807_v30  ;;  %v2111_v37 = vsel %vm5817_vm3, %v2079_v35, %v1883_v50  ;;  %vm5819_vm14 = vmmov %vm5816_vm11  ;;  %v5831_v50 = vld [vmem:[#allocation12_spill] sm:$0xff] }
  0xed   : > { %1850 = vrot.lane.b32.xlu0 %v1630_v22, %s3564_s25  ;;  %1800 = vrot.lane.b32.xlu1 %v1610_v41, %s3567_s17  ;;  %v1953_v47 = vsel %vm5819_vm14, %v1296_v56, %v1691_v1  ;;  %vm5820_vm11 = vmmov %vm5817_vm3  ;;  %v1307_v1 = vsel %vm4383_vm10, %v5825_v54, 0  ;;  %v5871_v54 = vld [vmem:[#allocation16_spill] sm:$0xff] }
  0xee   : > { %2512 = vmatmul.mubr.bf16.gmra.mrb[4].mxu1 %v2064_v45  ;;  %vm5823_vm3 = vmmov %vm5819_vm14  ;;  %v5832_v45 = vld [vmem:[#allocation11_spill] sm:$0xff] }
  0xef   : > { %v1916_v27 = vpop.permute.xlu0 %1915  ;;  %v1739_v7 = vpop.permute.xlu1 %1738  ;;  %vm5827_vm14 = vmmov %vm5821_vm1 }
  0xf0   : > { %v2146_v57 = vsel %vm5818_vm5, %v2111_v37, %v1916_v27  ;;  %v1998_v36 = vsel %vm5820_vm11, %v1953_v47, %v1739_v7  ;;  %vm5824_vm5 = vmmov %vm5820_vm11 }
  0xf1   : > { %1898 = vrot.lane.b32.xlu0 %v1648_v34, %s3568_s30  ;;  %1706 = vrot.lane.b32.xlu1 %v4375_v61, %s3564_s25  ;;  %vm5828_vm11 = vmmov %vm5823_vm3  ;;  %v1297_v34 = vsel %vm4479_vm4, %v5832_v45, 0 }
  0xf2   : > { %2431 = vmatprep.mubr.bf16.mxu0 %v2146_v57  ;;  %vm5830_vm8 = vmmov %vm5827_vm14 }
  0xf3   : > { %v1857_v43 = vpop.permute.xlu0 %1856  ;;  %v1787_v9 = vpop.permute.xlu1 %1786  ;;  %vm5840_vm4 = vmmov %vm5823_vm3 }
  0xf4   : > { %v2034_v62 = vsel %vm5821_vm1, %v1998_v36, %v1787_v9  ;;  %v2101_v60 = vsel %vm5823_vm3, %v5822_v14, %v1857_v43  ;;  %vm5829_vm1 = vmmov %vm5824_vm5 }
  0xf5   : > { %1931 = vrot.lane.b32.xlu0 %v3951_v48, %s3567_s17  ;;  %1754 = vrot.lane.b32.xlu1 %v1581_v53, %s3568_s30  ;;  %vm5834_vm10 = vmmov %vm5829_vm1  ;;  %v5843_v48 = vld [vmem:[#allocation15_spill] sm:$0xff] }
  0xf6   : > { %2432 = vmatmul.mubr.bf16.gmra.mrb[12].mxu0 %v2034_v62 }
  0xf7   : > { %v1905_v40 = vpop.permute.xlu0 %1904  ;;  %v1713_v6 = vpop.permute.xlu1 %1712 }
  0xf8   : > { %v2133_v25 = vsel %vm5824_vm5, %v2101_v60, %v1905_v40  ;;  %v1986_v49 = vsel %vm5828_vm11, %v1307_v1, %v1713_v6  ;;  %vm5835_vm5 = vmmov %vm5830_vm8  ;;  %v5839_v6 = vld [vmem:[#allocation18_spill] sm:$0xff]  ;;  %v5844_v1 = vsel %vm4545_vm6, %v5843_v48, 0 }
  0xf9   : > { %1802 = vrot.lane.b32.xlu1 %v1611_v4, %s3567_s17  ;;  %vm5837_vm11 = vmmov %vm5829_vm1 }
  0xfb   : > { %v1837_v44 = vpop.permute.xlu0 %1836  ;;  %v1761_v0 = vpop.permute.xlu1 %1760 }
  0xfc   : > { %v2020_v17 = vsel %vm5829_vm1, %v1986_v49, %v1761_v0  ;;  %v2081_v30 = vsel %vm5823_vm3, %v5831_v50, %v1837_v44  ;;  %v5851_v50 = vld [vmem:[#allocation20_spill] sm:$0xff] }
  0xff   : > { %v1693_v13 = vpop.permute.xlu0 %1692  ;;  %v1938_v15 = vpop.permute.xlu1 %1937 }
 0x100   : > { %v2179_v12 = vsel %vm5827_vm14, %v2133_v25, %v1938_v15  ;;  %vm5836_vm14 = vmmov %vm5823_vm3 }
 0x101   : > { %2519 = vmatprep.mubr.bf16.mxu1 %v2179_v12  ;;  %v1956_v57 = vsel %vm5836_vm14, %v1297_v34, %v1693_v13  ;;  %vm5841_vm3 = vmmov %vm5835_vm5 }
 0x102   : > { %vm5853_vm6 = vmmov %vm5841_vm3 }
 0x103   : > { %v1885_v22 = vpop.permute.xlu0 %1884  ;;  %v1809_v41 = vpop.permute.xlu1 %1808 }
 0x104   : > { %v2067_v42 = vsel %vm5830_vm8, %v2020_v17, %v1809_v41  ;;  %v2113_v56 = vsel %vm5834_vm10, %v2081_v30, %v1885_v22  ;;  %vm5838_vm8 = vmmov %vm5835_vm5  ;;  %v5847_v17 = vld [vmem:[#allocation4_spill] sm:$0xff]  ;;  %v5848_v22 = vld [vmem:[#allocation2_spill] sm:$0xff] }
 0x105   : > { %2520 = vmatmul.mubr.bf16.gmra.mrb[8].mxu1 %v2067_v42  ;;  %vm5845_vm10 = vmmov %vm5840_vm4  ;;  %vm5849_vm14 = vnez %v5848_v22 }
 0x106   : > { %v1653_v41 = vsel %vm5849_vm14, %v5847_v17, 0 }
 0x107   : > { %v1918_v37 = vpop.permute.xlu0 %1917  ;;  %v1741_v27 = vpop.permute.xlu1 %1740 }
 0x108   : > { %v2149_v7 = vsel %vm5835_vm5, %v2113_v56, %v1918_v37  ;;  %v2000_v47 = vsel %vm5837_vm11, %v1956_v57, %v1741_v27  ;;  %vm5846_vm5 = vmmov %vm5829_vm1  ;;  %v5854_v37 = vld [vmem:[#allocation30_spill] sm:$0xff]  ;;  %v5856_v27 = vld [vmem:[#allocation19_spill] sm:$0xff] }
 0x109   : > { %2439 = vmatprep.mubr.bf16.mxu0 %v2149_v7  ;;  %vm5850_vm11 = vmmov %vm5841_vm3 }
 0x10b   : > { %v1859_v53 = vpop.permute.xlu0 %1858  ;;  %v1789_v36 = vpop.permute.xlu1 %1788 }
 0x10c   : > { %v2037_v43 = vsel %vm5838_vm8, %v2000_v47, %v1789_v36  ;;  %v2103_v44 = vsel %vm5840_vm4, %v5839_v6, %v1859_v53  ;;  %vm5852_vm8 = vmmov %vm5840_vm4  ;;  %v5866_v6 = vld [vmem:[#allocation5_spill] sm:$0xff] }
 0x10d   : > { %2440 = vmatmul.mubr.bf16.gmra.mrb[16].mxu0 %v2037_v43  ;;  %v5860_v43 = vld [vmem:[#allocation17_spill] sm:$0xff] }
 0x10f   : > { %v1907_v9 = vpop.permute.xlu0 %1906  ;;  %v1715_v62 = vpop.permute.xlu1 %1714 }
 0x110   : > { %v2135_v0 = vsel %vm5829_vm1, %v2103_v44, %v1907_v9  ;;  %v1989_v13 = vsel %vm5845_vm10, %v5844_v1, %v1715_v62  ;;  %vm5858_vm10 = vmmov %vm5840_vm4  ;;  %v5861_v9 = vld [vmem:[#allocation10_spill] sm:$0xff] }
 0x111   : > { %vm5862_vm14 = vnez %v5861_v9 }
 0x112   : > { %v1655_v62 = vsel %vm5862_vm14, %v5860_v43, 0 }
 0x113   : > { %v1839_v4 = vpop.permute.xlu0 %1838  ;;  %v1763_v40 = vpop.permute.xlu1 %1762 }
 0x114   : > { %v2022_v15 = vsel %vm5846_vm5, %v1989_v13, %v1763_v40  ;;  %v2083_v30 = vsel %vm5852_vm8, %v5851_v50, %v1839_v4  ;;  %vm5859_vm5 = vmmov %vm5829_vm1  ;;  %v5864_v40 = vld [vmem:[#allocation3_spill] sm:$0xff] }
 0x115   : > { %vm5865_vm8 = vnez %v5864_v40 }
 0x116   : > { %v5867_v44 = vsel %vm5865_vm8, %v5866_v6, 0 }
 0x117   : > { %v1695_v14 = vpop.permute.xlu0 %1694  ;;  %v1940_v60 = vpop.permute.xlu1 %1939 }
 0x118   : > { %v2182_v25 = vsel %vm5841_vm3, %v2135_v0, %v1940_v60  ;;  %vm5855_vm3 = vnez %v5854_v37 }
 0x119   : > { %2527 = vmatprep.mubr.bf16.mxu1 %v2182_v25  ;;  %v5857_v7 = vsel %vm5855_vm3, %v5856_v27, 0  ;;  %v5870_v25 = vld [vmem:[#allocation25_spill] sm:$0xff]  ;;  %vm5872_vm3 = vnez %v5871_v54 }
 0x11a   : > { %v1959_v57 = vsel %vm5858_vm10, %v5857_v7, %v1695_v14  ;;  %v1656_v48 = vsel %vm5872_vm3, %v5870_v25, 0  ;;  %vm5873_vm10 = vmmov %vm5859_vm5 }
 0x11b   : > { %v1887_v12 = vpop.permute.xlu0 %1886  ;;  %v1811_v49 = vpop.permute.xlu1 %1810 }
 0x11c   : > { %v2070_v42 = vsel %vm5850_vm11, %v2022_v15, %v1811_v49  ;;  %v2115_v45 = vsel %vm5829_vm1, %v2083_v30, %v1887_v12  ;;  %vm5863_vm11 = vmmov %vm5853_vm6  ;;  %v5874_v12 = vld [vmem:[#allocation32_spill] sm:$0xff] }
 0x11d   : > { %2528 = vmatmul.mubr.bf16.gmra.mrb[12].mxu1 %v2070_v42  ;;  %vm5868_vm1 = vmmov %vm5840_vm4  ;;  %v5875_v49 = vld [vmem:[#allocation24_spill] sm:$0xff] }
 0x11e   : > { %3473 = vmatprep.mubr.msk.bf16.mxu1 %vm5840_vm4, %v1653_v41  ;;  %vm5877_vm14 = vmmov %vm5863_vm11  ;;  %v5879_v41 = vld [vmem:[#allocation34_spill] sm:$0xff] }
 0x11f   : > { %v1920_v35 = vpop.permute.xlu0 %1919  ;;  %v1743_v34 = vpop.permute.xlu1 %1742  ;;  %vm5880_vm8 = vnez %v5879_v41  ;;  %vm5885_vm3 = vmmov %vm5877_vm14 }
 0x120   : > { %v2152_v56 = vsel %vm5853_vm6, %v2115_v45, %v1920_v35  ;;  %v2002_v47 = vsel %vm5859_vm5, %v1959_v57, %v1743_v34  ;;  %vm5869_vm6 = vmmov %vm5868_vm1  ;;  %vm5876_vm5 = vnez %v5875_v49  ;;  %v5888_v57 = vld [vmem:[#allocation35_spill] sm:$0xff] }
 0x121   : > { %2447 = vmatprep.mubr.bf16.mxu0 %v2152_v56  ;;  %v1657_v17 = vsel %vm5876_vm5, %v5874_v12, 0  ;;  %v5886_v56 = vld [vmem:[#allocation31_spill] sm:$0xff]  ;;  %vm5889_vm5 = vnez %v5888_v57  ;;  %v5914_v12 = vld [vmem:[#allocation6_spill] sm:$0xff]  ;;  %v1303_v57 = vsel %vm5013_vm13, %v4875_v59, 0 }
 0x122   : > { %vm5915_vm2 = vnez %v5914_v12 }
 0x123   : > { %v1841_v53 = vpop.permute.xlu0 %1840  ;;  %v1791_v36 = vpop.permute.xlu1 %1790 }
 0x124   : > { %v2040_v4 = vsel %vm5863_vm11, %v2002_v47, %v1791_v36  ;;  %v2085_v60 = vsel %vm5869_vm6, %v4509_v20, %v1841_v53  ;;  %vm5878_vm11 = vmmov %vm5868_vm1  ;;  %v5881_v20 = vld [vmem:[#allocation26_spill] sm:$0xff]  ;;  %v1659_v47 = vsel %vm5889_vm5, %v4755_v3, 0 }
 0x125   : > { %2448 = vmatmul.mubr.bf16.gmra.mrb[20].mxu0 %v2040_v4  ;;  %3474 = vmatmul.mubr.msk.bf16.vlgmr.msra.gmra.mrb[16].mxu1 %vm5840_vm4, %v5867_v44  ;;  %v5882_v42 = vsel %vm5880_vm8, %v5881_v20, 0  ;;  %vm5883_vm4 = vmmov %vm5868_vm1 }
 0x126   : > { %3477 = vmatprep.mubr.msk.bf16.mxu1 %vm5868_vm1, %v1655_v62  ;;  %vm5884_vm6 = vmmov %vm5873_vm10 }
 0x127   : > { %v1889_v0 = vpop.permute.xlu0 %1888  ;;  %v1697_v14 = vpop.permute.xlu1 %1696  ;;  %vm5892_vm8 = vmmov %vm5868_vm1 }
 0x128   : > { %v2117_v1 = vsel %vm5873_vm10, %v2085_v60, %v1889_v0  ;;  %v1962_v50 = vsel %vm5883_vm4, %v5882_v42, %v1697_v14  ;;  %vm5887_vm10 = vnez %v5886_v56  ;;  %vm5893_vm4 = vmmov %vm5884_vm6  ;;  %v5900_v0 = vld [vmem:[#allocation36_spill] sm:$0xff]  ;;  %v5922_v42 = vld [vmem:[#allocation21_spill] sm:$0xff] }
 0x129   : > { %v1658_v37 = vsel %vm5887_vm10, %v4676_v10, 0  ;;  %v5895_v10 = vld [vmem:[#allocation33_spill] sm:$0xff]  ;;  %vm5901_vm5 = vnez %v5900_v0  ;;  %v5927_v56 = vld [vmem:[#allocation22_spill] sm:$0xff] }
 0x12a   : > { %v5896_v4 = vsel %vm4727_vm7, %v5895_v10, 0  ;;  %v5902_v14 = vsel %vm5901_vm5, %v4793_v31, 0 }
 0x12b   : > { %v1922_v13 = vpop.permute.xlu0 %1921  ;;  %v1745_v15 = vpop.permute.xlu1 %1744 }
 0x12c   : > { %v2155_v22 = vsel %vm5877_vm14, %v2117_v1, %v1922_v13  ;;  %v2004_v30 = vsel %vm5884_vm6, %v1962_v50, %v1745_v15  ;;  %vm5890_vm14 = vmmov %vm5868_vm1  ;;  %v1664_v13 = vsel %vm5041_vm12, %v5912_v39, 0  ;;  %v5923_v50 = vld [vmem:[#allocation13_spill] sm:$0xff] }
 0x12d   : > { %2455 = vmatprep.mubr.bf16.mxu0 %v2155_v22  ;;  %3478 = vmatmul.mubr.msk.bf16.gmra.mrb[20].mxu1 %vm5878_vm11, %v1656_v48  ;;  %vm5891_vm11 = vmmov %vm5868_vm1  ;;  %v1301_v48 = vsel %vm4877_vm15, %v4706_v29, 0 }
 0x12e   : > { %3481 = vmatprep.mubr.msk.bf16.mxu1 %vm5868_vm1, %v1657_v17  ;;  %vm5894_vm1 = vmmov %vm5885_vm3 }
 0x12f   : > { %v1843_v45 = vpop.permute.xlu0 %1842  ;;  %v1793_v35 = vpop.permute.xlu1 %1792  ;;  %vm5897_vm6 = vmmov %vm5892_vm8 }
 0x130   : > { %v2043_v34 = vsel %vm5885_vm3, %v2004_v30, %v1793_v35  ;;  %v2087_v53 = vsel %vm5890_vm14, %v4610_v63, %v1843_v45  ;;  %vm5898_vm3 = vmmov %vm5893_vm4 }
 0x131   : > { %2456 = vmatmul.mubr.bf16.gmra.mrb[24].mxu0 %v2043_v34  ;;  %vm5899_vm10 = vmmov %vm5894_vm1  ;;  %v5926_v34 = vld [vmem:[#allocation28_spill] sm:$0xff] }
 0x132   : > { %vm5903_vm14 = vmmov %vm5897_vm6 }
 0x133   : > { %v1891_v27 = vpop.permute.xlu0 %1890  ;;  %v1699_v7 = vpop.permute.xlu1 %1698  ;;  %vm5905_vm7 = vmmov %vm5897_vm6 }
 0x134   : > { %v2119_v36 = vsel %vm5893_vm4, %v2087_v53, %v1891_v27  ;;  %v1965_v3 = vsel %vm5897_vm6, %v5896_v4, %v1699_v7  ;;  %vm5907_vm4 = vmmov %vm5898_vm3 }
 0x135   : > { %3482 = vmatmul.mubr.msk.bf16.gmra.mrb[24].mxu1 %vm5891_vm11, %v1658_v37  ;;  %vm5910_vm15 = vmmov %vm5907_vm4 }
 0x136   : > { %3485 = vmatprep.mubr.msk.bf16.mxu1 %vm5892_vm8, %v1659_v47  ;;  %vm5906_vm8 = vmmov %vm5897_vm6 }
 0x137   : > { %v1924_v43 = vpop.permute.xlu0 %1923  ;;  %v1747_v9 = vpop.permute.xlu1 %1746  ;;  %vm5911_vm5 = vmmov %vm5894_vm1 }
 0x138   : > { %v2158_v62 = vsel %vm5894_vm1, %v2119_v36, %v1924_v43  ;;  %v2006_v40 = vsel %vm5898_vm3, %v1965_v3, %v1747_v9  ;;  %vm5908_vm3 = vmmov %vm5897_vm6 }
 0x139   : > { %2463 = vmatprep.mubr.bf16.mxu0 %v2158_v62  ;;  %vm5916_vm0 = vmmov %vm5908_vm3 }
 0x13a   : > { %vm5918_vm11 = vmmov %vm5916_vm0 }
 0x13b   : > { %v1845_v63 = vpop.permute.xlu0 %1844  ;;  %v1795_v6 = vpop.permute.xlu1 %1794  ;;  %vm5921_vm12 = vmmov %vm5916_vm0 }
 0x13c   : > { %v2046_v44 = vsel %vm5899_vm10, %v2006_v40, %v1795_v6  ;;  %v2089_v25 = vsel %vm5906_vm8, %v4683_v38, %v1845_v63  ;;  %vm5909_vm10 = vmmov %vm5908_vm3 }
 0x13d   : > { %2464 = vmatmul.mubr.bf16.gmra.mrb[28].mxu0 %v2046_v44  ;;  %3486 = vmatmul.mubr.msk.bf16.gmra.mrb[28].mxu1 %vm5903_vm14, %v5902_v14  ;;  %vm5917_vm14 = vmmov %vm5916_vm0 }
 0x13e   : > { %3489 = vmatprep.mubr.msk.bf16.mxu1 %vm5905_vm7, %v1661_v16  ;;  %vm5919_vm7 = vmmov %vm5907_vm4 }
 0x13f   : > { %v1893_v55 = vpop.permute.xlu0 %1892  ;;  %v1701_v60 = vpop.permute.xlu1 %1700  ;;  %vm5920_vm8 = vmmov %vm5894_vm1 }
 0x140   : > { %v2121_v54 = vsel %vm5907_vm4, %v2089_v25, %v1893_v55  ;;  %v1968_v38 = vsel %vm5908_vm3, %v1301_v48, %v1701_v60  ;;  %vm5924_vm4 = vnez %v5923_v50  ;;  %vm5929_vm3 = vmmov %vm5911_vm5 }
 0x141   : > { %vm5931_vm9 = vmmov %vm5916_vm0 }
 0x142   : > { %vm5937_vm13 = vmmov %vm5916_vm0 }
 0x143   : > { %v1926_v31 = vpop.permute.xlu0 %1925  ;;  %v1749_v1 = vpop.permute.xlu1 %1748 }
 0x144   : > { %v2161_v19 = vsel %vm5894_vm1, %v2121_v54, %v1926_v31  ;;  %v2008_v29 = vsel %vm5910_vm15, %v1968_v38, %v1749_v1  ;;  %vm5925_vm1 = vmmov %vm5919_vm7 }
 0x145   : > { %2471 = vmatprep.mubr.bf16.mxu0 %v2161_v19  ;;  %3490 = vmatmul.mubr.msk.bf16.gmra.mrb[32].mxu1 %vm5897_vm6, %v1662_v21  ;;  %v1665_v21 = vsel %vm5915_vm2, %v5913_v2, 0  ;;  %vm5928_vm6 = vnez %v5927_v56  ;;  %vm5932_vm15 = vmmov %vm5916_vm0 }
 0x146   : > { %3493 = vmatprep.mubr.msk.bf16.mxu1 %vm5909_vm10, %v1663_v51  ;;  %v1667_v37 = vsel %vm5928_vm6, %v5926_v34, 0  ;;  %vm5930_vm10 = vmmov %vm5916_vm0 }
 0x147   : > { %v1847_v16 = vpop.permute.xlu0 %1846  ;;  %v1797_v8 = vpop.permute.xlu1 %1796  ;;  %vm5934_vm2 = vmmov %vm5929_vm3 }
 0x148   : > { %v2049_v46 = vsel %vm5911_vm5, %v2008_v29, %v1797_v8  ;;  %v2091_v49 = vsel %vm5916_vm0, %v4712_v52, %v1847_v16  ;;  %v1666_v52 = vsel %vm5924_vm4, %v5922_v42, 0  ;;  %vm5933_vm5 = vmmov %vm5925_vm1 }
 0x149   : > { %2472 = vmatmul.mubr.bf16.gmra.mrb[32].mxu0 %v2049_v46  ;;  %vm5941_vm4 = vmmov %vm5916_vm0 }
 0x14a   : > { %vm5942_vm6 = vmmov %vm5934_vm2 }
 0x14b   : > { %v1895_v32 = vpop.permute.xlu0 %1894  ;;  %v1703_v15 = vpop.permute.xlu1 %1702 }
 0x14c   : > { %v2123_v17 = vsel %vm5919_vm7, %v2091_v49, %v1895_v32  ;;  %v1971_v20 = vsel %vm5921_vm12, %v1302_v58, %v1703_v15  ;;  %vm5938_vm7 = vmmov %vm5925_vm1 }
 0x14d   : > { %3494 = vmatmul.mubr.msk.bf16.gmra.mrb[36].mxu1 %vm5917_vm14, %v1664_v13  ;;  %vm5935_vm14 = vmmov %vm5925_vm1 }
 0x14e   : > { %3497 = vmatprep.mubr.msk.bf16.mxu1 %vm5918_vm11, %v1665_v21  ;;  %vm5936_vm11 = vmmov %vm5934_vm2 }
 0x14f   : > { %v1928_v22 = vpop.permute.xlu0 %1927  ;;  %v1751_v41 = vpop.permute.xlu1 %1750  ;;  %vm5940_vm12 = vmmov %vm5934_vm2 }
 0x150   : > { %v2164_v33 = vsel %vm5920_vm8, %v2123_v17, %v1928_v22  ;;  %v2010_v30 = vsel %vm5925_vm1, %v1971_v20, %v1751_v41  ;;  %vm5939_vm8 = vnez %v5814_v11 }
 0x151   : > { %2479 = vmatprep.mubr.bf16.mxu0 %v2164_v33 }
 0x153   : > { %v1849_v45 = vpop.permute.xlu0 %1848  ;;  %v1799_v35 = vpop.permute.xlu1 %1798 }
 0x154   : > { %v2052_v27 = vsel %vm5929_vm3, %v2010_v30, %v1799_v35  ;;  %v2093_v58 = vsel %vm5932_vm15, %v4375_v61, %v1849_v45  ;;  %vm2825_vm3 = vcmask 257024   ;;  %vm5945_vm15 = vmmov %vm5916_vm0 }
 0x155   : > { %2480 = vmatmul.mubr.bf16.gmra.mrb[36].mxu0 %v2052_v27  ;;  %3498 = vmatmul.mubr.msk.bf16.gmra.mrb[40].mxu1 %vm5930_vm10, %v1666_v52  ;;  %vm5943_vm10 = vmmov %vm5916_vm0 }
 0x156   : > { %3501 = vmatprep.mubr.msk.bf16.mxu1 %vm5931_vm9, %v1667_v37  ;;  %vm5944_vm9 = vmmov %vm5916_vm0 }
 0x157   : > { %v1897_v24 = vpop.permute.xlu0 %1896  ;;  %v1705_v18 = vpop.permute.xlu1 %1704 }
 0x158   : > { %v2125_v7 = vsel %vm5933_vm5, %v2093_v58, %v1897_v24  ;;  %v1974_v43 = vsel %vm5916_vm0, %v1303_v57, %v1705_v18  ;;  %vm5946_vm5 = vmmov %vm5916_vm0 }
 0x15b   : > { %v1930_v47 = vpop.permute.xlu0 %1929  ;;  %v1753_v53 = vpop.permute.xlu1 %1752 }
 0x15c   : > { %v2167_v36 = vsel %vm5934_vm2, %v2125_v7, %v1930_v47  ;;  %v2012_v9 = vsel %vm5935_vm14, %v1974_v43, %v1753_v53  ;;  %vm5947_vm2 = vmmov %vm5916_vm0 }
 0x15d   : > { %2487 = vmatprep.mubr.bf16.mxu0 %v2167_v36  ;;  %3502 = vmatmul.mubr.bf16.gmra.mrb[44].mxu1 %v5670_v26  ;;  %v1304_v26 = vsel %vm5939_vm8, %v4944_v28, 0  ;;  %vm5948_vm14 = vmmov %vm5916_vm0 }
 0x15e   : > { %vm5952_vm8 = vmmov %vm5916_vm0 }
 0x15f   : > { %v1851_v62 = vpop.permute.xlu0 %1850  ;;  %v1801_v10 = vpop.permute.xlu1 %1800 }
 0x160   : > { %v2055_v61 = vsel %vm5936_vm11, %v2012_v9, %v1801_v10  ;;  %v2095_v59 = vsel %vm5937_vm13, %v3844_v5, %v1851_v62  ;;  %vm5949_vm11 = vmmov %vm5916_vm0 }
 0x161   : > { %2488 = vmatmul.mubr.bf16.gmra.mrb[40].mxu0 %v2055_v61  ;;  %vm5950_vm13 = vmmov %vm5916_vm0 }
 0x163   : > { %v1899_v4 = vpop.permute.xlu0 %1898  ;;  %v1707_v3 = vpop.permute.xlu1 %1706 }
 0x164   : > { %v2127_v23 = vsel %vm5938_vm7, %v2095_v59, %v1899_v4  ;;  %v1977_v44 = vsel %vm5941_vm4, %v1304_v26, %v1707_v3  ;;  %vm5951_vm7 = vmmov %vm5916_vm0 }
 0x165   : > { %vm5954_vm4 = vmmov %vm5916_vm0 }
 0x167   : > { %v1932_v40 = vpop.permute.xlu0 %1931  ;;  %v1755_v63 = vpop.permute.xlu1 %1754 }
 0x168   : > { %v2170_v6 = vsel %vm5940_vm12, %v2127_v23, %v1932_v40  ;;  %v2014_v0 = vsel %vm5925_vm1, %v1977_v44, %v1755_v63  ;;  %vm5953_vm12 = vmmov %vm5916_vm0 }
 0x169   : > { %2495 = vmatprep.mubr.bf16.mxu0 %v2170_v6  ;;  %vm5955_vm1 = vmmov %vm5916_vm0 }
 0x16b   : > { %v1803_v14 = vpop.permute.xlu1 %1802 }
 0x16c   : > { %v2058_v55 = vsel %vm5942_vm6, %v2014_v0, %v1803_v14  ;;  %vm5956_vm6 = vmmov %vm5916_vm0 }
 0x16d   : > { %2496 = vmatmul.mubr.bf16.gmra.mrb[44].mxu0 %v2058_v55 }
 0x19d   : > { %v3355_v5 = vpop.f32.mrb[0].mxu0 }
 0x19e   : > { %v3356_v60 = vpop.f32.mrb[1].mxu0 }
 0x19f   : > { %v3357_v25 = vadd.f32 %v3356_v60, %v3355_v5  ;;  %v3358_v54 = vpop.f32.mrb[2].mxu0 }
 0x1a0   : > { %v3359_v48 = vpop.f32.mrb[3].mxu0 }
 0x1a1   : > { %v5262_v11 = vadd.f32 %v3359_v48, %v3358_v54 }
 0x1a5   : > { %v3361_v28 = vpop.f32.mrb[4].mxu0 }
 0x1a6   : > { %v3362_v31 = vpop.f32.mrb[5].mxu0 }
 0x1a7   : > { %v3363_v1 = vadd.f32 %v3362_v31, %v3361_v28  ;;  %v3364_v51 = vpop.f32.mrb[6].mxu0 }
 0x1a8   : > { %v3365_v19 = vpop.f32.mrb[7].mxu0 }
 0x1a9   : > { %v3366_v38 = vadd.f32 %v3365_v19, %v3364_v51 }
 0x1ad   : > { %v3427_v29 = vpop.f32.mrb[0].mxu1 }
 0x1ae   : > { %v3428_v16 = vpop.f32.mrb[1].mxu1 }
 0x1af   : > { %v5264_v8 = vadd.f32 %v3428_v16, %v3427_v29  ;;  %v3430_v46 = vpop.f32.mrb[2].mxu1 }
 0x1b0   : > { %v3431_v39 = vpop.f32.mrb[3].mxu1 }
 0x1b1   : > { %v5266_v13 = vadd.f32 %v3431_v39, %v3430_v46 }
 0x1b5   : > { %v3367_v32 = vpop.f32.mrb[8].mxu0 }
 0x1b6   : > { %v3368_v15 = vpop.f32.mrb[9].mxu0 }
 0x1b7   : > { %v5268_v2 = vadd.f32 %v3368_v15, %v3367_v32  ;;  %v3370_v12 = vpop.f32.mrb[10].mxu0 }
 0x1b8   : > { %v3371_v21 = vpop.f32.mrb[11].mxu0 }
 0x1b9   : > { %v5270_v49 = vadd.f32 %v3371_v21, %v3370_v12 }
 0x1c1   : > { %v3433_v17 = vpop.f32.mrb[4].mxu1 }
 0x1c2   : > { %v3434_v22 = vpop.f32.mrb[5].mxu1 }
 0x1c3   : > { %v5272_v41 = vadd.f32 %v3434_v22, %v3433_v17  ;;  %v3436_v33 = vpop.f32.mrb[6].mxu1 }
 0x1c4   : > { %v3437_v20 = vpop.f32.mrb[7].mxu1 }
 0x1c5   : > { %v5274_v42 = vadd.f32 %v3437_v20, %v3436_v33 }
 0x1c9   : > { %v3373_v50 = vpop.f32.mrb[12].mxu0 }
 0x1ca   : > { %v3374_v52 = vpop.f32.mrb[13].mxu0 }
 0x1cb   : > { %v3375_v30 = vadd.f32 %v3374_v52, %v3373_v50  ;;  %v3376_v45 = vpop.f32.mrb[14].mxu0 }
 0x1cc   : > { %v3377_v35 = vpop.f32.mrb[15].mxu0 }
 0x1cd   : > { %v5276_v34 = vadd.f32 %v3377_v35, %v3376_v45 }
 0x1d8   : > { %v3439_v56 = vpop.f32.mrb[8].mxu1 }
 0x1d9   : > { %v3440_v37 = vpop.f32.mrb[9].mxu1 }
 0x1da   : > { %v5278_v27 = vadd.f32 %v3440_v37, %v3439_v56  ;;  %v3442_v24 = vpop.f32.mrb[10].mxu1 }
 0x1db   : > { %v3443_v18 = vpop.f32.mrb[11].mxu1 }
 0x1dc   : > { %v5280_v58 = vadd.f32 %v3443_v18, %v3442_v24 }
 0x1e0   : > { %v3379_v7 = vpop.f32.mrb[16].mxu0 }
 0x1e1   : > { %v3380_v57 = vpop.f32.mrb[17].mxu0 }
 0x1e2   : > { %v5282_v47 = vadd.f32 %v3380_v57, %v3379_v7  ;;  %v3382_v53 = vpop.f32.mrb[18].mxu0 }
 0x1e3   : > { %v3383_v36 = vpop.f32.mrb[19].mxu0 }
 0x1e4   : > { %v5284_v43 = vadd.f32 %v3383_v36, %v3382_v53 }
 0x1f0   : > { %v3445_v9 = vpop.f32.mrb[12].mxu1 }
 0x1f1   : > { %v3446_v62 = vpop.f32.mrb[13].mxu1 }
 0x1f2   : > { %v5286_v10 = vadd.f32 %v3446_v62, %v3445_v9  ;;  %v3448_v61 = vpop.f32.mrb[14].mxu1 }
 0x1f3   : > { %v3449_v4 = vpop.f32.mrb[15].mxu1 }
 0x1f4   : > { %v5288_v3 = vadd.f32 %v3449_v4, %v3448_v61 }
 0x1f8   : > { %v3385_v59 = vpop.f32.mrb[20].mxu0  ;;  %v3475_v23 = vpop.f32.mrb[16].mxu1 }
 0x1f9   : > { %v2579_v26 = vadd.f32 %v3475_v23, %v3363_v1  ;;  %v3386_v40 = vpop.f32.mrb[21].mxu0  ;;  %v2570_v63 = vpop.f32.mrb[17].mxu1 }
 0x1fa   : > { %v5297_v6 = vadd.f32 %v3386_v40, %v3385_v59  ;;  %v2571_v44 = vadd.f32 %v3357_v25, %v2570_v63  ;;  %v3388_v0 = vpop.f32.mrb[22].mxu0  ;;  %v3476_v14 = vpop.f32.mrb[18].mxu1 }
 0x1fb   : > { %v3230_v55 = vpack.c.bf16 %v2579_v26, %v2579_v26  ;;  %v2582_v5 = vadd.f32 %v3476_v14, %v3366_v38  ;;  %v3389_v60 = vpop.f32.mrb[23].mxu0  ;;  %v2573_v54 = vpop.f32.mrb[19].mxu1  ;;  %v2929_v19 = vmul.f32 %v2579_v26, %v2579_v26  ;;  %v2861_v39 = vsel %vm5945_vm15, %v2579_v26, 0.0  ;;  %vm5959_vm15 = vmmov %vm5916_vm0 }
 0x1fc   : > { %v3228_v48 = vpack.c.bf16 %v2571_v44, %v2571_v44  ;;  %v5299_v28 = vadd.f32 %v3389_v60, %v3388_v0  ;;  %v2927_v1 = vmul.f32 %v2571_v44, %v2571_v44  ;;  %v2574_v51 = vadd.f32 %v5262_v11, %v2573_v54 }
 0x1fd   : > { %2828 = vst.msk [vmem:[%s5295_s12 + $0x8] sm:$0xf] %vm2825_vm3, %v3230_v55  ;;  %v3231_v31 = vpack.c.bf16 %v2582_v5, %v2582_v5  ;;  %v2858_v25 = vsel %vm5943_vm10, %v2571_v44, 0.0  ;;  %v2930_v17 = vmul.f32 %v2582_v5, %v2582_v5  ;;  %v2962_v20 = vsel %vm5916_vm0, %v2929_v19, 0.0  ;;  %vm5957_vm10 = vmmov %vm5916_vm0 }
 0x1fe   : > { %2826 = vst.msk [vmem:[%s5295_s12] sm:$0xf] %vm2825_vm3, %v3228_v48  ;;  %v3229_v38 = vpack.c.bf16 %v2574_v51, %v2574_v51  ;;  %v2859_v29 = vsel %vm5944_vm9, %v2574_v51, 0.0  ;;  %v2928_v16 = vmul.f32 %v2574_v51, %v2574_v51  ;;  %v2959_v21 = vsel %vm5946_vm5, %v2927_v1, 0.0  ;;  %vm5958_vm9 = vmmov %vm5916_vm0 }
 0x1ff   : > { %2829 = vst.msk [vmem:[%s5295_s12 + $0xc] sm:$0xf] %vm2825_vm3, %v3231_v31  ;;  %v2860_v32 = vadd.f32 %v2859_v29, %v2858_v25  ;;  %v2964_v9 = vsel %vm5950_vm13, %v2930_v17, 0.0  ;;  %vm5960_vm5 = vmmov %vm5916_vm0 }
 0x200   : > { %v3479_v46 = vpop.f32.mrb[20].mxu1  ;;  %2827 = vst.msk [vmem:[%s5295_s12 + $0x4] sm:$0xf] %vm2825_vm3, %v3229_v38  ;;  %v2960_v11 = vsel %vm5947_vm2, %v2928_v16, 0.0  ;;  %vm5961_vm2 = vmmov %vm5916_vm0 }
 0x201   : > { %v2595_v15 = vadd.f32 %v3479_v46, %v3375_v30  ;;  %v2586_v12 = vpop.f32.mrb[21].mxu1  ;;  %v2862_v50 = vadd.f32 %v2861_v39, %v2860_v32  ;;  %v2961_v52 = vadd.f32 %v2960_v11, %v2959_v21  ;;  %v2863_v30 = vsel %vm5948_vm14, %v2582_v5, 0.0  ;;  %vm5962_vm14 = vmmov %vm5916_vm0 }
 0x202   : > { %v2587_v22 = vadd.f32 %v5268_v2, %v2586_v12  ;;  %v3480_v33 = vpop.f32.mrb[22].mxu1  ;;  %vm5964_vm13 = vmmov %vm5916_vm0 }
 0x203   : > { %v3234_v45 = vpack.c.bf16 %v2595_v15, %v2595_v15  ;;  %v2589_v35 = vpop.f32.mrb[23].mxu1  ;;  %v2963_v7 = vadd.f32 %v2962_v20, %v2961_v52  ;;  %v2864_v57 = vadd.f32 %v2863_v30, %v2862_v50  ;;  %v2598_v2 = vadd.f32 %v3480_v33, %v5276_v34 }
 0x204   : > { %v3232_v56 = vpack.c.bf16 %v2587_v22, %v2587_v22  ;;  %v2865_v37 = vsel %vm5949_vm11, %v2587_v22, 0.0  ;;  %v2931_v24 = vmul.f32 %v2587_v22, %v2587_v22  ;;  %v3391_v18 = vpop.f32.mrb[24].mxu0  ;;  %v2590_v53 = vadd.f32 %v5270_v49, %v2589_v35  ;;  %vm5963_vm11 = vmmov %vm5916_vm0 }
 0x205   : > { %2832 = vst.msk [vmem:[%s5295_s12 + $0x18] sm:$0xf] %vm2825_vm3, %v3234_v45  ;;  %v3392_v36 = vpop.f32.mrb[25].mxu0  ;;  %v2933_v59 = vmul.f32 %v2595_v15, %v2595_v15  ;;  %v2866_v23 = vadd.f32 %v2865_v37, %v2864_v57  ;;  %v2965_v26 = vadd.f32 %v2964_v9, %v2963_v7  ;;  %v3235_v40 = vpack.c.bf16 %v2598_v2, %v2598_v2 }
 0x206   : > { %2830 = vst.msk [vmem:[%s5295_s12 + $0x10] sm:$0xf] %vm2825_vm3, %v3232_v56  ;;  %v2966_v62 = vsel %vm5951_vm7, %v2931_v24, 0.0  ;;  %v3393_v61 = vadd.f32 %v3392_v36, %v3391_v18  ;;  %v3394_v4 = vpop.f32.mrb[26].mxu0  ;;  %v3233_v44 = vpack.c.bf16 %v2590_v53, %v2590_v53  ;;  %v2867_v34 = vsel %vm5952_vm8, %v2590_v53, 0.0  ;;  %vm5965_vm7 = vmmov %vm5916_vm0 }
 0x207   : > { %v3395_v63 = vpop.f32.mrb[27].mxu0  ;;  %v2932_v49 = vmul.f32 %v2590_v53, %v2590_v53  ;;  %v2967_v14 = vadd.f32 %v2966_v62, %v2965_v26  ;;  %2833 = vst.msk [vmem:[%s5295_s12 + $0x1c] sm:$0xf] %vm2825_vm3, %v3235_v40  ;;  %v2868_v55 = vadd.f32 %v2867_v34, %v2866_v23  ;;  %v2869_v48 = vsel %vm5953_vm12, %v2595_v15, 0.0  ;;  %vm5966_vm8 = vmmov %vm5916_vm0 }
 0x208   : > { %v3483_v0 = vpop.f32.mrb[24].mxu1  ;;  %v3396_v5 = vadd.f32 %v3395_v63, %v3394_v4  ;;  %v2934_v31 = vmul.f32 %v2598_v2, %v2598_v2  ;;  %2831 = vst.msk [vmem:[%s5295_s12 + $0x14] sm:$0xf] %vm2825_vm3, %v3233_v44  ;;  %v2970_v25 = vsel %vm5955_vm1, %v2933_v59, 0.0  ;;  %vm5967_vm12 = vmmov %vm5916_vm0 }
 0x209   : > { %v2611_v60 = vadd.f32 %v3483_v0, %v5297_v6  ;;  %v2602_v54 = vpop.f32.mrb[25].mxu1  ;;  %v2968_v1 = vsel %vm5954_vm4, %v2932_v49, 0.0  ;;  %v2870_v38 = vadd.f32 %v2869_v48, %v2868_v55  ;;  %v2871_v6 = vsel %vm5956_vm6, %v2598_v2, 0.0  ;;  %vm5968_vm4 = vmmov %vm5916_vm0 }
 0x20a   : > { %v2603_v51 = vadd.f32 %v5282_v47, %v2602_v54  ;;  %v3484_v19 = vpop.f32.mrb[26].mxu1  ;;  %v2969_v29 = vadd.f32 %v2968_v1, %v2967_v14  ;;  %v2972_v11 = vsel %vm5958_vm9, %v2934_v31, 0.0  ;;  %vm5969_vm1 = vmmov %vm5916_vm0 }
 0x20b   : > { %v3238_v16 = vpack.c.bf16 %v2611_v60, %v2611_v60  ;;  %v2605_v46 = vpop.f32.mrb[27].mxu1  ;;  %v2872_v21 = vadd.f32 %v2871_v6, %v2870_v38  ;;  %v2614_v47 = vadd.f32 %v3484_v19, %v5299_v28  ;;  %v2937_v33 = vmul.f32 %v2611_v60, %v2611_v60  ;;  %vm5970_vm6 = vmmov %vm5916_vm0 }
 0x20c   : > { %v3236_v39 = vpack.c.bf16 %v2603_v51, %v2603_v51  ;;  %v2873_v32 = vsel %vm5957_vm10, %v2603_v51, 0.0  ;;  %v2935_v15 = vmul.f32 %v2603_v51, %v2603_v51  ;;  %v2971_v12 = vadd.f32 %v2970_v25, %v2969_v29  ;;  %vm5971_vm10 = vmmov %vm5916_vm0 }
 0x20d   : > { %2836 = vst.msk [vmem:[%s5295_s12 + $0x28] sm:$0xf] %vm2825_vm3, %v3238_v16  ;;  %v2606_v17 = vadd.f32 %v5284_v43, %v2605_v46  ;;  %v2874_v20 = vadd.f32 %v2873_v32, %v2872_v21  ;;  %v3239_v52 = vpack.c.bf16 %v2614_v47, %v2614_v47  ;;  %v2877_v37 = vsel %vm5961_vm2, %v2611_v60, 0.0  ;;  %vm5972_vm9 = vmmov %vm5916_vm0 }
 0x20e   : > { %2834 = vst.msk [vmem:[%s5295_s12 + $0x20] sm:$0xf] %vm2825_vm3, %v3236_v39  ;;  %v2974_v22 = vsel %vm5959_vm15, %v2935_v15, 0.0  ;;  %v2973_v50 = vadd.f32 %v2972_v11, %v2971_v12  ;;  %v2938_v57 = vmul.f32 %v2614_v47, %v2614_v47  ;;  %v2978_v4 = vsel %vm5962_vm14, %v2937_v33, 0.0  ;;  %vm5973_vm15 = vmmov %vm5916_vm0 }
 0x20f   : > { %v3237_v45 = vpack.c.bf16 %v2606_v17, %v2606_v17  ;;  %v2875_v35 = vsel %vm5960_vm5, %v2606_v17, 0.0  ;;  %v2936_v30 = vmul.f32 %v2606_v17, %v2606_v17  ;;  %2837 = vst.msk [vmem:[%s5295_s12 + $0x2c] sm:$0xf] %vm2825_vm3, %v3239_v52  ;;  %v2879_v59 = vsel %vm5963_vm11, %v2614_v47, 0.0  ;;  %vm5974_vm5 = vmmov %vm5916_vm0 }
 0x210   : > { %v3397_v56 = vpop.f32.mrb[28].mxu0  ;;  %v3487_v28 = vpop.f32.mrb[28].mxu1  ;;  %v2975_v43 = vadd.f32 %v2974_v22, %v2973_v50  ;;  %v2876_v24 = vadd.f32 %v2875_v35, %v2874_v20  ;;  %v2980_v54 = vsel %vm5965_vm7, %v2938_v57, 0.0  ;;  %vm5975_vm2 = vmmov %vm5916_vm0 }
 0x211   : > { %v3398_v18 = vpop.f32.mrb[29].mxu0  ;;  %v2618_v7 = vpop.f32.mrb[29].mxu1  ;;  %2835 = vst.msk [vmem:[%s5295_s12 + $0x24] sm:$0xf] %vm2825_vm3, %v3237_v45  ;;  %v2976_v2 = vsel %vm5916_vm0, %v2936_v30, 0.0  ;;  %vm5976_vm14 = vmmov %vm5916_vm0 }
 0x212   : > { %v3399_v53 = vadd.f32 %v3398_v18, %v3397_v56  ;;  %v2619_v36 = vadd.f32 %v3393_v61, %v2618_v7  ;;  %v3400_v9 = vpop.f32.mrb[30].mxu0  ;;  %v3488_v62 = vpop.f32.mrb[30].mxu1  ;;  %v2878_v23 = vadd.f32 %v2877_v37, %v2876_v24  ;;  %v2977_v26 = vadd.f32 %v2976_v2, %v2975_v43  ;;  %vm5977_vm11 = vmmov %vm5916_vm0 }
 0x213   : > { %v3401_v40 = vpop.f32.mrb[31].mxu0  ;;  %v2621_v63 = vpop.f32.mrb[31].mxu1  ;;  %vm5979_vm7 = vmmov %vm5916_vm0 }
 0x214   : > { %v2627_v44 = vadd.f32 %v3487_v28, %v3399_v53  ;;  %v3240_v34 = vpack.c.bf16 %v2619_v36, %v2619_v36  ;;  %v2881_v49 = vsel %vm5964_vm13, %v2619_v36, 0.0  ;;  %v2939_v0 = vmul.f32 %v2619_v36, %v2619_v36  ;;  %vm5978_vm13 = vmmov %vm5916_vm0 }
 0x215   : > { %v2979_v14 = vadd.f32 %v2978_v4, %v2977_v26  ;;  %v2880_v55 = vadd.f32 %v2879_v59, %v2878_v23  ;;  %v3402_v61 = vadd.f32 %v3401_v40, %v3400_v9  ;;  %v2622_v60 = vadd.f32 %v3396_v5, %v2621_v63 }
 0x216   : > { %v3242_v48 = vpack.c.bf16 %v2627_v44, %v2627_v44  ;;  %2838 = vst.msk [vmem:[%s5295_s12 + $0x30] sm:$0xf] %vm2825_vm3, %v3240_v34  ;;  %v2982_v31 = vsel %vm5966_vm8, %v2939_v0, 0.0  ;;  %v2941_v38 = vmul.f32 %v2627_v44, %v2627_v44  ;;  %v2885_v47 = vsel %vm5969_vm1, %v2627_v44, 0.0  ;;  %vm5980_vm8 = vmmov %vm5916_vm0 }
 0x217   : > { %v2882_v1 = vadd.f32 %v2881_v49, %v2880_v55  ;;  %v2981_v51 = vadd.f32 %v2980_v54, %v2979_v14  ;;  %v2630_v19 = vadd.f32 %v3488_v62, %v3402_v61  ;;  %v3241_v25 = vpack.c.bf16 %v2622_v60, %v2622_v60  ;;  %vm5983_vm1 = vmmov %vm5916_vm0 }
 0x218   : > { %2840 = vst.msk [vmem:[%s5295_s12 + $0x38] sm:$0xf] %vm2825_vm3, %v3242_v48  ;;  %v2883_v29 = vsel %vm5967_vm12, %v2622_v60, 0.0  ;;  %v2940_v16 = vmul.f32 %v2622_v60, %v2622_v60  ;;  %v3491_v5 = vpop.f32.mrb[32].mxu1  ;;  %v2986_v22 = vsel %vm5970_vm6, %v2941_v38, 0.0  ;;  %vm5981_vm12 = vmmov %vm5916_vm0 }
 0x219   : > { %v2983_v46 = vadd.f32 %v2982_v31, %v2981_v51  ;;  %v3243_v6 = vpack.c.bf16 %v2630_v19, %v2630_v19  ;;  %2839 = vst.msk [vmem:[%s5295_s12 + $0x34] sm:$0xf] %vm2825_vm3, %v3241_v25  ;;  %v2634_v39 = vpop.f32.mrb[33].mxu1  ;;  %v2942_v32 = vmul.f32 %v2630_v19, %v2630_v19  ;;  %v2884_v15 = vadd.f32 %v2883_v29, %v2882_v1  ;;  %vm5984_vm6 = vmmov %vm5916_vm0 }
 0x21a   : > { %v2984_v12 = vsel %vm5968_vm4, %v2940_v16, 0.0  ;;  %v5367_v21 = vpop.f32.mrb[34].mxu1  ;;  %v2887_v50 = vsel %vm5971_vm10, %v2630_v19, 0.0  ;;  %vm5982_vm4 = vmmov %vm5916_vm0 }
 0x21b   : > { %2841 = vst.msk [vmem:[%s5295_s12 + $0x3c] sm:$0xf] %vm2825_vm3, %v3243_v6  ;;  %v2985_v17 = vadd.f32 %v2984_v12, %v2983_v46  ;;  %v2637_v11 = vpop.f32.mrb[35].mxu1  ;;  %v2886_v33 = vadd.f32 %v2885_v47, %v2884_v15  ;;  %v2988_v35 = vsel %vm5972_vm9, %v2942_v32, 0.0  ;;  %vm5985_vm10 = vmmov %vm5916_vm0 }
 0x21c   : > { %v3403_v20 = vpop.f32.mrb[32].mxu0  ;;  %vm5986_vm9 = vmmov %vm5916_vm0 }
 0x21d   : > { %v2987_v52 = vadd.f32 %v2986_v22, %v2985_v17  ;;  %v3404_v45 = vpop.f32.mrb[33].mxu0  ;;  %v2888_v28 = vadd.f32 %v2887_v50, %v2886_v33 }
 0x21e   : > { %v3405_v30 = vadd.f32 %v3404_v45, %v3403_v20  ;;  %v3406_v56 = vpop.f32.mrb[34].mxu0 }
 0x21f   : > { %v3407_v37 = vpop.f32.mrb[35].mxu0  ;;  %v2989_v43 = vadd.f32 %v2988_v35, %v2987_v52 }
 0x220   : > { %v3408_v24 = vadd.f32 %v3407_v37, %v3406_v56  ;;  %v2635_v18 = vadd.f32 %v3405_v30, %v2634_v39  ;;  %v5375_v7 = vpop.f32.mrb[36].mxu1 }
 0x221   : > { %v5377_v57 = vpop.f32.mrb[37].mxu1 }
 0x222   : > { %v3244_v2 = vpack.c.bf16 %v2635_v18, %v2635_v18  ;;  %v2889_v53 = vsel %vm5973_vm15, %v2635_v18, 0.0  ;;  %v2943_v36 = vmul.f32 %v2635_v18, %v2635_v18  ;;  %v2638_v9 = vadd.f32 %v3408_v24, %v2637_v11  ;;  %v5380_v62 = vpop.f32.mrb[38].mxu1  ;;  %vm5987_vm15 = vmmov %vm5916_vm0 }
 0x223   : > { %v2890_v4 = vadd.f32 %v2889_v53, %v2888_v28  ;;  %v5382_v59 = vpop.f32.mrb[39].mxu1 }
 0x224   : > { %2842 = vst.msk [vmem:[%s5295_s12 + $0x40] sm:$0xf] %vm2825_vm3, %v3244_v2  ;;  %v2990_v23 = vsel %vm5974_vm5, %v2943_v36, 0.0  ;;  %v3245_v26 = vpack.c.bf16 %v2638_v9, %v2638_v9  ;;  %v2891_v40 = vsel %vm5975_vm2, %v2638_v9, 0.0  ;;  %v2944_v63 = vmul.f32 %v2638_v9, %v2638_v9  ;;  %vm5988_vm5 = vmmov %vm5916_vm0 }
 0x225   : > { %v2991_v44 = vadd.f32 %v2990_v23, %v2989_v43  ;;  %v2892_v34 = vadd.f32 %v2891_v40, %v2890_v4  ;;  %vm5989_vm2 = vmmov %vm5916_vm0 }
 0x226   : > { %2843 = vst.msk [vmem:[%s5295_s12 + $0x44] sm:$0xf] %vm2825_vm3, %v3245_v26  ;;  %v2992_v49 = vsel %vm5916_vm0, %v2944_v63, 0.0 }
 0x227   : > { %v2993_v0 = vadd.f32 %v2992_v49, %v2991_v44 }
 0x228   : > { %v3409_v14 = vpop.f32.mrb[36].mxu0  ;;  %v3499_v55 = vpop.f32.mrb[40].mxu1 }
 0x229   : > { %v5392_v61 = vadd.f32 %v3499_v55, %v5272_v41  ;;  %v3410_v60 = vpop.f32.mrb[37].mxu0  ;;  %v2666_v54 = vpop.f32.mrb[41].mxu1 }
 0x22a   : > { %v3411_v48 = vadd.f32 %v3410_v60, %v3409_v14  ;;  %v5395_v31 = vadd.f32 %v5264_v8, %v2666_v54  ;;  %v3412_v1 = vpop.f32.mrb[38].mxu0  ;;  %v3500_v51 = vpop.f32.mrb[42].mxu1 }
 0x22b   : > { %v3254_v19 = vpack.c.bf16 %v5392_v61, %v5392_v61  ;;  %v5400_v25 = vadd.f32 %v3500_v51, %v5274_v42  ;;  %v3413_v38 = vpop.f32.mrb[39].mxu0  ;;  %v2669_v41 = vpop.f32.mrb[43].mxu1 }
 0x22c   : > { %v2643_v29 = vadd.f32 %v3491_v5, %v3411_v48  ;;  %v3252_v16 = vpack.c.bf16 %v5395_v31, %v5395_v31  ;;  %v3414_v42 = vadd.f32 %v3413_v38, %v3412_v1  ;;  %v5414_v5 = vadd.f32 %v5266_v13, %v2669_v41 }
 0x22d   : > { %2852 = vst.msk [vmem:[%s5295_s12 + $0x68] sm:$0xf] %vm2825_vm3, %v3254_v19  ;;  %v3255_v8 = vpack.c.bf16 %v5400_v25, %v5400_v25 }
 0x22e   : > { %v3246_v46 = vpack.c.bf16 %v2643_v29, %v2643_v29  ;;  %v2893_v6 = vsel %vm5976_vm14, %v2643_v29, 0.0  ;;  %v2945_v39 = vmul.f32 %v2643_v29, %v2643_v29  ;;  %2850 = vst.msk [vmem:[%s5295_s12 + $0x60] sm:$0xf] %vm2825_vm3, %v3252_v16  ;;  %v2646_v17 = vadd.f32 %v5367_v21, %v3414_v42  ;;  %vm5990_vm14 = vmmov %vm5916_vm0 }
 0x22f   : > { %v2894_v32 = vadd.f32 %v2893_v6, %v2892_v34  ;;  %2853 = vst.msk [vmem:[%s5295_s12 + $0x6c] sm:$0xf] %vm2825_vm3, %v3255_v8  ;;  %v3253_v11 = vpack.c.bf16 %v5414_v5, %v5414_v5 }
 0x230   : > { %2844 = vst.msk [vmem:[%s5295_s12 + $0x48] sm:$0xf] %vm2825_vm3, %v3246_v46  ;;  %v2994_v15 = vsel %vm5977_vm11, %v2945_v39, 0.0  ;;  %v3503_v12 = vpop.f32.mrb[44].mxu1  ;;  %v3247_v50 = vpack.c.bf16 %v2646_v17, %v2646_v17  ;;  %v2895_v52 = vsel %vm5978_vm13, %v2646_v17, 0.0  ;;  %v2946_v45 = vmul.f32 %v2646_v17, %v2646_v17  ;;  %vm5992_vm11 = vmmov %vm5916_vm0 }
 0x231   : > { %v2995_v47 = vadd.f32 %v2994_v15, %v2993_v0  ;;  %v2682_v22 = vpop.f32.mrb[45].mxu1  ;;  %v5423_v33 = vadd.f32 %v3503_v12, %v5286_v10  ;;  %2851 = vst.msk [vmem:[%s5295_s12 + $0x64] sm:$0xf] %vm2825_vm3, %v3253_v11  ;;  %v2896_v30 = vadd.f32 %v2895_v52, %v2894_v32  ;;  %v2951_v46 = vmul.f32 %v5395_v31, %v5395_v31  ;;  %vm5993_vm13 = vmmov %vm5916_vm0 }
 0x232   : > { %v5426_v20 = vadd.f32 %v5278_v27, %v2682_v22  ;;  %v3504_v13 = vpop.f32.mrb[46].mxu1  ;;  %2845 = vst.msk [vmem:[%s5295_s12 + $0x4c] sm:$0xf] %vm2825_vm3, %v3247_v50  ;;  %v2996_v56 = vsel %vm5979_vm7, %v2946_v45, 0.0  ;;  %v2907_v52 = vsel %vm5916_vm0, %v5414_v5, 0.0  ;;  %vm5994_vm7 = vmmov %vm5916_vm0 }
 0x233   : > { %v5432_v21 = vadd.f32 %v3504_v13, %v5288_v3  ;;  %v2685_v35 = vpop.f32.mrb[47].mxu1  ;;  %v3258_v10 = vpack.c.bf16 %v5423_v33, %v5423_v33  ;;  %v2997_v43 = vadd.f32 %v2996_v56, %v2995_v47  ;;  %v2905_v47 = vsel %vm5987_vm15, %v5395_v31, 0.0  ;;  %vm6002_vm15 = vmmov %vm5916_vm0 }
 0x234   : > { %v3415_v27 = vpop.f32.mrb[40].mxu0  ;;  %v3256_v28 = vpack.c.bf16 %v5426_v20, %v5426_v20  ;;  %v5448_v18 = vadd.f32 %v5280_v58, %v2685_v35  ;;  %v2953_v13 = vmul.f32 %v5392_v61, %v5392_v61  ;;  %v3006_v50 = vsel %vm5989_vm2, %v2951_v46, 0.0 }
 0x235   : > { %v3416_v37 = vpop.f32.mrb[41].mxu0  ;;  %2856 = vst.msk [vmem:[%s5295_s12 + $0x78] sm:$0xf] %vm2825_vm3, %v3258_v10  ;;  %v3259_v3 = vpack.c.bf16 %v5432_v21, %v5432_v21  ;;  %v2909_v31 = vsel %vm5990_vm14, %v5392_v61, 0.0  ;;  %vm6004_vm2 = vcmask 254976  }
 0x236   : > { %v3418_v24 = vpop.f32.mrb[42].mxu0  ;;  %2854 = vst.msk [vmem:[%s5295_s12 + $0x70] sm:$0xf] %vm2825_vm3, %v3256_v28  ;;  %v3417_v2 = vadd.f32 %v3416_v37, %v3415_v27  ;;  %v3257_v9 = vpack.c.bf16 %v5448_v18, %v5448_v18  ;;  %v3010_v28 = vsel %vm5992_vm11, %v2953_v13, 0.0  ;;  %v2911_v37 = vsel %vm5993_vm13, %v5400_v25, 0.0 }
 0x237   : > { %v3419_v53 = vpop.f32.mrb[43].mxu0  ;;  %2857 = vst.msk [vmem:[%s5295_s12 + $0x7c] sm:$0xf] %vm2825_vm3, %v3259_v3 }
 0x238   : > { %v3420_v36 = vadd.f32 %v3419_v53, %v3418_v24  ;;  %v2651_v4 = vadd.f32 %v3417_v2, %v5377_v57  ;;  %2855 = vst.msk [vmem:[%s5295_s12 + $0x74] sm:$0xf] %vm2825_vm3, %v3257_v9  ;;  %v2956_v2 = vmul.f32 %v5448_v18, %v5448_v18  ;;  %v2957_v9 = vmul.f32 %v5423_v33, %v5423_v33 }
 0x23a   : > { %v2654_v23 = vadd.f32 %v3420_v36, %v5382_v59  ;;  %v3248_v26 = vpack.c.bf16 %v2651_v4, %v2651_v4  ;;  %v2897_v58 = vsel %vm5980_vm8, %v2651_v4, 0.0  ;;  %v2947_v40 = vmul.f32 %v2651_v4, %v2651_v4  ;;  %vm5995_vm8 = vmmov %vm5916_vm0 }
 0x23b   : > { %v2898_v44 = vadd.f32 %v2897_v58, %v2896_v30  ;;  %v2954_v30 = vmul.f32 %v5400_v25, %v5400_v25  ;;  %v2913_v61 = vsel %vm5995_vm8, %v5426_v20, 0.0 }
 0x23c   : > { %v3249_v63 = vpack.c.bf16 %v2654_v23, %v2654_v23  ;;  %v2899_v34 = vsel %vm5981_vm12, %v2654_v23, 0.0  ;;  %v2948_v49 = vmul.f32 %v2654_v23, %v2654_v23  ;;  %2846 = vst.msk [vmem:[%s5295_s12 + $0x50] sm:$0xf] %vm2825_vm3, %v3248_v26  ;;  %v2998_v0 = vsel %vm5982_vm4, %v2947_v40, 0.0  ;;  %vm5996_vm12 = vmmov %vm5916_vm0 }
 0x23d   : > { %v2999_v57 = vadd.f32 %v2998_v0, %v2997_v43  ;;  %v2900_v14 = vadd.f32 %v2899_v34, %v2898_v44  ;;  %v3012_v24 = vsel %vm5994_vm7, %v2954_v30, 0.0  ;;  %vm5997_vm4 = vmmov %vm5916_vm0 }
 0x23e   : > { %2847 = vst.msk [vmem:[%s5295_s12 + $0x54] sm:$0xf] %vm2825_vm3, %v3249_v63  ;;  %v3000_v59 = vsel %vm5983_vm1, %v2948_v49, 0.0  ;;  %v2915_v4 = vsel %vm5997_vm4, %v5448_v18, 0.0  ;;  %vm5998_vm1 = vmmov %vm5916_vm0 }
 0x23f   : > { %v3001_v60 = vadd.f32 %v3000_v59, %v2999_v57  ;;  %v2917_v58 = vsel %vm5998_vm1, %v5423_v33, 0.0 }
 0x240   : > { %v3421_v55 = vpop.f32.mrb[44].mxu0 }
 0x241   : > { %v3422_v54 = vpop.f32.mrb[45].mxu0 }
 0x242   : > { %v3423_v48 = vadd.f32 %v3422_v54, %v3421_v55  ;;  %v3424_v1 = vpop.f32.mrb[46].mxu0 }
 0x243   : > { %v3425_v51 = vpop.f32.mrb[47].mxu0 }
 0x244   : > { %v2659_v19 = vadd.f32 %v5375_v7, %v3423_v48  ;;  %v3426_v38 = vadd.f32 %v3425_v51, %v3424_v1 }
 0x246   : > { %v3250_v41 = vpack.c.bf16 %v2659_v19, %v2659_v19  ;;  %v2901_v29 = vsel %vm5984_vm6, %v2659_v19, 0.0  ;;  %v2949_v16 = vmul.f32 %v2659_v19, %v2659_v19  ;;  %v2662_v8 = vadd.f32 %v5380_v62, %v3426_v38  ;;  %vm5999_vm6 = vmmov %vm5916_vm0 }
 0x247   : > { %v2902_v6 = vadd.f32 %v2901_v29, %v2900_v14  ;;  %v2952_v62 = vmul.f32 %v5414_v5, %v5414_v5  ;;  %v2955_v5 = vmul.f32 %v5426_v20, %v5426_v20  ;;  %v2958_v20 = vmul.f32 %v5432_v21, %v5432_v21 }
 0x248   : > { %2848 = vst.msk [vmem:[%s5295_s12 + $0x58] sm:$0xf] %vm2825_vm3, %v3250_v41  ;;  %v3002_v39 = vsel %vm5985_vm10, %v2949_v16, 0.0  ;;  %v3251_v32 = vpack.c.bf16 %v2662_v8, %v2662_v8  ;;  %v2903_v42 = vsel %vm5986_vm9, %v2662_v8, 0.0  ;;  %v2950_v7 = vmul.f32 %v2662_v8, %v2662_v8  ;;  %vm6000_vm10 = vmmov %vm5916_vm0 }
 0x249   : > { %v3003_v15 = vadd.f32 %v3002_v39, %v3001_v60  ;;  %v2904_v12 = vadd.f32 %v2903_v42, %v2902_v6  ;;  %v3014_v25 = vsel %vm5996_vm12, %v2955_v5, 0.0  ;;  %v3016_v40 = vsel %vm5999_vm6, %v2956_v2, 0.0  ;;  %vm6001_vm9 = vmmov %vm5916_vm0 }
 0x24a   : > { %2849 = vst.msk [vmem:[%s5295_s12 + $0x5c] sm:$0xf] %vm2825_vm3, %v3251_v32  ;;  %v3004_v17 = vsel %vm5988_vm5, %v2950_v7, 0.0  ;;  %vm5991_vm3 = vmmov %vm5916_vm0  ;;  %v3018_v34 = vsel %vm6000_vm10, %v2957_v9, 0.0  ;;  %v2919_v49 = vsel %vm6001_vm9, %v5432_v21, 0.0  ;;  %v3020_v57 = vsel %vm6002_vm15, %v2958_v20, 0.0 }
 0x24b   : > { %v2906_v11 = vadd.f32 %v2905_v47, %v2904_v12  ;;  %v3005_v22 = vadd.f32 %v3004_v17, %v3003_v15  ;;  %v3008_v10 = vsel %vm5991_vm3, %v2952_v62, 0.0  ;;  %vm6003_vm5 = vcmask 1040384  }
 0x24d   : > { %v2908_v45 = vadd.f32 %v2907_v52, %v2906_v11  ;;  %v3007_v35 = vadd.f32 %v3006_v50, %v3005_v22 }
 0x24f   : > { %v2910_v27 = vadd.f32 %v2909_v31, %v2908_v45  ;;  %v3009_v56 = vadd.f32 %v3008_v10, %v3007_v35 }
 0x251   : > { %v2912_v43 = vadd.f32 %v2911_v37, %v2910_v27  ;;  %v3011_v3 = vadd.f32 %v3010_v28, %v3009_v56 }
 0x253   : > { %v2914_v53 = vadd.f32 %v2913_v61, %v2912_v43  ;;  %v3013_v36 = vadd.f32 %v3012_v24, %v3011_v3 }
 0x255   : > { %v2916_v23 = vadd.f32 %v2915_v4, %v2914_v53  ;;  %v3015_v26 = vadd.f32 %v3014_v25, %v3013_v36 }
 0x257   : > { %v2918_v63 = vadd.f32 %v2917_v58, %v2916_v23  ;;  %v3017_v44 = vadd.f32 %v3016_v40, %v3015_v26 }
 0x259   : > { %v2920_v0 = vadd.f32 %v2919_v49, %v2918_v63  ;;  %v3019_v18 = vadd.f32 %v3018_v34, %v3017_v44 }
 0x25b   : > { %v2921_v14 = vrot.slane %v2920_v0, 4  ;;  %v3021_v59 = vadd.f32 %v3020_v57, %v3019_v18 }
 0x25d   : > { %v2922_v33 = vadd.f32 %v2921_v14, %v2920_v0  ;;  %v3022_v55 = vrot.slane %v3021_v59, 4 }
 0x25f   : > { %v2923_v60 = vrot.slane %v2922_v33, 2  ;;  %v3023_v54 = vadd.f32 %v3022_v55, %v3021_v59 }
 0x261   : > { %v2924_v48 = vadd.f32 %v2923_v60, %v2922_v33  ;;  %v3024_v1 = vrot.slane %v3023_v54, 2 }
 0x263   : > { %v2925_v51 = vrot.slane %v2924_v48, 1  ;;  %v3025_v19 = vadd.f32 %v3024_v1, %v3023_v54 }
 0x265   : > { %v3026_v38 = vrot.slane %v3025_v19, 1  ;;  %v2926_v21 = vadd.f32 %v2925_v51, %v2924_v48 }
 0x267   : > { %v3027_v41 = vadd.f32 %v3026_v38, %v3025_v19 }
 0x269   : > { %v3029_v29 = vsel %vm6003_vm5, %v2926_v21, %v3027_v41 }
 0x26a   : > { %3030 = vst.msk [vmem:[%s262_s15] sm:$0x3] %vm6004_vm2, %v3029_v29 }
 0x26b PF: > { %s17_s21 = sadd.s32 1, %s3561_s21  }
 0x26c   : > { %p14_p4 = scmp.ge.s32.totalorder %s17_s21, 4  }
 0x26e   :  { %16 = sbr.rel (!%p14_p4) target bundleno = 1 (0x1), region = 82 }

</bundles_post_ra>
